<compile_context>
chip_gen: v7x
topology: tpu7x:2x2x1
jax: 0.10.0
libtpu: 0.0.40
codegen_flags: <defaults>
</compile_context>

<pallas_src>
import functools

import jax
import jax.numpy as jnp
from jax.experimental import pallas as pl
from jax.experimental.pallas import tpu as pltpu

# ---- model hyper-parameters (consistent with the PyTorch module) -----------
N_EMB = 32          # hard-coded 32 in SelfAttentionModel
N_HEADS = 4
HEAD_SIZE = 32      # total head size; per-head dim = HEAD_SIZE // N_HEADS = 8
HD = HEAD_SIZE // N_HEADS
N_BLOCKS = 4
BLOCK_SIZE = 8      # T (sequence length / block_size)
VOCAB = 64
BATCH = 2
FF_HIDDEN = 4 * N_EMB
LN_EPS = 1e-5
NEG_INF = -1e30

# packed per-block vector offsets inside blkvec (N_BLOCKS, 6*C + 4C)
_OFF_LN1G = 0 * N_EMB
_OFF_LN1B = 1 * N_EMB
_OFF_BPROJ = 2 * N_EMB
_OFF_LN2G = 3 * N_EMB
_OFF_LN2B = 4 * N_EMB
_OFF_B2 = 5 * N_EMB
_OFF_B1 = 6 * N_EMB
BLKVEC_W = 6 * N_EMB + FF_HIDDEN                 # 320

# packed per-block matrix lane-offsets inside blkmat (N_BLOCKS, C, 3*HS + C + 4C)
_MOFF_QKV = 0
_MOFF_PROJ = 3 * HEAD_SIZE                        # 96
_MOFF_W1 = 3 * HEAD_SIZE + N_EMB                  # 128
BLKMAT_W = 3 * HEAD_SIZE + N_EMB + FF_HIDDEN      # 256


def _layer_norm(x, g, b):
    mu = jnp.mean(x, axis=-1, keepdims=True)
    var = jnp.mean((x - mu) ** 2, axis=-1, keepdims=True)
    return (x - mu) * jax.lax.rsqrt(var + LN_EPS) * g + b


def transformer_kernel(
    tok_ref,        # (B*T, 1) int32 token ids
    emb_ref,        # (VOCAB + B*T, C): [tok_emb ; pos_emb tiled to B*T]
    blkvec_ref,     # (N_BLOCKS, 320): [ln1g|ln1b|bproj|ln2g|ln2b|b2|b1]
    blkmat_ref,     # (N_BLOCKS, C, 256): [wqkv(96)|wproj(32)|w1(128)]
    w2_ref,         # (N_BLOCKS, 4C, C)
    headvec_ref,    # (1, 128): [lnfg(32)|lnfb(32)|blm(64)]
    wlm_ref,        # (C, VOCAB)
    out_ref,        # (T, B*VOCAB) lane-dense logits slab
    *, B, T,
):
    BT = B * T
    HBT = N_HEADS * BT
    C = N_EMB

    # ---- fused embedding gather: one_hot(tokens) @ tok_emb (exact) --------
    tok = tok_ref[...]                                               # (BT, 1) i32
    vocab_iota = jax.lax.broadcasted_iota(jnp.int32, (BT, VOCAB), 1)
    onehot = (tok == vocab_iota).astype(jnp.float32)                 # (BT, V)
    x = jnp.dot(onehot, emb_ref[0:VOCAB, :],
                preferred_element_type=jnp.float32)                  # (BT, C)
    x = x + emb_ref[VOCAB:VOCAB + BT, :]                             # pre-tiled pos emb

    # ---- merged-head additive mask (HBT, HBT), built ONCE -------------------
    # flat row/col index = head*BT + batch*T + t (all powers of two: shift/and).
    log2t = T.bit_length() - 1
    log2bt = BT.bit_length() - 1
    row = jax.lax.broadcasted_iota(jnp.int32, (HBT, HBT), 0)
    col = jax.lax.broadcasted_iota(jnp.int32, (HBT, HBT), 1)
    same_head = (row >> log2bt) == (col >> log2bt)
    same_batch = ((row >> log2t) & (B - 1)) == ((col >> log2t) & (B - 1))
    causal = (row & (T - 1)) >= (col & (T - 1))
    mask_add = jnp.where(same_head & same_batch & causal,
                         jnp.float32(0.0), jnp.float32(NEG_INF))     # (HBT, HBT)

    for blk in range(N_BLOCKS):
        # ---- multi-head self-attention (pre-LN, residual) ------------------
        h = _layer_norm(x,
                        blkvec_ref[blk, _OFF_LN1G:_OFF_LN1G + C],
                        blkvec_ref[blk, _OFF_LN1B:_OFF_LN1B + C])    # (BT, C)

        # fused QKV projection: one (BT, C) x (C, 3*HS) MXU push
        qkv = jnp.dot(h, blkmat_ref[blk, :, _MOFF_QKV:_MOFF_QKV + 3 * HEAD_SIZE],
                      preferred_element_type=jnp.float32)            # (BT, 96)

        # merge heads onto the sublane axis: (H*BT, HD), head-major rows
        def split_heads(base):
            return jnp.concatenate(
                [qkv[:, base + hh * HD: base + (hh + 1) * HD]
                 for hh in range(N_HEADS)], axis=0)
        qs = split_heads(0)                                          # (HBT, HD)
        ks = split_heads(HEAD_SIZE)
        vs = split_heads(2 * HEAD_SIZE)

        # ONE 2-D score matmul + ONE 2-D softmax + ONE value matmul for all heads
        s = jnp.einsum('qd,kd->qk', qs, ks,
                       preferred_element_type=jnp.float32)           # (HBT, HBT)
        s = s + mask_add                                             # un-scaled, like module
        p = jnp.exp(s - jnp.max(s, axis=-1, keepdims=True))
        denom = jnp.sum(p, axis=-1, keepdims=True)
        r = pl.reciprocal(denom, approx=True)
        r = r * (2.0 - denom * r)        # one Newton-Raphson step (VPU), ~1e-7 rel err
        p = p * r
        o = jnp.dot(p, vs, preferred_element_type=jnp.float32)       # (HBT, HD)

        # un-merge heads back to (BT, HEAD_SIZE)
        attn = jnp.concatenate(
            [o[hh * BT:(hh + 1) * BT, :] for hh in range(N_HEADS)], axis=1)

        # output projection + residual; dropout = identity
        x = x + jnp.dot(attn, blkmat_ref[blk, :, _MOFF_PROJ:_MOFF_PROJ + C],
                        preferred_element_type=jnp.float32) \
              + blkvec_ref[blk, _OFF_BPROJ:_OFF_BPROJ + C]

        # ---- feed-forward (pre-LN, residual) --------------------------------
        h2 = _layer_norm(x,
                         blkvec_ref[blk, _OFF_LN2G:_OFF_LN2G + C],
                         blkvec_ref[blk, _OFF_LN2B:_OFF_LN2B + C])
        f = jnp.dot(h2, blkmat_ref[blk, :, _MOFF_W1:_MOFF_W1 + FF_HIDDEN],
                    preferred_element_type=jnp.float32) \
            + blkvec_ref[blk, _OFF_B1:_OFF_B1 + FF_HIDDEN]
        f = jnp.maximum(f, 0.0)
        x = x + jnp.dot(f, w2_ref[blk], preferred_element_type=jnp.float32) \
              + blkvec_ref[blk, _OFF_B2:_OFF_B2 + C]

    # ---- final LN + lm_head: per-batch dots into lane-dense (T, B*V) slab ----
    xn = _layer_norm(x, headvec_ref[0, 0:C], headvec_ref[0, C:2 * C])
    wlm = wlm_ref[...]
    blm = headvec_ref[0, 2 * C:2 * C + VOCAB]
    halves = [jnp.dot(xn[b * T:(b + 1) * T, :], wlm,
                      preferred_element_type=jnp.float32) + blm
              for b in range(B)]
    out_ref[...] = jnp.concatenate(halves, axis=1)                   # (T, B*V) unmasked vst


def init_params(key):
    ks = jax.random.split(key, 20)
    s = 0.02
    return {
        'tok_emb': jax.random.normal(ks[0], (VOCAB, N_EMB), jnp.float32) * s,
        'pos_emb': jax.random.normal(ks[1], (BLOCK_SIZE, N_EMB), jnp.float32) * s,
        'ln1g': jnp.ones((N_BLOCKS, N_EMB), jnp.float32),
        'ln1b': jnp.zeros((N_BLOCKS, N_EMB), jnp.float32),
        'wq': jax.random.normal(ks[2], (N_BLOCKS, N_EMB, HEAD_SIZE), jnp.float32) * s,
        'wk': jax.random.normal(ks[3], (N_BLOCKS, N_EMB, HEAD_SIZE), jnp.float32) * s,
        'wv': jax.random.normal(ks[4], (N_BLOCKS, N_EMB, HEAD_SIZE), jnp.float32) * s,
        'wproj': jax.random.normal(ks[5], (N_BLOCKS, N_EMB, N_EMB), jnp.float32) * s,
        'bproj': jax.random.normal(ks[6], (N_BLOCKS, N_EMB), jnp.float32) * s,
        'ln2g': jnp.ones((N_BLOCKS, N_EMB), jnp.float32),
        'ln2b': jnp.zeros((N_BLOCKS, N_EMB), jnp.float32),
        'w1': jax.random.normal(ks[7], (N_BLOCKS, N_EMB, FF_HIDDEN), jnp.float32) * s,
        'b1': jax.random.normal(ks[8], (N_BLOCKS, FF_HIDDEN), jnp.float32) * s,
        'w2': jax.random.normal(ks[9], (N_BLOCKS, FF_HIDDEN, N_EMB), jnp.float32) * s,
        'b2': jax.random.normal(ks[10], (N_BLOCKS, N_EMB), jnp.float32) * s,
        'lnfg': jnp.ones((1, N_EMB), jnp.float32),
        'lnfb': jnp.zeros((1, N_EMB), jnp.float32),
        'wlm': jax.random.normal(ks[11], (N_EMB, VOCAB), jnp.float32) * s,
        'blm': jax.random.normal(ks[12], (1, VOCAB), jnp.float32) * s,
    }


@jax.jit
def self_attention_model(tokens, params):
    """tokens: (B, T) int32 -> logits (B, T, VOCAB).  Eval forward only."""
    # TODO(synk): training-mode dropout, the optional cross-entropy loss branch and
    # the autoregressive generate() sampling loop are host-side glue, not kernelized.
    B, T = tokens.shape
    assert T & (T - 1) == 0 and B & (B - 1) == 0, "mask construction assumes pow2 B, T"
    tok_flat = tokens.reshape(B * T, 1).astype(jnp.int32)

    # ---- parameter packing: ~20 tiny inputs -> 7 HBM->VMEM DMAs ------------
    emb = jnp.concatenate(
        [params['tok_emb'], jnp.tile(params['pos_emb'][:T], (B, 1))], axis=0)   # (V+BT, C)
    wqkv = jnp.concatenate([params['wq'], params['wk'], params['wv']], axis=-1)  # (NB,C,96)
    blkmat = jnp.concatenate([wqkv, params['wproj'], params['w1']], axis=-1)     # (NB,C,256)
    blkvec = jnp.concatenate([params['ln1g'], params['ln1b'], params['bproj'],
                              params['ln2g'], params['ln2b'], params['b2'],
                              params['b1']], axis=-1)                            # (NB,320)
    headvec = jnp.concatenate([params['lnfg'], params['lnfb'], params['blm']],
                              axis=-1)                                           # (1,128)

    vmem = pl.BlockSpec(memory_space=pltpu.MemorySpace.VMEM)
    args = (tok_flat, emb, blkvec, blkmat, params['w2'], headvec, params['wlm'])

    out = pl.pallas_call(
        functools.partial(transformer_kernel, B=B, T=T),
        out_shape=jax.ShapeDtypeStruct((T, B * VOCAB), jnp.float32),  # (8, 128)
        in_specs=[vmem] * len(args),
        out_specs=vmem,
    )(*args)

    # lane-dense slab (T, B*V) -> (B, T, V)
    return jnp.transpose(out.reshape(T, B, VOCAB), (1, 0, 2))


def reference_model(tokens, params):
    """Pure-JAX reference mirroring the PyTorch forward (eval mode)."""
    B, T = tokens.shape
    x = params['tok_emb'][tokens] + params['pos_emb'][:T][None]
    causal = jnp.tril(jnp.ones((T, T), bool))
    for blk in range(N_BLOCKS):
        h = _layer_norm(x, params['ln1g'][blk], params['ln1b'][blk])
        q = h @ params['wq'][blk]
        k = h @ params['wk'][blk]
        v = h @ params['wv'][blk]
        outs = []
        for hi in range(N_HEADS):
            sl = slice(hi * HD, (hi + 1) * HD)
            s = jnp.einsum('bqd,bkd->bqk', q[..., sl], k[..., sl])
            s = jnp.where(causal[None], s, -jnp.inf)
            p = jax.nn.softmax(s, axis=-1)
            outs.append(jnp.einsum('bqk,bkd->bqd', p, v[..., sl]))
        attn = jnp.concatenate(outs, axis=-1)
        x = x + attn @ params['wproj'][blk] + params['bproj'][blk]
        h2 = _layer_norm(x, params['ln2g'][blk], params['ln2b'][blk])
        f = jax.nn.relu(h2 @ params['w1'][blk] + params['b1'][blk])
        x = x + f @ params['w2'][blk] + params['b2'][blk]
    x = _layer_norm(x, params['lnfg'][0], params['lnfb'][0])
    return x @ params['wlm'] + params['blm'][0]


if __name__ == "__main__":
    key = jax.random.PRNGKey(0)
    pkey, tkey = jax.random.split(key)
    params = init_params(pkey)
    tokens = jax.random.randint(tkey, (BATCH, BLOCK_SIZE), 0, VOCAB, jnp.int32)

    logits = self_attention_model(tokens, params)
    logits = jax.block_until_ready(logits)

    ref = reference_model(tokens, params)
    assert logits.shape == (BATCH, BLOCK_SIZE, VOCAB)
    assert jnp.allclose(logits, ref, atol=1e-4, rtol=1e-4), (
        float(jnp.max(jnp.abs(logits - ref))))
    print("KERNEL_OK")
</pallas_src>

<mosaic_0001>
module attributes {stable_mosaic.version = 11 : i64} {
  func.func @transformer_kernel(%arg0: memref<16x1xi32, #tpu.memory_space<vmem>>, %arg1: memref<80x32xf32, #tpu.memory_space<vmem>>, %arg2: memref<4x320xf32, #tpu.memory_space<vmem>>, %arg3: memref<4x32x256xf32, #tpu.memory_space<vmem>>, %arg4: memref<4x128x32xf32, #tpu.memory_space<vmem>>, %arg5: memref<1x128xf32, #tpu.memory_space<vmem>>, %arg6: memref<32x64xf32, #tpu.memory_space<vmem>>, %arg7: memref<8x128xf32, #tpu.memory_space<vmem>>) attributes {dimension_semantics = [], scalar_prefetch = 0 : i64, scratch_operands = 0 : i64, tpu.core_type = #tpu.core_type<tc>} {
    %c0 = arith.constant 0 : index
    %c0_0 = arith.constant 0 : index
    %0 = vector.load %arg0[%c0, %c0_0] : memref<16x1xi32, #tpu.memory_space<vmem>>, vector<16x1xi32>
    %1 = tpu.iota {dimensions = array<i32: 1>} : vector<16x64xi32>
    %2 = vector.broadcast %0 : vector<16x1xi32> to vector<16x64xi32>
    %3 = arith.cmpi eq, %2, %1 : vector<16x64xi32>
    %4 = arith.extui %3 : vector<16x64xi1> to vector<16x64xi32>
    %5 = arith.sitofp %4 : vector<16x64xi32> to vector<16x64xf32>
    %c0_1 = arith.constant 0 : index
    %c0_2 = arith.constant 0 : index
    %6 = vector.load %arg1[%c0_1, %c0_2] : memref<80x32xf32, #tpu.memory_space<vmem>>, vector<64x32xf32>
    %cst = arith.constant dense<0.000000e+00> : vector<16x32xf32>
    %7 = tpu.matmul %5, %6, %cst {dimension_numbers = #tpu.dot_dimension_numbers<[1], [0], [0], [1], [0, 0, 1, 1], [], []>} : vector<16x64xf32>, vector<64x32xf32>, vector<16x32xf32> -> vector<16x32xf32>
    %c64 = arith.constant 64 : index
    %c0_3 = arith.constant 0 : index
    %8 = vector.load %arg1[%c64, %c0_3] : memref<80x32xf32, #tpu.memory_space<vmem>>, vector<16x32xf32>
    %9 = arith.addf %7, %8 : vector<16x32xf32>
    %10 = tpu.iota {dimensions = array<i32: 0>} : vector<64x64xi32>
    %11 = tpu.iota {dimensions = array<i32: 1>} : vector<64x64xi32>
    %c4_i32 = arith.constant 4 : i32
    %12 = vector.broadcast %c4_i32 : i32 to vector<64x64xi32>
    %13 = arith.shrsi %10, %12 : vector<64x64xi32>
    %c4_i32_4 = arith.constant 4 : i32
    %14 = vector.broadcast %c4_i32_4 : i32 to vector<64x64xi32>
    %15 = arith.shrsi %11, %14 : vector<64x64xi32>
    %16 = arith.cmpi eq, %13, %15 : vector<64x64xi32>
    %c3_i32 = arith.constant 3 : i32
    %17 = vector.broadcast %c3_i32 : i32 to vector<64x64xi32>
    %18 = arith.shrsi %10, %17 : vector<64x64xi32>
    %c1_i32 = arith.constant 1 : i32
    %19 = vector.broadcast %c1_i32 : i32 to vector<64x64xi32>
    %20 = arith.andi %18, %19 : vector<64x64xi32>
    %c3_i32_5 = arith.constant 3 : i32
    %21 = vector.broadcast %c3_i32_5 : i32 to vector<64x64xi32>
    %22 = arith.shrsi %11, %21 : vector<64x64xi32>
    %c1_i32_6 = arith.constant 1 : i32
    %23 = vector.broadcast %c1_i32_6 : i32 to vector<64x64xi32>
    %24 = arith.andi %22, %23 : vector<64x64xi32>
    %25 = arith.cmpi eq, %20, %24 : vector<64x64xi32>
    %c7_i32 = arith.constant 7 : i32
    %26 = vector.broadcast %c7_i32 : i32 to vector<64x64xi32>
    %27 = arith.andi %10, %26 : vector<64x64xi32>
    %c7_i32_7 = arith.constant 7 : i32
    %28 = vector.broadcast %c7_i32_7 : i32 to vector<64x64xi32>
    %29 = arith.andi %11, %28 : vector<64x64xi32>
    %30 = arith.cmpi sge, %27, %29 : vector<64x64xi32>
    %31 = arith.andi %16, %25 : vector<64x64xi1>
    %32 = arith.andi %31, %30 : vector<64x64xi1>
    %cst_8 = arith.constant 0.000000e+00 : f32
    %cst_9 = arith.constant -1.000000e+30 : f32
    %33 = vector.broadcast %cst_8 : f32 to vector<64x64xf32>
    %34 = vector.broadcast %cst_9 : f32 to vector<64x64xf32>
    %35 = arith.select %32, %33, %34 : vector<64x64xi1>, vector<64x64xf32>
    %c0_10 = arith.constant 0 : index
    %c0_11 = arith.constant 0 : index
    %36 = vector.load %arg2[%c0_10, %c0_11] : memref<4x320xf32, #tpu.memory_space<vmem>>, vector<1x32xf32>
    %37 = vector.shape_cast %36 : vector<1x32xf32> to vector<32xf32>
    %c0_12 = arith.constant 0 : index
    %c32 = arith.constant 32 : index
    %38 = vector.load %arg2[%c0_12, %c32] : memref<4x320xf32, #tpu.memory_space<vmem>>, vector<1x32xf32>
    %39 = vector.shape_cast %38 : vector<1x32xf32> to vector<32xf32>
    %cst_13 = arith.constant dense<0.000000e+00> : vector<16xf32>
    %40 = vector.multi_reduction <add>, %9, %cst_13 [1] : vector<16x32xf32> to vector<16xf32>
    %41 = vector.shape_cast %40 : vector<16xf32> to vector<16x1xf32>
    %cst_14 = arith.constant 3.200000e+01 : f32
    %42 = vector.broadcast %cst_14 : f32 to vector<16x1xf32>
    %43 = arith.divf %41, %42 : vector<16x1xf32>
    %44 = vector.broadcast %43 : vector<16x1xf32> to vector<16x32xf32>
    %45 = arith.subf %9, %44 : vector<16x32xf32>
    %46 = arith.mulf %45, %45 : vector<16x32xf32>
    %cst_15 = arith.constant dense<0.000000e+00> : vector<16xf32>
    %47 = vector.multi_reduction <add>, %46, %cst_15 [1] : vector<16x32xf32> to vector<16xf32>
    %48 = vector.shape_cast %47 : vector<16xf32> to vector<16x1xf32>
    %cst_16 = arith.constant 3.200000e+01 : f32
    %49 = vector.broadcast %cst_16 : f32 to vector<16x1xf32>
    %50 = arith.divf %48, %49 : vector<16x1xf32>
    %51 = vector.broadcast %43 : vector<16x1xf32> to vector<16x32xf32>
    %52 = arith.subf %9, %51 : vector<16x32xf32>
    %cst_17 = arith.constant 9.99999974E-6 : f32
    %53 = vector.broadcast %cst_17 : f32 to vector<16x1xf32>
    %54 = arith.addf %50, %53 : vector<16x1xf32>
    %55 = math.rsqrt %54 : vector<16x1xf32>
    %56 = vector.broadcast %55 : vector<16x1xf32> to vector<16x32xf32>
    %57 = arith.mulf %52, %56 : vector<16x32xf32>
    %58 = vector.shape_cast %37 : vector<32xf32> to vector<1x32xf32>
    %59 = vector.broadcast %58 : vector<1x32xf32> to vector<16x32xf32>
    %60 = arith.mulf %57, %59 : vector<16x32xf32>
    %61 = vector.shape_cast %39 : vector<32xf32> to vector<1x32xf32>
    %62 = vector.broadcast %61 : vector<1x32xf32> to vector<16x32xf32>
    %63 = arith.addf %60, %62 : vector<16x32xf32>
    %c0_18 = arith.constant 0 : index
    %c0_19 = arith.constant 0 : index
    %c0_20 = arith.constant 0 : index
    %64 = vector.load %arg3[%c0_18, %c0_19, %c0_20] : memref<4x32x256xf32, #tpu.memory_space<vmem>>, vector<1x32x96xf32>
    %65 = vector.shape_cast %64 : vector<1x32x96xf32> to vector<32x96xf32>
    %cst_21 = arith.constant dense<0.000000e+00> : vector<16x96xf32>
    %66 = tpu.matmul %63, %65, %cst_21 {dimension_numbers = #tpu.dot_dimension_numbers<[1], [0], [0], [1], [0, 0, 1, 1], [], []>} : vector<16x32xf32>, vector<32x96xf32>, vector<16x96xf32> -> vector<16x96xf32>
    %67 = vector.extract_strided_slice %66 {offsets = [0, 0], sizes = [16, 8], strides = [1, 1]} : vector<16x96xf32> to vector<16x8xf32>
    %68 = vector.extract_strided_slice %66 {offsets = [0, 8], sizes = [16, 8], strides = [1, 1]} : vector<16x96xf32> to vector<16x8xf32>
    %69 = vector.extract_strided_slice %66 {offsets = [0, 16], sizes = [16, 8], strides = [1, 1]} : vector<16x96xf32> to vector<16x8xf32>
    %70 = vector.extract_strided_slice %66 {offsets = [0, 24], sizes = [16, 8], strides = [1, 1]} : vector<16x96xf32> to vector<16x8xf32>
    %71 = tpu.concatenate %67, %68, %69, %70 in 0 : vector<16x8xf32>, vector<16x8xf32>, vector<16x8xf32>, vector<16x8xf32> -> vector<64x8xf32>
    %72 = vector.extract_strided_slice %66 {offsets = [0, 32], sizes = [16, 8], strides = [1, 1]} : vector<16x96xf32> to vector<16x8xf32>
    %73 = vector.extract_strided_slice %66 {offsets = [0, 40], sizes = [16, 8], strides = [1, 1]} : vector<16x96xf32> to vector<16x8xf32>
    %74 = vector.extract_strided_slice %66 {offsets = [0, 48], sizes = [16, 8], strides = [1, 1]} : vector<16x96xf32> to vector<16x8xf32>
    %75 = vector.extract_strided_slice %66 {offsets = [0, 56], sizes = [16, 8], strides = [1, 1]} : vector<16x96xf32> to vector<16x8xf32>
    %76 = tpu.concatenate %72, %73, %74, %75 in 0 : vector<16x8xf32>, vector<16x8xf32>, vector<16x8xf32>, vector<16x8xf32> -> vector<64x8xf32>
    %77 = vector.extract_strided_slice %66 {offsets = [0, 64], sizes = [16, 8], strides = [1, 1]} : vector<16x96xf32> to vector<16x8xf32>
    %78 = vector.extract_strided_slice %66 {offsets = [0, 72], sizes = [16, 8], strides = [1, 1]} : vector<16x96xf32> to vector<16x8xf32>
    %79 = vector.extract_strided_slice %66 {offsets = [0, 80], sizes = [16, 8], strides = [1, 1]} : vector<16x96xf32> to vector<16x8xf32>
    %80 = vector.extract_strided_slice %66 {offsets = [0, 88], sizes = [16, 8], strides = [1, 1]} : vector<16x96xf32> to vector<16x8xf32>
    %81 = tpu.concatenate %77, %78, %79, %80 in 0 : vector<16x8xf32>, vector<16x8xf32>, vector<16x8xf32>, vector<16x8xf32> -> vector<64x8xf32>
    "tpu.trace_start"() <{level = 10 : i32, message = "qd,kd->qk"}> : () -> ()
    %cst_22 = arith.constant dense<0.000000e+00> : vector<64x64xf32>
    %82 = tpu.matmul %71, %76, %cst_22 {dimension_numbers = #tpu.dot_dimension_numbers<[1], [1], [0], [0], [0, 0, 1, 0], [], []>} : vector<64x8xf32>, vector<64x8xf32>, vector<64x64xf32> -> vector<64x64xf32>
    "tpu.trace_stop"() : () -> ()
    %83 = arith.addf %82, %35 : vector<64x64xf32>
    %cst_23 = arith.constant dense<0xFF800000> : vector<64xf32>
    %84 = vector.multi_reduction <maximumf>, %83, %cst_23 [1] : vector<64x64xf32> to vector<64xf32>
    %85 = vector.shape_cast %84 : vector<64xf32> to vector<64x1xf32>
    %86 = vector.broadcast %85 : vector<64x1xf32> to vector<64x64xf32>
    %87 = arith.subf %83, %86 : vector<64x64xf32>
    %88 = math.exp %87 : vector<64x64xf32>
    %cst_24 = arith.constant dense<0.000000e+00> : vector<64xf32>
    %89 = vector.multi_reduction <add>, %88, %cst_24 [1] : vector<64x64xf32> to vector<64xf32>
    %90 = vector.shape_cast %89 : vector<64xf32> to vector<64x1xf32>
    %91 = tpu.reciprocal %90 {approx = true} : vector<64x1xf32> -> vector<64x1xf32>
    %92 = arith.mulf %90, %91 : vector<64x1xf32>
    %cst_25 = arith.constant 2.000000e+00 : f32
    %93 = vector.broadcast %cst_25 : f32 to vector<64x1xf32>
    %94 = arith.subf %93, %92 : vector<64x1xf32>
    %95 = arith.mulf %91, %94 : vector<64x1xf32>
    %96 = vector.broadcast %95 : vector<64x1xf32> to vector<64x64xf32>
    %97 = arith.mulf %88, %96 : vector<64x64xf32>
    %cst_26 = arith.constant dense<0.000000e+00> : vector<64x8xf32>
    %98 = tpu.matmul %97, %81, %cst_26 {dimension_numbers = #tpu.dot_dimension_numbers<[1], [0], [0], [1], [0, 0, 1, 1], [], []>} : vector<64x64xf32>, vector<64x8xf32>, vector<64x8xf32> -> vector<64x8xf32>
    %99 = vector.extract_strided_slice %98 {offsets = [0, 0], sizes = [16, 8], strides = [1, 1]} : vector<64x8xf32> to vector<16x8xf32>
    %100 = vector.extract_strided_slice %98 {offsets = [16, 0], sizes = [16, 8], strides = [1, 1]} : vector<64x8xf32> to vector<16x8xf32>
    %101 = vector.extract_strided_slice %98 {offsets = [32, 0], sizes = [16, 8], strides = [1, 1]} : vector<64x8xf32> to vector<16x8xf32>
    %102 = vector.extract_strided_slice %98 {offsets = [48, 0], sizes = [16, 8], strides = [1, 1]} : vector<64x8xf32> to vector<16x8xf32>
    %103 = tpu.concatenate %99, %100, %101, %102 in 1 : vector<16x8xf32>, vector<16x8xf32>, vector<16x8xf32>, vector<16x8xf32> -> vector<16x32xf32>
    %c0_27 = arith.constant 0 : index
    %c0_28 = arith.constant 0 : index
    %c96 = arith.constant 96 : index
    %104 = vector.load %arg3[%c0_27, %c0_28, %c96] : memref<4x32x256xf32, #tpu.memory_space<vmem>>, vector<1x32x32xf32>
    %105 = vector.shape_cast %104 : vector<1x32x32xf32> to vector<32x32xf32>
    %cst_29 = arith.constant dense<0.000000e+00> : vector<16x32xf32>
    %106 = tpu.matmul %103, %105, %cst_29 {dimension_numbers = #tpu.dot_dimension_numbers<[1], [0], [0], [1], [0, 0, 1, 1], [], []>} : vector<16x32xf32>, vector<32x32xf32>, vector<16x32xf32> -> vector<16x32xf32>
    %107 = arith.addf %9, %106 : vector<16x32xf32>
    %c0_30 = arith.constant 0 : index
    %c64_31 = arith.constant 64 : index
    %108 = vector.load %arg2[%c0_30, %c64_31] : memref<4x320xf32, #tpu.memory_space<vmem>>, vector<1x32xf32>
    %109 = vector.shape_cast %108 : vector<1x32xf32> to vector<32xf32>
    %110 = vector.shape_cast %109 : vector<32xf32> to vector<1x32xf32>
    %111 = vector.broadcast %110 : vector<1x32xf32> to vector<16x32xf32>
    %112 = arith.addf %107, %111 : vector<16x32xf32>
    %c0_32 = arith.constant 0 : index
    %c96_33 = arith.constant 96 : index
    %113 = vector.load %arg2[%c0_32, %c96_33] : memref<4x320xf32, #tpu.memory_space<vmem>>, vector<1x32xf32>
    %114 = vector.shape_cast %113 : vector<1x32xf32> to vector<32xf32>
    %c0_34 = arith.constant 0 : index
    %c128 = arith.constant 128 : index
    %115 = vector.load %arg2[%c0_34, %c128] : memref<4x320xf32, #tpu.memory_space<vmem>>, vector<1x32xf32>
    %116 = vector.shape_cast %115 : vector<1x32xf32> to vector<32xf32>
    %cst_35 = arith.constant dense<0.000000e+00> : vector<16xf32>
    %117 = vector.multi_reduction <add>, %112, %cst_35 [1] : vector<16x32xf32> to vector<16xf32>
    %118 = vector.shape_cast %117 : vector<16xf32> to vector<16x1xf32>
    %cst_36 = arith.constant 3.200000e+01 : f32
    %119 = vector.broadcast %cst_36 : f32 to vector<16x1xf32>
    %120 = arith.divf %118, %119 : vector<16x1xf32>
    %121 = vector.broadcast %120 : vector<16x1xf32> to vector<16x32xf32>
    %122 = arith.subf %112, %121 : vector<16x32xf32>
    %123 = arith.mulf %122, %122 : vector<16x32xf32>
    %cst_37 = arith.constant dense<0.000000e+00> : vector<16xf32>
    %124 = vector.multi_reduction <add>, %123, %cst_37 [1] : vector<16x32xf32> to vector<16xf32>
    %125 = vector.shape_cast %124 : vector<16xf32> to vector<16x1xf32>
    %cst_38 = arith.constant 3.200000e+01 : f32
    %126 = vector.broadcast %cst_38 : f32 to vector<16x1xf32>
    %127 = arith.divf %125, %126 : vector<16x1xf32>
    %128 = vector.broadcast %120 : vector<16x1xf32> to vector<16x32xf32>
    %129 = arith.subf %112, %128 : vector<16x32xf32>
    %cst_39 = arith.constant 9.99999974E-6 : f32
    %130 = vector.broadcast %cst_39 : f32 to vector<16x1xf32>
    %131 = arith.addf %127, %130 : vector<16x1xf32>
    %132 = math.rsqrt %131 : vector<16x1xf32>
    %133 = vector.broadcast %132 : vector<16x1xf32> to vector<16x32xf32>
    %134 = arith.mulf %129, %133 : vector<16x32xf32>
    %135 = vector.shape_cast %114 : vector<32xf32> to vector<1x32xf32>
    %136 = vector.broadcast %135 : vector<1x32xf32> to vector<16x32xf32>
    %137 = arith.mulf %134, %136 : vector<16x32xf32>
    %138 = vector.shape_cast %116 : vector<32xf32> to vector<1x32xf32>
    %139 = vector.broadcast %138 : vector<1x32xf32> to vector<16x32xf32>
    %140 = arith.addf %137, %139 : vector<16x32xf32>
    %c0_40 = arith.constant 0 : index
    %c0_41 = arith.constant 0 : index
    %c128_42 = arith.constant 128 : index
    %141 = vector.load %arg3[%c0_40, %c0_41, %c128_42] : memref<4x32x256xf32, #tpu.memory_space<vmem>>, vector<1x32x128xf32>
    %142 = vector.shape_cast %141 : vector<1x32x128xf32> to vector<32x128xf32>
    %cst_43 = arith.constant dense<0.000000e+00> : vector<16x128xf32>
    %143 = tpu.matmul %140, %142, %cst_43 {dimension_numbers = #tpu.dot_dimension_numbers<[1], [0], [0], [1], [0, 0, 1, 1], [], []>} : vector<16x32xf32>, vector<32x128xf32>, vector<16x128xf32> -> vector<16x128xf32>
    %c0_44 = arith.constant 0 : index
    %c192 = arith.constant 192 : index
    %144 = vector.load %arg2[%c0_44, %c192] : memref<4x320xf32, #tpu.memory_space<vmem>>, vector<1x128xf32>
    %145 = vector.shape_cast %144 : vector<1x128xf32> to vector<128xf32>
    %146 = vector.shape_cast %145 : vector<128xf32> to vector<1x128xf32>
    %147 = vector.broadcast %146 : vector<1x128xf32> to vector<16x128xf32>
    %148 = arith.addf %143, %147 : vector<16x128xf32>
    %cst_45 = arith.constant 0.000000e+00 : f32
    %149 = vector.broadcast %cst_45 : f32 to vector<16x128xf32>
    %150 = arith.maximumf %148, %149 : vector<16x128xf32>
    %c0_46 = arith.constant 0 : index
    %c0_47 = arith.constant 0 : index
    %c0_48 = arith.constant 0 : index
    %151 = vector.load %arg4[%c0_46, %c0_47, %c0_48] : memref<4x128x32xf32, #tpu.memory_space<vmem>>, vector<1x128x32xf32>
    %152 = vector.shape_cast %151 : vector<1x128x32xf32> to vector<128x32xf32>
    %cst_49 = arith.constant dense<0.000000e+00> : vector<16x32xf32>
    %153 = tpu.matmul %150, %152, %cst_49 {dimension_numbers = #tpu.dot_dimension_numbers<[1], [0], [0], [1], [0, 0, 1, 1], [], []>} : vector<16x128xf32>, vector<128x32xf32>, vector<16x32xf32> -> vector<16x32xf32>
    %154 = arith.addf %112, %153 : vector<16x32xf32>
    %c0_50 = arith.constant 0 : index
    %c160 = arith.constant 160 : index
    %155 = vector.load %arg2[%c0_50, %c160] : memref<4x320xf32, #tpu.memory_space<vmem>>, vector<1x32xf32>
    %156 = vector.shape_cast %155 : vector<1x32xf32> to vector<32xf32>
    %157 = vector.shape_cast %156 : vector<32xf32> to vector<1x32xf32>
    %158 = vector.broadcast %157 : vector<1x32xf32> to vector<16x32xf32>
    %159 = arith.addf %154, %158 : vector<16x32xf32>
    %c1 = arith.constant 1 : index
    %c0_51 = arith.constant 0 : index
    %160 = vector.load %arg2[%c1, %c0_51] : memref<4x320xf32, #tpu.memory_space<vmem>>, vector<1x32xf32>
    %161 = vector.shape_cast %160 : vector<1x32xf32> to vector<32xf32>
    %c1_52 = arith.constant 1 : index
    %c32_53 = arith.constant 32 : index
    %162 = vector.load %arg2[%c1_52, %c32_53] : memref<4x320xf32, #tpu.memory_space<vmem>>, vector<1x32xf32>
    %163 = vector.shape_cast %162 : vector<1x32xf32> to vector<32xf32>
    %cst_54 = arith.constant dense<0.000000e+00> : vector<16xf32>
    %164 = vector.multi_reduction <add>, %159, %cst_54 [1] : vector<16x32xf32> to vector<16xf32>
    %165 = vector.shape_cast %164 : vector<16xf32> to vector<16x1xf32>
    %cst_55 = arith.constant 3.200000e+01 : f32
    %166 = vector.broadcast %cst_55 : f32 to vector<16x1xf32>
    %167 = arith.divf %165, %166 : vector<16x1xf32>
    %168 = vector.broadcast %167 : vector<16x1xf32> to vector<16x32xf32>
    %169 = arith.subf %159, %168 : vector<16x32xf32>
    %170 = arith.mulf %169, %169 : vector<16x32xf32>
    %cst_56 = arith.constant dense<0.000000e+00> : vector<16xf32>
    %171 = vector.multi_reduction <add>, %170, %cst_56 [1] : vector<16x32xf32> to vector<16xf32>
    %172 = vector.shape_cast %171 : vector<16xf32> to vector<16x1xf32>
    %cst_57 = arith.constant 3.200000e+01 : f32
    %173 = vector.broadcast %cst_57 : f32 to vector<16x1xf32>
    %174 = arith.divf %172, %173 : vector<16x1xf32>
    %175 = vector.broadcast %167 : vector<16x1xf32> to vector<16x32xf32>
    %176 = arith.subf %159, %175 : vector<16x32xf32>
    %cst_58 = arith.constant 9.99999974E-6 : f32
    %177 = vector.broadcast %cst_58 : f32 to vector<16x1xf32>
    %178 = arith.addf %174, %177 : vector<16x1xf32>
    %179 = math.rsqrt %178 : vector<16x1xf32>
    %180 = vector.broadcast %179 : vector<16x1xf32> to vector<16x32xf32>
    %181 = arith.mulf %176, %180 : vector<16x32xf32>
    %182 = vector.shape_cast %161 : vector<32xf32> to vector<1x32xf32>
    %183 = vector.broadcast %182 : vector<1x32xf32> to vector<16x32xf32>
    %184 = arith.mulf %181, %183 : vector<16x32xf32>
    %185 = vector.shape_cast %163 : vector<32xf32> to vector<1x32xf32>
    %186 = vector.broadcast %185 : vector<1x32xf32> to vector<16x32xf32>
    %187 = arith.addf %184, %186 : vector<16x32xf32>
    %c1_59 = arith.constant 1 : index
    %c0_60 = arith.constant 0 : index
    %c0_61 = arith.constant 0 : index
    %188 = vector.load %arg3[%c1_59, %c0_60, %c0_61] : memref<4x32x256xf32, #tpu.memory_space<vmem>>, vector<1x32x96xf32>
    %189 = vector.shape_cast %188 : vector<1x32x96xf32> to vector<32x96xf32>
    %cst_62 = arith.constant dense<0.000000e+00> : vector<16x96xf32>
    %190 = tpu.matmul %187, %189, %cst_62 {dimension_numbers = #tpu.dot_dimension_numbers<[1], [0], [0], [1], [0, 0, 1, 1], [], []>} : vector<16x32xf32>, vector<32x96xf32>, vector<16x96xf32> -> vector<16x96xf32>
    %191 = vector.extract_strided_slice %190 {offsets = [0, 0], sizes = [16, 8], strides = [1, 1]} : vector<16x96xf32> to vector<16x8xf32>
    %192 = vector.extract_strided_slice %190 {offsets = [0, 8], sizes = [16, 8], strides = [1, 1]} : vector<16x96xf32> to vector<16x8xf32>
    %193 = vector.extract_strided_slice %190 {offsets = [0, 16], sizes = [16, 8], strides = [1, 1]} : vector<16x96xf32> to vector<16x8xf32>
    %194 = vector.extract_strided_slice %190 {offsets = [0, 24], sizes = [16, 8], strides = [1, 1]} : vector<16x96xf32> to vector<16x8xf32>
    %195 = tpu.concatenate %191, %192, %193, %194 in 0 : vector<16x8xf32>, vector<16x8xf32>, vector<16x8xf32>, vector<16x8xf32> -> vector<64x8xf32>
    %196 = vector.extract_strided_slice %190 {offsets = [0, 32], sizes = [16, 8], strides = [1, 1]} : vector<16x96xf32> to vector<16x8xf32>
    %197 = vector.extract_strided_slice %190 {offsets = [0, 40], sizes = [16, 8], strides = [1, 1]} : vector<16x96xf32> to vector<16x8xf32>
    %198 = vector.extract_strided_slice %190 {offsets = [0, 48], sizes = [16, 8], strides = [1, 1]} : vector<16x96xf32> to vector<16x8xf32>
    %199 = vector.extract_strided_slice %190 {offsets = [0, 56], sizes = [16, 8], strides = [1, 1]} : vector<16x96xf32> to vector<16x8xf32>
    %200 = tpu.concatenate %196, %197, %198, %199 in 0 : vector<16x8xf32>, vector<16x8xf32>, vector<16x8xf32>, vector<16x8xf32> -> vector<64x8xf32>
    %201 = vector.extract_strided_slice %190 {offsets = [0, 64], sizes = [16, 8], strides = [1, 1]} : vector<16x96xf32> to vector<16x8xf32>
    %202 = vector.extract_strided_slice %190 {offsets = [0, 72], sizes = [16, 8], strides = [1, 1]} : vector<16x96xf32> to vector<16x8xf32>
    %203 = vector.extract_strided_slice %190 {offsets = [0, 80], sizes = [16, 8], strides = [1, 1]} : vector<16x96xf32> to vector<16x8xf32>
    %204 = vector.extract_strided_slice %190 {offsets = [0, 88], sizes = [16, 8], strides = [1, 1]} : vector<16x96xf32> to vector<16x8xf32>
    %205 = tpu.concatenate %201, %202, %203, %204 in 0 : vector<16x8xf32>, vector<16x8xf32>, vector<16x8xf32>, vector<16x8xf32> -> vector<64x8xf32>
    "tpu.trace_start"() <{level = 10 : i32, message = "qd,kd->qk"}> : () -> ()
    %cst_63 = arith.constant dense<0.000000e+00> : vector<64x64xf32>
    %206 = tpu.matmul %195, %200, %cst_63 {dimension_numbers = #tpu.dot_dimension_numbers<[1], [1], [0], [0], [0, 0, 1, 0], [], []>} : vector<64x8xf32>, vector<64x8xf32>, vector<64x64xf32> -> vector<64x64xf32>
    "tpu.trace_stop"() : () -> ()
    %207 = arith.addf %206, %35 : vector<64x64xf32>
    %cst_64 = arith.constant dense<0xFF800000> : vector<64xf32>
    %208 = vector.multi_reduction <maximumf>, %207, %cst_64 [1] : vector<64x64xf32> to vector<64xf32>
    %209 = vector.shape_cast %208 : vector<64xf32> to vector<64x1xf32>
    %210 = vector.broadcast %209 : vector<64x1xf32> to vector<64x64xf32>
    %211 = arith.subf %207, %210 : vector<64x64xf32>
    %212 = math.exp %211 : vector<64x64xf32>
    %cst_65 = arith.constant dense<0.000000e+00> : vector<64xf32>
    %213 = vector.multi_reduction <add>, %212, %cst_65 [1] : vector<64x64xf32> to vector<64xf32>
    %214 = vector.shape_cast %213 : vector<64xf32> to vector<64x1xf32>
    %215 = tpu.reciprocal %214 {approx = true} : vector<64x1xf32> -> vector<64x1xf32>
    %216 = arith.mulf %214, %215 : vector<64x1xf32>
    %cst_66 = arith.constant 2.000000e+00 : f32
    %217 = vector.broadcast %cst_66 : f32 to vector<64x1xf32>
    %218 = arith.subf %217, %216 : vector<64x1xf32>
    %219 = arith.mulf %215, %218 : vector<64x1xf32>
    %220 = vector.broadcast %219 : vector<64x1xf32> to vector<64x64xf32>
    %221 = arith.mulf %212, %220 : vector<64x64xf32>
    %cst_67 = arith.constant dense<0.000000e+00> : vector<64x8xf32>
    %222 = tpu.matmul %221, %205, %cst_67 {dimension_numbers = #tpu.dot_dimension_numbers<[1], [0], [0], [1], [0, 0, 1, 1], [], []>} : vector<64x64xf32>, vector<64x8xf32>, vector<64x8xf32> -> vector<64x8xf32>
    %223 = vector.extract_strided_slice %222 {offsets = [0, 0], sizes = [16, 8], strides = [1, 1]} : vector<64x8xf32> to vector<16x8xf32>
    %224 = vector.extract_strided_slice %222 {offsets = [16, 0], sizes = [16, 8], strides = [1, 1]} : vector<64x8xf32> to vector<16x8xf32>
    %225 = vector.extract_strided_slice %222 {offsets = [32, 0], sizes = [16, 8], strides = [1, 1]} : vector<64x8xf32> to vector<16x8xf32>
    %226 = vector.extract_strided_slice %222 {offsets = [48, 0], sizes = [16, 8], strides = [1, 1]} : vector<64x8xf32> to vector<16x8xf32>
    %227 = tpu.concatenate %223, %224, %225, %226 in 1 : vector<16x8xf32>, vector<16x8xf32>, vector<16x8xf32>, vector<16x8xf32> -> vector<16x32xf32>
    %c1_68 = arith.constant 1 : index
    %c0_69 = arith.constant 0 : index
    %c96_70 = arith.constant 96 : index
    %228 = vector.load %arg3[%c1_68, %c0_69, %c96_70] : memref<4x32x256xf32, #tpu.memory_space<vmem>>, vector<1x32x32xf32>
    %229 = vector.shape_cast %228 : vector<1x32x32xf32> to vector<32x32xf32>
    %cst_71 = arith.constant dense<0.000000e+00> : vector<16x32xf32>
    %230 = tpu.matmul %227, %229, %cst_71 {dimension_numbers = #tpu.dot_dimension_numbers<[1], [0], [0], [1], [0, 0, 1, 1], [], []>} : vector<16x32xf32>, vector<32x32xf32>, vector<16x32xf32> -> vector<16x32xf32>
    %231 = arith.addf %159, %230 : vector<16x32xf32>
    %c1_72 = arith.constant 1 : index
    %c64_73 = arith.constant 64 : index
    %232 = vector.load %arg2[%c1_72, %c64_73] : memref<4x320xf32, #tpu.memory_space<vmem>>, vector<1x32xf32>
    %233 = vector.shape_cast %232 : vector<1x32xf32> to vector<32xf32>
    %234 = vector.shape_cast %233 : vector<32xf32> to vector<1x32xf32>
    %235 = vector.broadcast %234 : vector<1x32xf32> to vector<16x32xf32>
    %236 = arith.addf %231, %235 : vector<16x32xf32>
    %c1_74 = arith.constant 1 : index
    %c96_75 = arith.constant 96 : index
    %237 = vector.load %arg2[%c1_74, %c96_75] : memref<4x320xf32, #tpu.memory_space<vmem>>, vector<1x32xf32>
    %238 = vector.shape_cast %237 : vector<1x32xf32> to vector<32xf32>
    %c1_76 = arith.constant 1 : index
    %c128_77 = arith.constant 128 : index
    %239 = vector.load %arg2[%c1_76, %c128_77] : memref<4x320xf32, #tpu.memory_space<vmem>>, vector<1x32xf32>
    %240 = vector.shape_cast %239 : vector<1x32xf32> to vector<32xf32>
    %cst_78 = arith.constant dense<0.000000e+00> : vector<16xf32>
    %241 = vector.multi_reduction <add>, %236, %cst_78 [1] : vector<16x32xf32> to vector<16xf32>
    %242 = vector.shape_cast %241 : vector<16xf32> to vector<16x1xf32>
    %cst_79 = arith.constant 3.200000e+01 : f32
    %243 = vector.broadcast %cst_79 : f32 to vector<16x1xf32>
    %244 = arith.divf %242, %243 : vector<16x1xf32>
    %245 = vector.broadcast %244 : vector<16x1xf32> to vector<16x32xf32>
    %246 = arith.subf %236, %245 : vector<16x32xf32>
    %247 = arith.mulf %246, %246 : vector<16x32xf32>
    %cst_80 = arith.constant dense<0.000000e+00> : vector<16xf32>
    %248 = vector.multi_reduction <add>, %247, %cst_80 [1] : vector<16x32xf32> to vector<16xf32>
    %249 = vector.shape_cast %248 : vector<16xf32> to vector<16x1xf32>
    %cst_81 = arith.constant 3.200000e+01 : f32
    %250 = vector.broadcast %cst_81 : f32 to vector<16x1xf32>
    %251 = arith.divf %249, %250 : vector<16x1xf32>
    %252 = vector.broadcast %244 : vector<16x1xf32> to vector<16x32xf32>
    %253 = arith.subf %236, %252 : vector<16x32xf32>
    %cst_82 = arith.constant 9.99999974E-6 : f32
    %254 = vector.broadcast %cst_82 : f32 to vector<16x1xf32>
    %255 = arith.addf %251, %254 : vector<16x1xf32>
    %256 = math.rsqrt %255 : vector<16x1xf32>
    %257 = vector.broadcast %256 : vector<16x1xf32> to vector<16x32xf32>
    %258 = arith.mulf %253, %257 : vector<16x32xf32>
    %259 = vector.shape_cast %238 : vector<32xf32> to vector<1x32xf32>
    %260 = vector.broadcast %259 : vector<1x32xf32> to vector<16x32xf32>
    %261 = arith.mulf %258, %260 : vector<16x32xf32>
    %262 = vector.shape_cast %240 : vector<32xf32> to vector<1x32xf32>
    %263 = vector.broadcast %262 : vector<1x32xf32> to vector<16x32xf32>
    %264 = arith.addf %261, %263 : vector<16x32xf32>
    %c1_83 = arith.constant 1 : index
    %c0_84 = arith.constant 0 : index
    %c128_85 = arith.constant 128 : index
    %265 = vector.load %arg3[%c1_83, %c0_84, %c128_85] : memref<4x32x256xf32, #tpu.memory_space<vmem>>, vector<1x32x128xf32>
    %266 = vector.shape_cast %265 : vector<1x32x128xf32> to vector<32x128xf32>
    %cst_86 = arith.constant dense<0.000000e+00> : vector<16x128xf32>
    %267 = tpu.matmul %264, %266, %cst_86 {dimension_numbers = #tpu.dot_dimension_numbers<[1], [0], [0], [1], [0, 0, 1, 1], [], []>} : vector<16x32xf32>, vector<32x128xf32>, vector<16x128xf32> -> vector<16x128xf32>
    %c1_87 = arith.constant 1 : index
    %c192_88 = arith.constant 192 : index
    %268 = vector.load %arg2[%c1_87, %c192_88] : memref<4x320xf32, #tpu.memory_space<vmem>>, vector<1x128xf32>
    %269 = vector.shape_cast %268 : vector<1x128xf32> to vector<128xf32>
    %270 = vector.shape_cast %269 : vector<128xf32> to vector<1x128xf32>
    %271 = vector.broadcast %270 : vector<1x128xf32> to vector<16x128xf32>
    %272 = arith.addf %267, %271 : vector<16x128xf32>
    %cst_89 = arith.constant 0.000000e+00 : f32
    %273 = vector.broadcast %cst_89 : f32 to vector<16x128xf32>
    %274 = arith.maximumf %272, %273 : vector<16x128xf32>
    %c1_90 = arith.constant 1 : index
    %c0_91 = arith.constant 0 : index
    %c0_92 = arith.constant 0 : index
    %275 = vector.load %arg4[%c1_90, %c0_91, %c0_92] : memref<4x128x32xf32, #tpu.memory_space<vmem>>, vector<1x128x32xf32>
    %276 = vector.shape_cast %275 : vector<1x128x32xf32> to vector<128x32xf32>
    %cst_93 = arith.constant dense<0.000000e+00> : vector<16x32xf32>
    %277 = tpu.matmul %274, %276, %cst_93 {dimension_numbers = #tpu.dot_dimension_numbers<[1], [0], [0], [1], [0, 0, 1, 1], [], []>} : vector<16x128xf32>, vector<128x32xf32>, vector<16x32xf32> -> vector<16x32xf32>
    %278 = arith.addf %236, %277 : vector<16x32xf32>
    %c1_94 = arith.constant 1 : index
    %c160_95 = arith.constant 160 : index
    %279 = vector.load %arg2[%c1_94, %c160_95] : memref<4x320xf32, #tpu.memory_space<vmem>>, vector<1x32xf32>
    %280 = vector.shape_cast %279 : vector<1x32xf32> to vector<32xf32>
    %281 = vector.shape_cast %280 : vector<32xf32> to vector<1x32xf32>
    %282 = vector.broadcast %281 : vector<1x32xf32> to vector<16x32xf32>
    %283 = arith.addf %278, %282 : vector<16x32xf32>
    %c2 = arith.constant 2 : index
    %c0_96 = arith.constant 0 : index
    %284 = vector.load %arg2[%c2, %c0_96] : memref<4x320xf32, #tpu.memory_space<vmem>>, vector<1x32xf32>
    %285 = vector.shape_cast %284 : vector<1x32xf32> to vector<32xf32>
    %c2_97 = arith.constant 2 : index
    %c32_98 = arith.constant 32 : index
    %286 = vector.load %arg2[%c2_97, %c32_98] : memref<4x320xf32, #tpu.memory_space<vmem>>, vector<1x32xf32>
    %287 = vector.shape_cast %286 : vector<1x32xf32> to vector<32xf32>
    %cst_99 = arith.constant dense<0.000000e+00> : vector<16xf32>
    %288 = vector.multi_reduction <add>, %283, %cst_99 [1] : vector<16x32xf32> to vector<16xf32>
    %289 = vector.shape_cast %288 : vector<16xf32> to vector<16x1xf32>
    %cst_100 = arith.constant 3.200000e+01 : f32
    %290 = vector.broadcast %cst_100 : f32 to vector<16x1xf32>
    %291 = arith.divf %289, %290 : vector<16x1xf32>
    %292 = vector.broadcast %291 : vector<16x1xf32> to vector<16x32xf32>
    %293 = arith.subf %283, %292 : vector<16x32xf32>
    %294 = arith.mulf %293, %293 : vector<16x32xf32>
    %cst_101 = arith.constant dense<0.000000e+00> : vector<16xf32>
    %295 = vector.multi_reduction <add>, %294, %cst_101 [1] : vector<16x32xf32> to vector<16xf32>
    %296 = vector.shape_cast %295 : vector<16xf32> to vector<16x1xf32>
    %cst_102 = arith.constant 3.200000e+01 : f32
    %297 = vector.broadcast %cst_102 : f32 to vector<16x1xf32>
    %298 = arith.divf %296, %297 : vector<16x1xf32>
    %299 = vector.broadcast %291 : vector<16x1xf32> to vector<16x32xf32>
    %300 = arith.subf %283, %299 : vector<16x32xf32>
    %cst_103 = arith.constant 9.99999974E-6 : f32
    %301 = vector.broadcast %cst_103 : f32 to vector<16x1xf32>
    %302 = arith.addf %298, %301 : vector<16x1xf32>
    %303 = math.rsqrt %302 : vector<16x1xf32>
    %304 = vector.broadcast %303 : vector<16x1xf32> to vector<16x32xf32>
    %305 = arith.mulf %300, %304 : vector<16x32xf32>
    %306 = vector.shape_cast %285 : vector<32xf32> to vector<1x32xf32>
    %307 = vector.broadcast %306 : vector<1x32xf32> to vector<16x32xf32>
    %308 = arith.mulf %305, %307 : vector<16x32xf32>
    %309 = vector.shape_cast %287 : vector<32xf32> to vector<1x32xf32>
    %310 = vector.broadcast %309 : vector<1x32xf32> to vector<16x32xf32>
    %311 = arith.addf %308, %310 : vector<16x32xf32>
    %c2_104 = arith.constant 2 : index
    %c0_105 = arith.constant 0 : index
    %c0_106 = arith.constant 0 : index
    %312 = vector.load %arg3[%c2_104, %c0_105, %c0_106] : memref<4x32x256xf32, #tpu.memory_space<vmem>>, vector<1x32x96xf32>
    %313 = vector.shape_cast %312 : vector<1x32x96xf32> to vector<32x96xf32>
    %cst_107 = arith.constant dense<0.000000e+00> : vector<16x96xf32>
    %314 = tpu.matmul %311, %313, %cst_107 {dimension_numbers = #tpu.dot_dimension_numbers<[1], [0], [0], [1], [0, 0, 1, 1], [], []>} : vector<16x32xf32>, vector<32x96xf32>, vector<16x96xf32> -> vector<16x96xf32>
    %315 = vector.extract_strided_slice %314 {offsets = [0, 0], sizes = [16, 8], strides = [1, 1]} : vector<16x96xf32> to vector<16x8xf32>
    %316 = vector.extract_strided_slice %314 {offsets = [0, 8], sizes = [16, 8], strides = [1, 1]} : vector<16x96xf32> to vector<16x8xf32>
    %317 = vector.extract_strided_slice %314 {offsets = [0, 16], sizes = [16, 8], strides = [1, 1]} : vector<16x96xf32> to vector<16x8xf32>
    %318 = vector.extract_strided_slice %314 {offsets = [0, 24], sizes = [16, 8], strides = [1, 1]} : vector<16x96xf32> to vector<16x8xf32>
    %319 = tpu.concatenate %315, %316, %317, %318 in 0 : vector<16x8xf32>, vector<16x8xf32>, vector<16x8xf32>, vector<16x8xf32> -> vector<64x8xf32>
    %320 = vector.extract_strided_slice %314 {offsets = [0, 32], sizes = [16, 8], strides = [1, 1]} : vector<16x96xf32> to vector<16x8xf32>
    %321 = vector.extract_strided_slice %314 {offsets = [0, 40], sizes = [16, 8], strides = [1, 1]} : vector<16x96xf32> to vector<16x8xf32>
    %322 = vector.extract_strided_slice %314 {offsets = [0, 48], sizes = [16, 8], strides = [1, 1]} : vector<16x96xf32> to vector<16x8xf32>
    %323 = vector.extract_strided_slice %314 {offsets = [0, 56], sizes = [16, 8], strides = [1, 1]} : vector<16x96xf32> to vector<16x8xf32>
    %324 = tpu.concatenate %320, %321, %322, %323 in 0 : vector<16x8xf32>, vector<16x8xf32>, vector<16x8xf32>, vector<16x8xf32> -> vector<64x8xf32>
    %325 = vector.extract_strided_slice %314 {offsets = [0, 64], sizes = [16, 8], strides = [1, 1]} : vector<16x96xf32> to vector<16x8xf32>
    %326 = vector.extract_strided_slice %314 {offsets = [0, 72], sizes = [16, 8], strides = [1, 1]} : vector<16x96xf32> to vector<16x8xf32>
    %327 = vector.extract_strided_slice %314 {offsets = [0, 80], sizes = [16, 8], strides = [1, 1]} : vector<16x96xf32> to vector<16x8xf32>
    %328 = vector.extract_strided_slice %314 {offsets = [0, 88], sizes = [16, 8], strides = [1, 1]} : vector<16x96xf32> to vector<16x8xf32>
    %329 = tpu.concatenate %325, %326, %327, %328 in 0 : vector<16x8xf32>, vector<16x8xf32>, vector<16x8xf32>, vector<16x8xf32> -> vector<64x8xf32>
    "tpu.trace_start"() <{level = 10 : i32, message = "qd,kd->qk"}> : () -> ()
    %cst_108 = arith.constant dense<0.000000e+00> : vector<64x64xf32>
    %330 = tpu.matmul %319, %324, %cst_108 {dimension_numbers = #tpu.dot_dimension_numbers<[1], [1], [0], [0], [0, 0, 1, 0], [], []>} : vector<64x8xf32>, vector<64x8xf32>, vector<64x64xf32> -> vector<64x64xf32>
    "tpu.trace_stop"() : () -> ()
    %331 = arith.addf %330, %35 : vector<64x64xf32>
    %cst_109 = arith.constant dense<0xFF800000> : vector<64xf32>
    %332 = vector.multi_reduction <maximumf>, %331, %cst_109 [1] : vector<64x64xf32> to vector<64xf32>
    %333 = vector.shape_cast %332 : vector<64xf32> to vector<64x1xf32>
    %334 = vector.broadcast %333 : vector<64x1xf32> to vector<64x64xf32>
    %335 = arith.subf %331, %334 : vector<64x64xf32>
    %336 = math.exp %335 : vector<64x64xf32>
    %cst_110 = arith.constant dense<0.000000e+00> : vector<64xf32>
    %337 = vector.multi_reduction <add>, %336, %cst_110 [1] : vector<64x64xf32> to vector<64xf32>
    %338 = vector.shape_cast %337 : vector<64xf32> to vector<64x1xf32>
    %339 = tpu.reciprocal %338 {approx = true} : vector<64x1xf32> -> vector<64x1xf32>
    %340 = arith.mulf %338, %339 : vector<64x1xf32>
    %cst_111 = arith.constant 2.000000e+00 : f32
    %341 = vector.broadcast %cst_111 : f32 to vector<64x1xf32>
    %342 = arith.subf %341, %340 : vector<64x1xf32>
    %343 = arith.mulf %339, %342 : vector<64x1xf32>
    %344 = vector.broadcast %343 : vector<64x1xf32> to vector<64x64xf32>
    %345 = arith.mulf %336, %344 : vector<64x64xf32>
    %cst_112 = arith.constant dense<0.000000e+00> : vector<64x8xf32>
    %346 = tpu.matmul %345, %329, %cst_112 {dimension_numbers = #tpu.dot_dimension_numbers<[1], [0], [0], [1], [0, 0, 1, 1], [], []>} : vector<64x64xf32>, vector<64x8xf32>, vector<64x8xf32> -> vector<64x8xf32>
    %347 = vector.extract_strided_slice %346 {offsets = [0, 0], sizes = [16, 8], strides = [1, 1]} : vector<64x8xf32> to vector<16x8xf32>
    %348 = vector.extract_strided_slice %346 {offsets = [16, 0], sizes = [16, 8], strides = [1, 1]} : vector<64x8xf32> to vector<16x8xf32>
    %349 = vector.extract_strided_slice %346 {offsets = [32, 0], sizes = [16, 8], strides = [1, 1]} : vector<64x8xf32> to vector<16x8xf32>
    %350 = vector.extract_strided_slice %346 {offsets = [48, 0], sizes = [16, 8], strides = [1, 1]} : vector<64x8xf32> to vector<16x8xf32>
    %351 = tpu.concatenate %347, %348, %349, %350 in 1 : vector<16x8xf32>, vector<16x8xf32>, vector<16x8xf32>, vector<16x8xf32> -> vector<16x32xf32>
    %c2_113 = arith.constant 2 : index
    %c0_114 = arith.constant 0 : index
    %c96_115 = arith.constant 96 : index
    %352 = vector.load %arg3[%c2_113, %c0_114, %c96_115] : memref<4x32x256xf32, #tpu.memory_space<vmem>>, vector<1x32x32xf32>
    %353 = vector.shape_cast %352 : vector<1x32x32xf32> to vector<32x32xf32>
    %cst_116 = arith.constant dense<0.000000e+00> : vector<16x32xf32>
    %354 = tpu.matmul %351, %353, %cst_116 {dimension_numbers = #tpu.dot_dimension_numbers<[1], [0], [0], [1], [0, 0, 1, 1], [], []>} : vector<16x32xf32>, vector<32x32xf32>, vector<16x32xf32> -> vector<16x32xf32>
    %355 = arith.addf %283, %354 : vector<16x32xf32>
    %c2_117 = arith.constant 2 : index
    %c64_118 = arith.constant 64 : index
    %356 = vector.load %arg2[%c2_117, %c64_118] : memref<4x320xf32, #tpu.memory_space<vmem>>, vector<1x32xf32>
    %357 = vector.shape_cast %356 : vector<1x32xf32> to vector<32xf32>
    %358 = vector.shape_cast %357 : vector<32xf32> to vector<1x32xf32>
    %359 = vector.broadcast %358 : vector<1x32xf32> to vector<16x32xf32>
    %360 = arith.addf %355, %359 : vector<16x32xf32>
    %c2_119 = arith.constant 2 : index
    %c96_120 = arith.constant 96 : index
    %361 = vector.load %arg2[%c2_119, %c96_120] : memref<4x320xf32, #tpu.memory_space<vmem>>, vector<1x32xf32>
    %362 = vector.shape_cast %361 : vector<1x32xf32> to vector<32xf32>
    %c2_121 = arith.constant 2 : index
    %c128_122 = arith.constant 128 : index
    %363 = vector.load %arg2[%c2_121, %c128_122] : memref<4x320xf32, #tpu.memory_space<vmem>>, vector<1x32xf32>
    %364 = vector.shape_cast %363 : vector<1x32xf32> to vector<32xf32>
    %cst_123 = arith.constant dense<0.000000e+00> : vector<16xf32>
    %365 = vector.multi_reduction <add>, %360, %cst_123 [1] : vector<16x32xf32> to vector<16xf32>
    %366 = vector.shape_cast %365 : vector<16xf32> to vector<16x1xf32>
    %cst_124 = arith.constant 3.200000e+01 : f32
    %367 = vector.broadcast %cst_124 : f32 to vector<16x1xf32>
    %368 = arith.divf %366, %367 : vector<16x1xf32>
    %369 = vector.broadcast %368 : vector<16x1xf32> to vector<16x32xf32>
    %370 = arith.subf %360, %369 : vector<16x32xf32>
    %371 = arith.mulf %370, %370 : vector<16x32xf32>
    %cst_125 = arith.constant dense<0.000000e+00> : vector<16xf32>
    %372 = vector.multi_reduction <add>, %371, %cst_125 [1] : vector<16x32xf32> to vector<16xf32>
    %373 = vector.shape_cast %372 : vector<16xf32> to vector<16x1xf32>
    %cst_126 = arith.constant 3.200000e+01 : f32
    %374 = vector.broadcast %cst_126 : f32 to vector<16x1xf32>
    %375 = arith.divf %373, %374 : vector<16x1xf32>
    %376 = vector.broadcast %368 : vector<16x1xf32> to vector<16x32xf32>
    %377 = arith.subf %360, %376 : vector<16x32xf32>
    %cst_127 = arith.constant 9.99999974E-6 : f32
    %378 = vector.broadcast %cst_127 : f32 to vector<16x1xf32>
    %379 = arith.addf %375, %378 : vector<16x1xf32>
    %380 = math.rsqrt %379 : vector<16x1xf32>
    %381 = vector.broadcast %380 : vector<16x1xf32> to vector<16x32xf32>
    %382 = arith.mulf %377, %381 : vector<16x32xf32>
    %383 = vector.shape_cast %362 : vector<32xf32> to vector<1x32xf32>
    %384 = vector.broadcast %383 : vector<1x32xf32> to vector<16x32xf32>
    %385 = arith.mulf %382, %384 : vector<16x32xf32>
    %386 = vector.shape_cast %364 : vector<32xf32> to vector<1x32xf32>
    %387 = vector.broadcast %386 : vector<1x32xf32> to vector<16x32xf32>
    %388 = arith.addf %385, %387 : vector<16x32xf32>
    %c2_128 = arith.constant 2 : index
    %c0_129 = arith.constant 0 : index
    %c128_130 = arith.constant 128 : index
    %389 = vector.load %arg3[%c2_128, %c0_129, %c128_130] : memref<4x32x256xf32, #tpu.memory_space<vmem>>, vector<1x32x128xf32>
    %390 = vector.shape_cast %389 : vector<1x32x128xf32> to vector<32x128xf32>
    %cst_131 = arith.constant dense<0.000000e+00> : vector<16x128xf32>
    %391 = tpu.matmul %388, %390, %cst_131 {dimension_numbers = #tpu.dot_dimension_numbers<[1], [0], [0], [1], [0, 0, 1, 1], [], []>} : vector<16x32xf32>, vector<32x128xf32>, vector<16x128xf32> -> vector<16x128xf32>
    %c2_132 = arith.constant 2 : index
    %c192_133 = arith.constant 192 : index
    %392 = vector.load %arg2[%c2_132, %c192_133] : memref<4x320xf32, #tpu.memory_space<vmem>>, vector<1x128xf32>
    %393 = vector.shape_cast %392 : vector<1x128xf32> to vector<128xf32>
    %394 = vector.shape_cast %393 : vector<128xf32> to vector<1x128xf32>
    %395 = vector.broadcast %394 : vector<1x128xf32> to vector<16x128xf32>
    %396 = arith.addf %391, %395 : vector<16x128xf32>
    %cst_134 = arith.constant 0.000000e+00 : f32
    %397 = vector.broadcast %cst_134 : f32 to vector<16x128xf32>
    %398 = arith.maximumf %396, %397 : vector<16x128xf32>
    %c2_135 = arith.constant 2 : index
    %c0_136 = arith.constant 0 : index
    %c0_137 = arith.constant 0 : index
    %399 = vector.load %arg4[%c2_135, %c0_136, %c0_137] : memref<4x128x32xf32, #tpu.memory_space<vmem>>, vector<1x128x32xf32>
    %400 = vector.shape_cast %399 : vector<1x128x32xf32> to vector<128x32xf32>
    %cst_138 = arith.constant dense<0.000000e+00> : vector<16x32xf32>
    %401 = tpu.matmul %398, %400, %cst_138 {dimension_numbers = #tpu.dot_dimension_numbers<[1], [0], [0], [1], [0, 0, 1, 1], [], []>} : vector<16x128xf32>, vector<128x32xf32>, vector<16x32xf32> -> vector<16x32xf32>
    %402 = arith.addf %360, %401 : vector<16x32xf32>
    %c2_139 = arith.constant 2 : index
    %c160_140 = arith.constant 160 : index
    %403 = vector.load %arg2[%c2_139, %c160_140] : memref<4x320xf32, #tpu.memory_space<vmem>>, vector<1x32xf32>
    %404 = vector.shape_cast %403 : vector<1x32xf32> to vector<32xf32>
    %405 = vector.shape_cast %404 : vector<32xf32> to vector<1x32xf32>
    %406 = vector.broadcast %405 : vector<1x32xf32> to vector<16x32xf32>
    %407 = arith.addf %402, %406 : vector<16x32xf32>
    %c3 = arith.constant 3 : index
    %c0_141 = arith.constant 0 : index
    %408 = vector.load %arg2[%c3, %c0_141] : memref<4x320xf32, #tpu.memory_space<vmem>>, vector<1x32xf32>
    %409 = vector.shape_cast %408 : vector<1x32xf32> to vector<32xf32>
    %c3_142 = arith.constant 3 : index
    %c32_143 = arith.constant 32 : index
    %410 = vector.load %arg2[%c3_142, %c32_143] : memref<4x320xf32, #tpu.memory_space<vmem>>, vector<1x32xf32>
    %411 = vector.shape_cast %410 : vector<1x32xf32> to vector<32xf32>
    %cst_144 = arith.constant dense<0.000000e+00> : vector<16xf32>
    %412 = vector.multi_reduction <add>, %407, %cst_144 [1] : vector<16x32xf32> to vector<16xf32>
    %413 = vector.shape_cast %412 : vector<16xf32> to vector<16x1xf32>
    %cst_145 = arith.constant 3.200000e+01 : f32
    %414 = vector.broadcast %cst_145 : f32 to vector<16x1xf32>
    %415 = arith.divf %413, %414 : vector<16x1xf32>
    %416 = vector.broadcast %415 : vector<16x1xf32> to vector<16x32xf32>
    %417 = arith.subf %407, %416 : vector<16x32xf32>
    %418 = arith.mulf %417, %417 : vector<16x32xf32>
    %cst_146 = arith.constant dense<0.000000e+00> : vector<16xf32>
    %419 = vector.multi_reduction <add>, %418, %cst_146 [1] : vector<16x32xf32> to vector<16xf32>
    %420 = vector.shape_cast %419 : vector<16xf32> to vector<16x1xf32>
    %cst_147 = arith.constant 3.200000e+01 : f32
    %421 = vector.broadcast %cst_147 : f32 to vector<16x1xf32>
    %422 = arith.divf %420, %421 : vector<16x1xf32>
    %423 = vector.broadcast %415 : vector<16x1xf32> to vector<16x32xf32>
    %424 = arith.subf %407, %423 : vector<16x32xf32>
    %cst_148 = arith.constant 9.99999974E-6 : f32
    %425 = vector.broadcast %cst_148 : f32 to vector<16x1xf32>
    %426 = arith.addf %422, %425 : vector<16x1xf32>
    %427 = math.rsqrt %426 : vector<16x1xf32>
    %428 = vector.broadcast %427 : vector<16x1xf32> to vector<16x32xf32>
    %429 = arith.mulf %424, %428 : vector<16x32xf32>
    %430 = vector.shape_cast %409 : vector<32xf32> to vector<1x32xf32>
    %431 = vector.broadcast %430 : vector<1x32xf32> to vector<16x32xf32>
    %432 = arith.mulf %429, %431 : vector<16x32xf32>
    %433 = vector.shape_cast %411 : vector<32xf32> to vector<1x32xf32>
    %434 = vector.broadcast %433 : vector<1x32xf32> to vector<16x32xf32>
    %435 = arith.addf %432, %434 : vector<16x32xf32>
    %c3_149 = arith.constant 3 : index
    %c0_150 = arith.constant 0 : index
    %c0_151 = arith.constant 0 : index
    %436 = vector.load %arg3[%c3_149, %c0_150, %c0_151] : memref<4x32x256xf32, #tpu.memory_space<vmem>>, vector<1x32x96xf32>
    %437 = vector.shape_cast %436 : vector<1x32x96xf32> to vector<32x96xf32>
    %cst_152 = arith.constant dense<0.000000e+00> : vector<16x96xf32>
    %438 = tpu.matmul %435, %437, %cst_152 {dimension_numbers = #tpu.dot_dimension_numbers<[1], [0], [0], [1], [0, 0, 1, 1], [], []>} : vector<16x32xf32>, vector<32x96xf32>, vector<16x96xf32> -> vector<16x96xf32>
    %439 = vector.extract_strided_slice %438 {offsets = [0, 0], sizes = [16, 8], strides = [1, 1]} : vector<16x96xf32> to vector<16x8xf32>
    %440 = vector.extract_strided_slice %438 {offsets = [0, 8], sizes = [16, 8], strides = [1, 1]} : vector<16x96xf32> to vector<16x8xf32>
    %441 = vector.extract_strided_slice %438 {offsets = [0, 16], sizes = [16, 8], strides = [1, 1]} : vector<16x96xf32> to vector<16x8xf32>
    %442 = vector.extract_strided_slice %438 {offsets = [0, 24], sizes = [16, 8], strides = [1, 1]} : vector<16x96xf32> to vector<16x8xf32>
    %443 = tpu.concatenate %439, %440, %441, %442 in 0 : vector<16x8xf32>, vector<16x8xf32>, vector<16x8xf32>, vector<16x8xf32> -> vector<64x8xf32>
    %444 = vector.extract_strided_slice %438 {offsets = [0, 32], sizes = [16, 8], strides = [1, 1]} : vector<16x96xf32> to vector<16x8xf32>
    %445 = vector.extract_strided_slice %438 {offsets = [0, 40], sizes = [16, 8], strides = [1, 1]} : vector<16x96xf32> to vector<16x8xf32>
    %446 = vector.extract_strided_slice %438 {offsets = [0, 48], sizes = [16, 8], strides = [1, 1]} : vector<16x96xf32> to vector<16x8xf32>
    %447 = vector.extract_strided_slice %438 {offsets = [0, 56], sizes = [16, 8], strides = [1, 1]} : vector<16x96xf32> to vector<16x8xf32>
    %448 = tpu.concatenate %444, %445, %446, %447 in 0 : vector<16x8xf32>, vector<16x8xf32>, vector<16x8xf32>, vector<16x8xf32> -> vector<64x8xf32>
    %449 = vector.extract_strided_slice %438 {offsets = [0, 64], sizes = [16, 8], strides = [1, 1]} : vector<16x96xf32> to vector<16x8xf32>
    %450 = vector.extract_strided_slice %438 {offsets = [0, 72], sizes = [16, 8], strides = [1, 1]} : vector<16x96xf32> to vector<16x8xf32>
    %451 = vector.extract_strided_slice %438 {offsets = [0, 80], sizes = [16, 8], strides = [1, 1]} : vector<16x96xf32> to vector<16x8xf32>
    %452 = vector.extract_strided_slice %438 {offsets = [0, 88], sizes = [16, 8], strides = [1, 1]} : vector<16x96xf32> to vector<16x8xf32>
    %453 = tpu.concatenate %449, %450, %451, %452 in 0 : vector<16x8xf32>, vector<16x8xf32>, vector<16x8xf32>, vector<16x8xf32> -> vector<64x8xf32>
    "tpu.trace_start"() <{level = 10 : i32, message = "qd,kd->qk"}> : () -> ()
    %cst_153 = arith.constant dense<0.000000e+00> : vector<64x64xf32>
    %454 = tpu.matmul %443, %448, %cst_153 {dimension_numbers = #tpu.dot_dimension_numbers<[1], [1], [0], [0], [0, 0, 1, 0], [], []>} : vector<64x8xf32>, vector<64x8xf32>, vector<64x64xf32> -> vector<64x64xf32>
    "tpu.trace_stop"() : () -> ()
    %455 = arith.addf %454, %35 : vector<64x64xf32>
    %cst_154 = arith.constant dense<0xFF800000> : vector<64xf32>
    %456 = vector.multi_reduction <maximumf>, %455, %cst_154 [1] : vector<64x64xf32> to vector<64xf32>
    %457 = vector.shape_cast %456 : vector<64xf32> to vector<64x1xf32>
    %458 = vector.broadcast %457 : vector<64x1xf32> to vector<64x64xf32>
    %459 = arith.subf %455, %458 : vector<64x64xf32>
    %460 = math.exp %459 : vector<64x64xf32>
    %cst_155 = arith.constant dense<0.000000e+00> : vector<64xf32>
    %461 = vector.multi_reduction <add>, %460, %cst_155 [1] : vector<64x64xf32> to vector<64xf32>
    %462 = vector.shape_cast %461 : vector<64xf32> to vector<64x1xf32>
    %463 = tpu.reciprocal %462 {approx = true} : vector<64x1xf32> -> vector<64x1xf32>
    %464 = arith.mulf %462, %463 : vector<64x1xf32>
    %cst_156 = arith.constant 2.000000e+00 : f32
    %465 = vector.broadcast %cst_156 : f32 to vector<64x1xf32>
    %466 = arith.subf %465, %464 : vector<64x1xf32>
    %467 = arith.mulf %463, %466 : vector<64x1xf32>
    %468 = vector.broadcast %467 : vector<64x1xf32> to vector<64x64xf32>
    %469 = arith.mulf %460, %468 : vector<64x64xf32>
    %cst_157 = arith.constant dense<0.000000e+00> : vector<64x8xf32>
    %470 = tpu.matmul %469, %453, %cst_157 {dimension_numbers = #tpu.dot_dimension_numbers<[1], [0], [0], [1], [0, 0, 1, 1], [], []>} : vector<64x64xf32>, vector<64x8xf32>, vector<64x8xf32> -> vector<64x8xf32>
    %471 = vector.extract_strided_slice %470 {offsets = [0, 0], sizes = [16, 8], strides = [1, 1]} : vector<64x8xf32> to vector<16x8xf32>
    %472 = vector.extract_strided_slice %470 {offsets = [16, 0], sizes = [16, 8], strides = [1, 1]} : vector<64x8xf32> to vector<16x8xf32>
    %473 = vector.extract_strided_slice %470 {offsets = [32, 0], sizes = [16, 8], strides = [1, 1]} : vector<64x8xf32> to vector<16x8xf32>
    %474 = vector.extract_strided_slice %470 {offsets = [48, 0], sizes = [16, 8], strides = [1, 1]} : vector<64x8xf32> to vector<16x8xf32>
    %475 = tpu.concatenate %471, %472, %473, %474 in 1 : vector<16x8xf32>, vector<16x8xf32>, vector<16x8xf32>, vector<16x8xf32> -> vector<16x32xf32>
    %c3_158 = arith.constant 3 : index
    %c0_159 = arith.constant 0 : index
    %c96_160 = arith.constant 96 : index
    %476 = vector.load %arg3[%c3_158, %c0_159, %c96_160] : memref<4x32x256xf32, #tpu.memory_space<vmem>>, vector<1x32x32xf32>
    %477 = vector.shape_cast %476 : vector<1x32x32xf32> to vector<32x32xf32>
    %cst_161 = arith.constant dense<0.000000e+00> : vector<16x32xf32>
    %478 = tpu.matmul %475, %477, %cst_161 {dimension_numbers = #tpu.dot_dimension_numbers<[1], [0], [0], [1], [0, 0, 1, 1], [], []>} : vector<16x32xf32>, vector<32x32xf32>, vector<16x32xf32> -> vector<16x32xf32>
    %479 = arith.addf %407, %478 : vector<16x32xf32>
    %c3_162 = arith.constant 3 : index
    %c64_163 = arith.constant 64 : index
    %480 = vector.load %arg2[%c3_162, %c64_163] : memref<4x320xf32, #tpu.memory_space<vmem>>, vector<1x32xf32>
    %481 = vector.shape_cast %480 : vector<1x32xf32> to vector<32xf32>
    %482 = vector.shape_cast %481 : vector<32xf32> to vector<1x32xf32>
    %483 = vector.broadcast %482 : vector<1x32xf32> to vector<16x32xf32>
    %484 = arith.addf %479, %483 : vector<16x32xf32>
    %c3_164 = arith.constant 3 : index
    %c96_165 = arith.constant 96 : index
    %485 = vector.load %arg2[%c3_164, %c96_165] : memref<4x320xf32, #tpu.memory_space<vmem>>, vector<1x32xf32>
    %486 = vector.shape_cast %485 : vector<1x32xf32> to vector<32xf32>
    %c3_166 = arith.constant 3 : index
    %c128_167 = arith.constant 128 : index
    %487 = vector.load %arg2[%c3_166, %c128_167] : memref<4x320xf32, #tpu.memory_space<vmem>>, vector<1x32xf32>
    %488 = vector.shape_cast %487 : vector<1x32xf32> to vector<32xf32>
    %cst_168 = arith.constant dense<0.000000e+00> : vector<16xf32>
    %489 = vector.multi_reduction <add>, %484, %cst_168 [1] : vector<16x32xf32> to vector<16xf32>
    %490 = vector.shape_cast %489 : vector<16xf32> to vector<16x1xf32>
    %cst_169 = arith.constant 3.200000e+01 : f32
    %491 = vector.broadcast %cst_169 : f32 to vector<16x1xf32>
    %492 = arith.divf %490, %491 : vector<16x1xf32>
    %493 = vector.broadcast %492 : vector<16x1xf32> to vector<16x32xf32>
    %494 = arith.subf %484, %493 : vector<16x32xf32>
    %495 = arith.mulf %494, %494 : vector<16x32xf32>
    %cst_170 = arith.constant dense<0.000000e+00> : vector<16xf32>
    %496 = vector.multi_reduction <add>, %495, %cst_170 [1] : vector<16x32xf32> to vector<16xf32>
    %497 = vector.shape_cast %496 : vector<16xf32> to vector<16x1xf32>
    %cst_171 = arith.constant 3.200000e+01 : f32
    %498 = vector.broadcast %cst_171 : f32 to vector<16x1xf32>
    %499 = arith.divf %497, %498 : vector<16x1xf32>
    %500 = vector.broadcast %492 : vector<16x1xf32> to vector<16x32xf32>
    %501 = arith.subf %484, %500 : vector<16x32xf32>
    %cst_172 = arith.constant 9.99999974E-6 : f32
    %502 = vector.broadcast %cst_172 : f32 to vector<16x1xf32>
    %503 = arith.addf %499, %502 : vector<16x1xf32>
    %504 = math.rsqrt %503 : vector<16x1xf32>
    %505 = vector.broadcast %504 : vector<16x1xf32> to vector<16x32xf32>
    %506 = arith.mulf %501, %505 : vector<16x32xf32>
    %507 = vector.shape_cast %486 : vector<32xf32> to vector<1x32xf32>
    %508 = vector.broadcast %507 : vector<1x32xf32> to vector<16x32xf32>
    %509 = arith.mulf %506, %508 : vector<16x32xf32>
    %510 = vector.shape_cast %488 : vector<32xf32> to vector<1x32xf32>
    %511 = vector.broadcast %510 : vector<1x32xf32> to vector<16x32xf32>
    %512 = arith.addf %509, %511 : vector<16x32xf32>
    %c3_173 = arith.constant 3 : index
    %c0_174 = arith.constant 0 : index
    %c128_175 = arith.constant 128 : index
    %513 = vector.load %arg3[%c3_173, %c0_174, %c128_175] : memref<4x32x256xf32, #tpu.memory_space<vmem>>, vector<1x32x128xf32>
    %514 = vector.shape_cast %513 : vector<1x32x128xf32> to vector<32x128xf32>
    %cst_176 = arith.constant dense<0.000000e+00> : vector<16x128xf32>
    %515 = tpu.matmul %512, %514, %cst_176 {dimension_numbers = #tpu.dot_dimension_numbers<[1], [0], [0], [1], [0, 0, 1, 1], [], []>} : vector<16x32xf32>, vector<32x128xf32>, vector<16x128xf32> -> vector<16x128xf32>
    %c3_177 = arith.constant 3 : index
    %c192_178 = arith.constant 192 : index
    %516 = vector.load %arg2[%c3_177, %c192_178] : memref<4x320xf32, #tpu.memory_space<vmem>>, vector<1x128xf32>
    %517 = vector.shape_cast %516 : vector<1x128xf32> to vector<128xf32>
    %518 = vector.shape_cast %517 : vector<128xf32> to vector<1x128xf32>
    %519 = vector.broadcast %518 : vector<1x128xf32> to vector<16x128xf32>
    %520 = arith.addf %515, %519 : vector<16x128xf32>
    %cst_179 = arith.constant 0.000000e+00 : f32
    %521 = vector.broadcast %cst_179 : f32 to vector<16x128xf32>
    %522 = arith.maximumf %520, %521 : vector<16x128xf32>
    %c3_180 = arith.constant 3 : index
    %c0_181 = arith.constant 0 : index
    %c0_182 = arith.constant 0 : index
    %523 = vector.load %arg4[%c3_180, %c0_181, %c0_182] : memref<4x128x32xf32, #tpu.memory_space<vmem>>, vector<1x128x32xf32>
    %524 = vector.shape_cast %523 : vector<1x128x32xf32> to vector<128x32xf32>
    %cst_183 = arith.constant dense<0.000000e+00> : vector<16x32xf32>
    %525 = tpu.matmul %522, %524, %cst_183 {dimension_numbers = #tpu.dot_dimension_numbers<[1], [0], [0], [1], [0, 0, 1, 1], [], []>} : vector<16x128xf32>, vector<128x32xf32>, vector<16x32xf32> -> vector<16x32xf32>
    %526 = arith.addf %484, %525 : vector<16x32xf32>
    %c3_184 = arith.constant 3 : index
    %c160_185 = arith.constant 160 : index
    %527 = vector.load %arg2[%c3_184, %c160_185] : memref<4x320xf32, #tpu.memory_space<vmem>>, vector<1x32xf32>
    %528 = vector.shape_cast %527 : vector<1x32xf32> to vector<32xf32>
    %529 = vector.shape_cast %528 : vector<32xf32> to vector<1x32xf32>
    %530 = vector.broadcast %529 : vector<1x32xf32> to vector<16x32xf32>
    %531 = arith.addf %526, %530 : vector<16x32xf32>
    %c0_186 = arith.constant 0 : index
    %c0_187 = arith.constant 0 : index
    %532 = vector.load %arg5[%c0_186, %c0_187] : memref<1x128xf32, #tpu.memory_space<vmem>>, vector<1x32xf32>
    %533 = vector.shape_cast %532 : vector<1x32xf32> to vector<32xf32>
    %c0_188 = arith.constant 0 : index
    %c32_189 = arith.constant 32 : index
    %534 = vector.load %arg5[%c0_188, %c32_189] : memref<1x128xf32, #tpu.memory_space<vmem>>, vector<1x32xf32>
    %535 = vector.shape_cast %534 : vector<1x32xf32> to vector<32xf32>
    %cst_190 = arith.constant dense<0.000000e+00> : vector<16xf32>
    %536 = vector.multi_reduction <add>, %531, %cst_190 [1] : vector<16x32xf32> to vector<16xf32>
    %537 = vector.shape_cast %536 : vector<16xf32> to vector<16x1xf32>
    %cst_191 = arith.constant 3.200000e+01 : f32
    %538 = vector.broadcast %cst_191 : f32 to vector<16x1xf32>
    %539 = arith.divf %537, %538 : vector<16x1xf32>
    %540 = vector.broadcast %539 : vector<16x1xf32> to vector<16x32xf32>
    %541 = arith.subf %531, %540 : vector<16x32xf32>
    %542 = arith.mulf %541, %541 : vector<16x32xf32>
    %cst_192 = arith.constant dense<0.000000e+00> : vector<16xf32>
    %543 = vector.multi_reduction <add>, %542, %cst_192 [1] : vector<16x32xf32> to vector<16xf32>
    %544 = vector.shape_cast %543 : vector<16xf32> to vector<16x1xf32>
    %cst_193 = arith.constant 3.200000e+01 : f32
    %545 = vector.broadcast %cst_193 : f32 to vector<16x1xf32>
    %546 = arith.divf %544, %545 : vector<16x1xf32>
    %547 = vector.broadcast %539 : vector<16x1xf32> to vector<16x32xf32>
    %548 = arith.subf %531, %547 : vector<16x32xf32>
    %cst_194 = arith.constant 9.99999974E-6 : f32
    %549 = vector.broadcast %cst_194 : f32 to vector<16x1xf32>
    %550 = arith.addf %546, %549 : vector<16x1xf32>
    %551 = math.rsqrt %550 : vector<16x1xf32>
    %552 = vector.broadcast %551 : vector<16x1xf32> to vector<16x32xf32>
    %553 = arith.mulf %548, %552 : vector<16x32xf32>
    %554 = vector.shape_cast %533 : vector<32xf32> to vector<1x32xf32>
    %555 = vector.broadcast %554 : vector<1x32xf32> to vector<16x32xf32>
    %556 = arith.mulf %553, %555 : vector<16x32xf32>
    %557 = vector.shape_cast %535 : vector<32xf32> to vector<1x32xf32>
    %558 = vector.broadcast %557 : vector<1x32xf32> to vector<16x32xf32>
    %559 = arith.addf %556, %558 : vector<16x32xf32>
    %c0_195 = arith.constant 0 : index
    %c0_196 = arith.constant 0 : index
    %560 = vector.load %arg6[%c0_195, %c0_196] : memref<32x64xf32, #tpu.memory_space<vmem>>, vector<32x64xf32>
    %c0_197 = arith.constant 0 : index
    %c64_198 = arith.constant 64 : index
    %561 = vector.load %arg5[%c0_197, %c64_198] : memref<1x128xf32, #tpu.memory_space<vmem>>, vector<1x64xf32>
    %562 = vector.shape_cast %561 : vector<1x64xf32> to vector<64xf32>
    %563 = vector.extract_strided_slice %559 {offsets = [0, 0], sizes = [8, 32], strides = [1, 1]} : vector<16x32xf32> to vector<8x32xf32>
    %cst_199 = arith.constant dense<0.000000e+00> : vector<8x64xf32>
    %564 = tpu.matmul %563, %560, %cst_199 {dimension_numbers = #tpu.dot_dimension_numbers<[1], [0], [0], [1], [0, 0, 1, 1], [], []>} : vector<8x32xf32>, vector<32x64xf32>, vector<8x64xf32> -> vector<8x64xf32>
    %565 = vector.shape_cast %562 : vector<64xf32> to vector<1x64xf32>
    %566 = vector.broadcast %565 : vector<1x64xf32> to vector<8x64xf32>
    %567 = arith.addf %564, %566 : vector<8x64xf32>
    %568 = vector.extract_strided_slice %559 {offsets = [8, 0], sizes = [8, 32], strides = [1, 1]} : vector<16x32xf32> to vector<8x32xf32>
    %cst_200 = arith.constant dense<0.000000e+00> : vector<8x64xf32>
    %569 = tpu.matmul %568, %560, %cst_200 {dimension_numbers = #tpu.dot_dimension_numbers<[1], [0], [0], [1], [0, 0, 1, 1], [], []>} : vector<8x32xf32>, vector<32x64xf32>, vector<8x64xf32> -> vector<8x64xf32>
    %570 = vector.shape_cast %562 : vector<64xf32> to vector<1x64xf32>
    %571 = vector.broadcast %570 : vector<1x64xf32> to vector<8x64xf32>
    %572 = arith.addf %569, %571 : vector<8x64xf32>
    %573 = tpu.concatenate %567, %572 in 1 : vector<8x64xf32>, vector<8x64xf32> -> vector<8x128xf32>
    %c0_201 = arith.constant 0 : index
    %c0_202 = arith.constant 0 : index
    %574 = vector.load %arg7[%c0_201, %c0_202] : memref<8x128xf32, #tpu.memory_space<vmem>>, vector<8x128xf32>
    tpu.vector_store %arg7[%c0_201, %c0_202], %573 {strides = array<i32>} : memref<8x128xf32, #tpu.memory_space<vmem>>, vector<8x128xf32>,
    return
  }
}

</mosaic_0001>

<bundles_post_ra>
// kernel: self_attention_model.1
= control target key start
LH: loop header
LB: loop body
LE: loop exit
PB: predicated region body
PF: predicated region fallthrough
CT: control target
= control target key end

     0   :  { %v6092_v0 = vmov 0   ;;  %v28_v15 = vlaneseq  ;;  %vm7604_vm0 = vcmask 523264   ;;  %v6093_v18 = vmov 0.0   ;;  %s6094_s25 = smov 96   ;;  %s6095_s11 = smov 112   ;;  %s7594_s0 = inlined_call_operand.vmem [shape: s32[16,1], index: 0, kind: input, shape index: {}]   ;;  %s7595_s1 = inlined_call_operand.vmem [shape: f32[80,32], index: 1, kind: input, shape index: {}]   ;;  %s7596_s2 = inlined_call_operand.vmem [shape: f32[4,320], index: 2, kind: input, shape index: {}]   ;;  %s7597_s3 = inlined_call_operand.vmem [shape: f32[4,32,256], index: 3, kind: input, shape index: {}]   ;;  %s7598_s4 = inlined_call_operand.vmem [shape: f32[4,128,32], index: 4, kind: input, shape index: {}]   ;;  %s7599_s5 = inlined_call_operand.vmem [shape: f32[1,128], index: 5, kind: input, shape index: {}]   ;;  %s7600_s6 = inlined_call_operand.vmem [shape: f32[32,64], index: 6, kind: input, shape index: {}]   ;;  %s7601_s7 = inlined_call_operand.vmem [shape: f32[8,128], index: 7, kind: output, shape index: {}]  }
   0x1   :  { %5727 = vset.pattern.permute.xlu0 %v6092_v0  ;;  %v26_v1 = vld [vmem:[%s7594_s0] sm:$0xff]  ;;  %v43_v3 = vld [vmem:[%s7595_s1 + $0x8] sm:$0xff]  ;;  %v44_v4 = vld [vmem:[%s7595_s1 + $0x10] sm:$0xff]  ;;  %vm7602_vm3 = vcmask 261120   ;;  %vm7603_vm4 = vcmask 64512   ;;  %s6096_s12 = smov 120  }
   0x2   :  { %v42_v2 = vld [vmem:[%s7595_s1] sm:$0xff]  ;;  %31 = vperm.xlu0 %5727, %v26_v1   ;;  %v45_v5 = vld [vmem:[%s7595_s1 + $0x18] sm:$0xff]  ;;  %v27_v6 = vld [vmem:[%s7594_s0 + $0x8] sm:$0xff]  ;;  %v6177_v16 = vand.u32 127, %v28_v15  ;;  %s6097_s13 = smov 104   ;;  %s6099_s14 = smov 64  }
   0x3   :  { %v5301_v7 = vpack.c.bf16 %v43_v3, %v42_v2  ;;  %v5305_v8 = vpack.c.bf16 %v45_v5, %v44_v4  ;;  %v46_v9 = vld [vmem:[%s7595_s1 + $0x20] sm:$0xff]  ;;  %v47_v10 = vld [vmem:[%s7595_s1 + $0x28] sm:$0xff]  ;;  %v48_v12 = vld [vmem:[%s7595_s1 + $0x30] sm:$0xff]  ;;  %s6100_s15 = smov 32   ;;  %s6101_s16 = smov 8  }
   0x4   :  { %v5309_v11 = vpack.c.bf16 %v47_v10, %v46_v9  ;;  %v49_v13 = vld [vmem:[%s7595_s1 + $0x38] sm:$0xff]  ;;  %v50_v22 = vld [vmem:[%s7595_s1 + $0x40] sm:$0xff]  ;;  %v51_v24 = vld [vmem:[%s7595_s1 + $0x48] sm:$0xff]  ;;  %s6102_s17 = smov 16   ;;  %s6103_s18 = smov 24  }
   0x5   :  { %5302 = vmatprep.subr.bf16.mxu0 %v5301_v7  ;;  %v5313_v14 = vpack.c.bf16 %v49_v13, %v48_v12  ;;  %v6206_v40 = vld [vmem:[%s7596_s2] ss:$0 sm:$0xff]  ;;  %v6218_v42 = vld [vmem:[%s7597_s3 + $0x10] sm:$0xff]  ;;  %vm6263_vm5 = vmpackc.low %vm7603_vm4, %vm7603_vm4  ;;  %v7607_v13 = vmov 0 }
   0x6   :  { %34 = vperm.xlu0 %5727, %v27_v6   ;;  %5304 = vmatpush3.bf16.msra.mxu0 %v5301_v7  ;;  %v6213_v41 = vld [vmem:[%s7597_s3] sm:$0xff]  ;;  %v6230_v45 = vld [vmem:[%s7597_s3 + $0x30] sm:$0xff]  ;;  %v7608_v13 = vsel %vm6263_vm5, 4294967295, %v7607_v13 }
   0x7   :  { %5306 = vmatprep.subr.bf16.mxu0 %v5305_v8  ;;  %v5317_v43 = vpack.c.bf16 %v6218_v42, %v6213_v41  ;;  %v6225_v44 = vld [vmem:[%s7597_s3 + $0x20] sm:$0xff] }
   0x8   :  { %v5321_v46 = vpack.c.bf16 %v6230_v45, %v6225_v44 }
   0x9   :  { %5318 = vmatprep.subr.bf16.mxu1 %v5317_v43 }
   0xa   :  { %5308 = vmatpush3.bf16.msra.mxu0 %v5305_v8  ;;  %5320 = vmatpush3.bf16.msra.mxu1 %v5317_v43 }
   0xb   :  { %5310 = vmatprep.subr.bf16.mxu0 %v5309_v11  ;;  %5322 = vmatprep.subr.bf16.mxu1 %v5321_v46 }
   0xe   :  { %5312 = vmatpush3.bf16.msra.mxu0 %v5309_v11  ;;  %5324 = vmatpush3.bf16.msra.mxu1 %v5321_v46 }
   0xf   :  { %5314 = vmatprep.subr.bf16.mxu0 %v5313_v14 }
  0x12   :  { %5316 = vmatpush3.bf16.msra.mxu0 %v5313_v14 }
  0x81   :  { %v32_v17 = vpop.permute.xlu0 %31 }
  0x82   :  { %vm36_vm1 = vcmp.eq.s32.totalorder %v32_v17, %v6177_v16 }
  0x83   :  { %v4249_v19 = vsel %vm36_vm1, 1.0, %v6093_v18 }
  0x84   :  { %4780 = vmatprep.mubr.msk.f32.mxu0 %vm7604_vm0, %v4249_v19 }
  0x85   :  { %v35_v20 = vpop.permute.xlu0 %34 }
  0x86   :  { %vm37_vm2 = vcmp.eq.s32.totalorder %v35_v20, %v6177_v16 }
  0x87   :  { %v4250_v21 = vsel %vm37_vm2, 1.0, %v6093_v18 }
  0x88   :  { %4781 = vmatmul.mubr.msk.f32.vlgmr.msra.gmra.mrb[0].mxu0 %vm7604_vm0, %v4250_v21 }
 0x15b   :  { %v4782_v23 = vpop.f32.mrb[0].mxu0 }
 0x15c   :  { %v125_v25 = vpop.f32.mrb[1].mxu0  ;;  %v6193_v27 = vadd.f32 %v4782_v23, %v51_v24 }
 0x15d   :  { %v6191_v26 = vadd.f32 %v125_v25, %v50_v22 }
 0x15e   :  { %v232_v29 = vsel %vm7602_vm3, %v6193_v27, 0.0 }
 0x15f   :  { %v229_v28 = vsel %vm7602_vm3, %v6191_v26, 0.0 }
 0x160   :  { %230 = vadd.xlane.f32.xlu1 %v229_v28 }
 0x164   :  { %233 = vadd.xlane.f32.xlu1 %v232_v29 }
 0x1ed   :  { %v231_v30 = vpop.xlane.xlu1 %230 }
 0x1ee   :  { %v236_v31 = vmul.f32 0.03125, %v231_v30 }
 0x1f0   :  { %v238_v32 = vsub.f32 %v6191_v26, %v236_v31 }
 0x1f1   :  { %v234_v33 = vpop.xlane.xlu1 %233 }
 0x1f2   :  { %v237_v34 = vmul.f32 0.03125, %v234_v33  ;;  %v240_v35 = vmul.f32 %v238_v32, %v238_v32 }
 0x1f4   :  { %v239_v36 = vsub.f32 %v6193_v27, %v237_v34  ;;  %v242_v37 = vsel %vm7602_vm3, %v240_v35, 0.0  ;;  %v176_v34 = vshra.s32 %v6177_v16, 3 }
 0x1f5   :  { %243 = vadd.xlane.f32.xlu0 %v242_v37 }
 0x1f6   :  { %v241_v38 = vmul.f32 %v239_v36, %v239_v36 }
 0x1f8   :  { %v245_v39 = vsel %vm7602_vm3, %v241_v38, 0.0  ;;  %v6298_v38 = vshra.s32 %v6177_v16, 4 }
 0x1f9   :  { %246 = vadd.xlane.f32.xlu1 %v245_v39  ;;  %v6300_v39 = vand.u32 1, %v176_v34 }
 0x20a   :  { %263 = vrot.lane.b32.xlu1 %v6206_v40, %s6094_s25 }
 0x282   :  { %v244_v47 = vpop.xlane.xlu0 %243 }
 0x283   :  { %v248_v48 = vmul.f32 0.03125, %v244_v47 }
 0x285   :  { %v250_v49 = vadd.f32 1e-05, %v248_v48 }
 0x286   :  { %v247_v50 = vpop.xlane.xlu1 %246 }
 0x287   :  { %5928 = vrsqrt.f32 %v250_v49  ;;  %v249_v51 = vmul.f32 0.03125, %v247_v50  ;;  %v6305_v50 = vand.u32 7, %v6177_v16 }
 0x289   :  { %v251_v52 = vadd.f32 1e-05, %v249_v51 }
 0x28a   :  { %v264_v55 = vpop.permute.xlu1 %263 }
 0x28b   :  { %5930 = vrsqrt.f32 %v251_v52 }
 0x291   :  { %v5929_v53 = vpop.eup %5928 }
 0x292   :  { %v254_v54 = vmul.f32 %v5929_v53, %v238_v32  ;;  %v6291_v32 = vshrl.u32 %v28_v15, 7 }
 0x294   :  { %v260_v56 = vmul.f32 %v6206_v40, %v254_v54  ;;  %v136_v33 = vadd.s32 8, %v6291_v32  ;;  %v137_v37 = vadd.s32 16, %v6291_v32  ;;  %v160_v47 = vshra.s32 %v6291_v32, 3 }
 0x295   :  { %v5931_v57 = vpop.eup %5930  ;;  %v140_v49 = vadd.s32 40, %v6291_v32  ;;  %v139_v52 = vadd.s32 32, %v6291_v32  ;;  %v143_v53 = vshra.s32 %v6291_v32, 4 }
 0x296   :  { %v255_v58 = vmul.f32 %v5931_v57, %v239_v36  ;;  %v266_v59 = vadd.f32 %v264_v55, %v260_v56  ;;  %v161_v35 = vshra.s32 %v136_v33, 3  ;;  %v138_v36 = vadd.s32 24, %v6291_v32 }
 0x297   :  { %v144_v43 = vshra.s32 %v136_v33, 4  ;;  %v162_v48 = vshra.s32 %v137_v37, 3  ;;  %v187_v51 = vand.u32 7, %v136_v33  ;;  %v168_v54 = vand.u32 1, %v160_v47 }
 0x298   :  { %v261_v60 = vmul.f32 %v6206_v40, %v255_v58  ;;  %4791 = vmatprep.mubr.msk.f32.mxu1 %vm7602_vm3, %v266_v59  ;;  %v169_v46 = vand.u32 1, %v161_v35  ;;  %v163_v15 = vshra.s32 %v138_v36, 3  ;;  %v145_v57 = vshra.s32 %v137_v37, 4 }
 0x299   :  { %vm153_vm6 = vcmp.eq.s32.totalorder %v144_v43, %v6298_v38  ;;  %v170_v58 = vand.u32 1, %v162_v48  ;;  %v165_v59 = vshra.s32 %v140_v49, 3  ;;  %vm6312_vm8 = vcmp.ge.s32.totalorder %v187_v51, %v6305_v50 }
 0x29a   :  { %v267_v61 = vadd.f32 %v264_v55, %v261_v60  ;;  %vm179_vm7 = vcmp.eq.s32.totalorder %v169_v46, %v6300_v39  ;;  %v146_v55 = vshra.s32 %v138_v36, 4  ;;  %v171_v56 = vand.u32 1, %v163_v15 }
 0x29b   :  { %vm6316_vm9 = vmand %vm153_vm6, %vm179_vm7  ;;  %vm152_vm10 = vcmp.eq.s32.totalorder %v143_v53, %v6298_v38  ;;  %vm178_vm11 = vcmp.eq.s32.totalorder %v168_v54, %v6300_v39  ;;  %vm154_vm15 = vcmp.eq.s32.totalorder %v145_v57, %v6298_v38  ;;  %vm180_vm1 = vcmp.eq.s32.totalorder %v170_v58, %v6300_v39 }
 0x29c   :  { %4792 = vmatmul.mubr.msk.f32.vlgmr.msra.gmra.mrb[0].mxu1 %vm7602_vm3, %v267_v61  ;;  %v186_v61 = vand.u32 7, %v6291_v32  ;;  %vm155_vm12 = vcmp.eq.s32.totalorder %v146_v55, %v6298_v38  ;;  %vm181_vm13 = vcmp.eq.s32.totalorder %v171_v56, %v6300_v39  ;;  %vm212_vm14 = vmand %vm6316_vm9, %vm6312_vm8 }
 0x29d   :  { %vm6340_vm6 = vmand %vm152_vm10, %vm178_vm11 }
 0x29e   :  { %vm6336_vm2 = vcmp.ge.s32.totalorder %v186_v61, %v6305_v50  ;;  %vm6349_vm3 = vmand %vm155_vm12, %vm181_vm13 }
 0x29f   :  { %vm6359_vm10 = vmand %vm154_vm15, %vm180_vm1 }
 0x2a0   :  { %vm211_vm11 = vmand %vm6340_vm6, %vm6336_vm2  ;;  %vm7637_vm2 = vcmask 523264  }
 0x36f   :  { %v4793_v62 = vpop.f32.mrb[0].mxu1 }
 0x370   :  { %361 = vrot.lane.b32.xlu0 %v4793_v62, %s6095_s11  ;;  %v344_v63 = vpop.f32.mrb[1].mxu1 }
 0x371   :  { %355 = vrot.lane.b32.xlu1 %v344_v63, %s6096_s12  ;;  %4810 = vmatprep.mubr.msk.f32.mxu1 %vm7603_vm4, %v344_v63  ;;  %v6241_v0 = vpack.i.bf16 %v4793_v62, %v344_v63 }
 0x375   :  { %357 = vrot.lane.b32.xlu1 %v4793_v62, %s6096_s12 }
 0x379   :  { %359 = vrot.lane.b32.xlu1 %v344_v63, %s6095_s11 }
 0x37d   :  { %363 = vrot.lane.b32.xlu1 %v344_v63, %s6097_s13  ;;  %v142_v63 = vadd.s32 56, %v6291_v32 }
 0x37f   :  { %v193_v15 = vand.u32 7, %v142_v63 }
 0x381   :  { %365 = vrot.lane.b32.xlu1 %v4793_v62, %s6097_s13 }
 0x385   :  { %5729 = vrot.lane.b32.xlu1 %v6241_v0, %s6094_s25 }
 0x3e2   :  { %v362_v4 = vpop.permute.xlu0 %361 }
 0x3e3   :  { %v356_v1 = vpop.permute.xlu1 %355 }
 0x3e7   :  { %v358_v2 = vpop.permute.xlu1 %357 }
 0x3e8   :  { %v6249_v3 = vpack.i.bf16 %v358_v2, %v356_v1 }
 0x3ea   :  { %5734 = vrot.lane.b32.xlu1 %v6249_v3, %s6094_s25 }
 0x3eb   :  { %v360_v5 = vpop.permute.xlu1 %359 }
 0x3ec   :  { %v6253_v6 = vpack.i.bf16 %v362_v4, %v360_v5 }
 0x3ee   :  { %5739 = vrot.lane.b32.xlu1 %v6253_v6, %s6094_s25 }
 0x3ef   :  { %v364_v7 = vpop.permute.xlu1 %363 }
 0x3f3   :  { %v366_v8 = vpop.permute.xlu1 %365 }
 0x3f4   :  { %v6257_v9 = vpack.i.bf16 %v366_v8, %v364_v7 }
 0x3f6   :  { %5744 = vrot.lane.b32.xlu0 %v6257_v9, %s6094_s25 }
 0x3f7   :  { %v5730_v10 = vpop.permute.xlu1 %5729 }
 0x3f8   :  { %v5732_v11 = vunpack.i.h.bf16 %v5730_v10  ;;  %v5731_v12 = vunpack.i.l.bf16 %v5730_v10 }
 0x3fa   :  { %v5325_v14 = vpack.c.bf16 %v5732_v11, %v5731_v12  ;;  %v147_v11 = vshra.s32 %v139_v52, 4 }
 0x3fc   :  { %5327 = vmatprep.subr.msk.bf16.mxu1 %vm6263_vm5, %v5325_v14  ;;  %vm156_vm1 = vcmp.eq.s32.totalorder %v147_v11, %v6298_v38 }
 0x3fd   :  { %5330 = vmatpush3.bf16.xpose.msk.msra.mxu1 %vm6263_vm5, %v5325_v14  ;;  %v167_v14 = vshra.s32 %v142_v63, 3 }
 0x45c   :  { %v5735_v17 = vpop.permute.xlu1 %5734 }
 0x45d   :  { %v5737_v19 = vunpack.i.h.bf16 %v5735_v17  ;;  %v5736_v20 = vunpack.i.l.bf16 %v5735_v17 }
 0x45f   :  { %v5331_v21 = vpack.c.bf16 %v5737_v19, %v5736_v20 }
 0x460   :  { %v5740_v22 = vpop.permute.xlu1 %5739 }
 0x461   :  { %v5742_v23 = vunpack.i.h.bf16 %v5740_v22  ;;  %v5741_v24 = vunpack.i.l.bf16 %v5740_v22  ;;  %5333 = vmatprep.subr.msk.bf16.mxu1 %vm6263_vm5, %v5331_v21 }
 0x462   :  { %5336 = vmatpush3.bf16.xpose.msk.msra.mxu1 %vm6263_vm5, %v5331_v21 }
 0x463   :  { %v5337_v25 = vpack.c.bf16 %v5742_v23, %v5741_v24  ;;  %v191_v23 = vand.u32 7, %v140_v49 }
 0x465   :  { %5339 = vmatprep.subr.msk.bf16.mxu1 %vm6263_vm5, %v5337_v25  ;;  %vm6394_vm6 = vcmp.ge.s32.totalorder %v191_v23, %v6305_v50 }
 0x468   :  { %v5745_v28 = vpop.permute.xlu0 %5744 }
 0x469   :  { %v5747_v29 = vunpack.i.h.bf16 %v5745_v28  ;;  %v5746_v30 = vunpack.i.l.bf16 %v5745_v28  ;;  %v150_v28 = vshra.s32 %v142_v63, 4 }
 0x46a   :  { %5342 = vmatpush3.bf16.xpose.msk.msra.mxu1 %vm6263_vm5, %v5337_v25  ;;  %v190_v25 = vand.u32 7, %v139_v52 }
 0x46b   :  { %v5343_v31 = vpack.c.bf16 %v5747_v29, %v5746_v30  ;;  %v175_v29 = vand.u32 1, %v167_v14  ;;  %v6098_v30 = vmov -1e+30  }
 0x46c   :  { %v6391_v35 = vsel %vm211_vm11, 0.0, %v6098_v30  ;;  %vm6405_vm9 = vcmp.ge.s32.totalorder %v190_v25, %v6305_v50  ;;  %vm6415_vm11 = vcmp.eq.s32.totalorder %v150_v28, %v6298_v38 }
 0x46d   :  { %5345 = vmatprep.subr.msk.bf16.mxu1 %vm6263_vm5, %v5343_v31 }
 0x472   :  { %5348 = vmatpush3.bf16.xpose.msk.msra.mxu1 %vm6263_vm5, %v5343_v31  ;;  %v6384_v31 = vsel %vm212_vm14, 0.0, %v6098_v30 }
 0x479   :  { %4811 = vmatmul.mubr.msk.f32.vlgmr.msra.gmra.mrb[2].mxu1 %vm7603_vm4, %v4793_v62  ;;  %v164_v62 = vshra.s32 %v139_v52, 3 }
 0x47a   :  { %4813 = vmatprep.mubr.msk.f32.mxu1 %vm7603_vm4, %v356_v1  ;;  %v189_v1 = vand.u32 7, %v138_v36 }
 0x47b   :  { %v172_v12 = vand.u32 1, %v164_v62 }
 0x47c   :  { %vm6345_vm7 = vcmp.ge.s32.totalorder %v189_v1, %v6305_v50 }
 0x47d   :  { %4814 = vmatmul.mubr.msk.f32.gmra.mrb[4].mxu1 %vm7603_vm4, %v358_v2  ;;  %v6325_v2 = vadd.s32 48, %v6291_v32  ;;  %vm214_vm15 = vmand %vm6349_vm3, %vm6345_vm7  ;;  %vm182_vm0 = vcmp.eq.s32.totalorder %v172_v12, %v6300_v39 }
 0x47e   :  { %4816 = vmatprep.mubr.msk.f32.mxu1 %vm7603_vm4, %v360_v5  ;;  %v148_v5 = vshra.s32 %v140_v49, 4  ;;  %vm6409_vm14 = vmand %vm156_vm1, %vm182_vm0  ;;  %v6427_v54 = vsel %vm214_vm15, 0.0, %v6098_v30  ;;  %vm6449_vm15 = vcmp.ge.s32.totalorder %v193_v15, %v6305_v50 }
 0x47f   :  { %v166_v20 = vshra.s32 %v6325_v2, 3  ;;  %v149_v33 = vshra.s32 %v6325_v2, 4  ;;  %v192_v52 = vand.u32 7, %v6325_v2  ;;  %vm215_vm3 = vmand %vm6409_vm14, %vm6405_vm9 }
 0x480   :  { %vm6368_vm12 = vcmp.eq.s32.totalorder %v148_v5, %v6298_v38  ;;  %vm7639_vm7 = vmmov %vm7637_vm2  ;;  %v6477_v1 = vsel %vm215_vm3, 0.0, %v6098_v30 }
 0x481   :  { %4817 = vmatmul.mubr.msk.f32.gmra.mrb[6].mxu1 %vm7603_vm4, %v362_v4  ;;  %v188_v4 = vand.u32 7, %v137_v37  ;;  %v174_v34 = vand.u32 1, %v166_v20  ;;  %vm7649_vm14 = vmmov %vm7639_vm7 }
 0x482   :  { %4819 = vmatprep.mubr.msk.f32.mxu1 %vm7603_vm4, %v364_v7  ;;  %v173_v7 = vand.u32 1, %v165_v59 }
 0x483   :  { %vm184_vm1 = vcmp.eq.s32.totalorder %v174_v34, %v6300_v39 }
 0x484   :  { %vm183_vm13 = vcmp.eq.s32.totalorder %v173_v7, %v6300_v39 }
 0x485   :  { %4820 = vmatmul.mubr.msk.f32.gmra.mrb[8].mxu1 %vm7603_vm4, %v366_v8  ;;  %vm6355_vm4 = vcmp.ge.s32.totalorder %v188_v4, %v6305_v50  ;;  %vm6400_vm8 = vmand %vm6368_vm12, %vm183_vm13  ;;  %vm185_vm12 = vcmp.eq.s32.totalorder %v175_v29, %v6300_v39  ;;  %vm158_vm13 = vcmp.eq.s32.totalorder %v149_v33, %v6298_v38 }
 0x486   :  { %vm216_vm0 = vmand %vm6400_vm8, %vm6394_vm6 }
 0x487   :  { %vm7638_vm5 = vmand %vm6359_vm10, %vm6355_vm4  ;;  %vm6461_vm4 = vcmp.ge.s32.totalorder %v192_v52, %v6305_v50  ;;  %v6475_v63 = vsel %vm216_vm0, 0.0, %v6098_v30 }
 0x488   :  { %v6441_v56 = vsel %vm7638_vm5, 0.0, %v6098_v30  ;;  %vm6465_vm5 = vmand %vm158_vm13, %vm184_vm1 }
 0x489   :  { %vm7648_vm10 = vmmov %vm7639_vm7 }
 0x48a   :  { %vm7650_vm6 = vmmov %vm7639_vm7 }
 0x48b   :  { %vm7651_vm8 = vmmov %vm7650_vm6 }
 0x48c   :  { %vm7653_vm0 = vmmov %vm7650_vm6 }
 0x48d   :  { %vm7654_vm13 = vmmov %vm7653_vm0 }
 0x48e   :  { %vm7655_vm1 = vmmov %vm7653_vm0 }
 0x48f   :  { %vm7656_vm3 = vmmov %vm7653_vm0 }
 0x54c   :  { %v4812_v43 = vpop.f32.mrb[2].mxu1 }
 0x54d   :  { %v488_v48 = vadd.f32 %v4812_v43, %v6384_v31  ;;  %v482_v49 = vpop.f32.mrb[3].mxu1 }
 0x54e   :  { %v483_v53 = vadd.f32 %v482_v49, %v6391_v35 }
 0x54f   :  { %v524_v55 = vsel %vm7637_vm2, %v488_v48, -inf  ;;  %vm6455_vm2 = vmand %vm6415_vm11, %vm185_vm12 }
 0x550   :  { %525 = vmax.xlane.f32.xlu0 %v524_v55  ;;  %v4815_v57 = vpop.f32.mrb[4].mxu1  ;;  %v521_v38 = vsel %vm7639_vm7, %v483_v53, -inf  ;;  %vm218_vm9 = vmand %vm6455_vm2, %vm6449_vm15 }
 0x551   :  { %v498_v59 = vadd.f32 %v4815_v57, %v6427_v54  ;;  %v492_v60 = vpop.f32.mrb[5].mxu1  ;;  %522 = vmax.xlane.f32.xlu1 %v521_v38  ;;  %vm217_vm11 = vmand %vm6465_vm5, %vm6461_vm4  ;;  %v6491_v10 = vsel %vm218_vm9, 0.0, %v6098_v30 }
 0x552   :  { %v493_v62 = vadd.f32 %v492_v60, %v6441_v56  ;;  %v6493_v11 = vsel %vm217_vm11, 0.0, %v6098_v30  ;;  %vm7652_vm12 = vmmov %vm7650_vm6 }
 0x553   :  { %v530_v50 = vsel %vm7648_vm10, %v498_v59, -inf  ;;  %vm7657_vm7 = vmmov %vm7653_vm0 }
 0x554   :  { %v4818_v2 = vpop.f32.mrb[6].mxu1  ;;  %v527_v4 = vsel %vm7649_vm14, %v493_v62, -inf  ;;  %vm7658_vm15 = vmmov %vm7653_vm0 }
 0x555   :  { %v508_v5 = vadd.f32 %v4818_v2, %v6475_v63  ;;  %v502_v7 = vpop.f32.mrb[7].mxu1  ;;  %528 = vmax.xlane.f32.xlu0 %v527_v4  ;;  %531 = vmax.xlane.f32.xlu1 %v530_v50  ;;  %vm7659_vm2 = vmmov %vm7653_vm0 }
 0x556   :  { %v503_v8 = vadd.f32 %v502_v7, %v6477_v1  ;;  %vm7660_vm4 = vmmov %vm7653_vm0 }
 0x557   :  { %v536_v12 = vsel %vm7650_vm6, %v508_v5, -inf  ;;  %vm7661_vm5 = vmmov %vm7653_vm0 }
 0x558   :  { %v4821_v14 = vpop.f32.mrb[8].mxu1  ;;  %v533_v17 = vsel %vm7651_vm8, %v503_v8, -inf  ;;  %vm7662_vm10 = vmmov %vm7653_vm0 }
 0x559   :  { %v518_v19 = vadd.f32 %v4821_v14, %v6491_v10  ;;  %v512_v20 = vpop.f32.mrb[9].mxu1  ;;  %534 = vmax.xlane.f32.xlu0 %v533_v17  ;;  %537 = vmax.xlane.f32.xlu1 %v536_v12  ;;  %vm7663_vm9 = vmmov %vm7653_vm0 }
 0x55a   :  { %v513_v21 = vadd.f32 %v512_v20, %v6493_v11  ;;  %vm7664_vm14 = vmmov %vm7653_vm0 }
 0x55b   :  { %v542_v22 = vsel %vm7652_vm12, %v518_v19, -inf  ;;  %vm7665_vm11 = vmmov %vm7653_vm0 }
 0x55c   :  { %v539_v23 = vsel %vm7653_vm0, %v513_v21, -inf  ;;  %vm7666_vm6 = vmmov %vm7653_vm0 }
 0x55d   :  { %540 = vmax.xlane.f32.xlu0 %v539_v23  ;;  %543 = vmax.xlane.f32.xlu1 %v542_v22  ;;  %vm7667_vm8 = vmmov %vm7653_vm0 }
 0x55e   :  { %vm7668_vm12 = vmmov %vm7653_vm0 }
 0x56e   :  { %5754 = vrot.lane.b32.xlu1 %v6249_v3, %s6099_s14 }
 0x573   :  { %5749 = vrot.lane.b32.xlu0 %v6241_v0, %s6099_s14 }
 0x5dd   :  { %v526_v24 = vpop.xlane.xlu0 %525 }
 0x5de   :  { %v546_v25 = vsub.f32 %v488_v48, %v526_v24  ;;  %v523_v28 = vpop.xlane.xlu1 %522 }
 0x5df   :  { %v545_v29 = vsub.f32 %v483_v53, %v523_v28 }
 0x5e0   :  { %v555_v30 = vmul.f32 1.442695, %v546_v25 }
 0x5e1   :  { %v553_v33 = vmul.f32 1.442695, %v545_v29 }
 0x5e2   :  { %5932 = vpow2.f32 %v555_v30  ;;  %v529_v34 = vpop.xlane.xlu0 %528  ;;  %v532_v36 = vpop.xlane.xlu1 %531  ;;  %v5768_v30 = vpack.i.bf16 %v6218_v42, %v6213_v41 }
 0x5e3   :  { %5934 = vpow2.f32 %v553_v33  ;;  %v547_v37 = vsub.f32 %v493_v62, %v529_v34  ;;  %v548_v43 = vsub.f32 %v498_v59, %v532_v36 }
 0x5e5   :  { %v557_v46 = vmul.f32 1.442695, %v547_v37  ;;  %v559_v47 = vmul.f32 1.442695, %v548_v43 }
 0x5e6   :  { %v535_v15 = vpop.xlane.xlu0 %534  ;;  %v538_v49 = vpop.xlane.xlu1 %537 }
 0x5e7   :  { %5936 = vpow2.f32 %v557_v46  ;;  %v549_v3 = vsub.f32 %v503_v8, %v535_v15  ;;  %v550_v51 = vsub.f32 %v508_v5, %v538_v49 }
 0x5e8   :  { %5938 = vpow2.f32 %v559_v47 }
 0x5e9   :  { %v561_v0 = vmul.f32 1.442695, %v549_v3  ;;  %v563_v48 = vmul.f32 1.442695, %v550_v51 }
 0x5ea   :  { %v541_v52 = vpop.xlane.xlu0 %540  ;;  %v544_v53 = vpop.xlane.xlu1 %543 }
 0x5eb   :  { %5940 = vpow2.f32 %v561_v0  ;;  %v551_v55 = vsub.f32 %v513_v21, %v541_v52  ;;  %v552_v57 = vsub.f32 %v518_v19, %v544_v53 }
 0x5ec   :  { %v6505_v38 = vpop.eup %5932  ;;  %5942 = vpow2.f32 %v563_v48 }
 0x5ed   :  { %v6507_v39 = vpop.eup %5934  ;;  %v565_v58 = vmul.f32 1.442695, %v551_v55  ;;  %v567_v59 = vmul.f32 1.442695, %v552_v57  ;;  %v572_v60 = vsel %vm7654_vm13, %v6505_v38, 0.0  ;;  %vm812_vm13 = vcmask 130048  }
 0x5ee   :  { %v5750_v16 = vpop.permute.xlu0 %5749  ;;  %573 = vadd.xlane.f32.xlu1 %v572_v60  ;;  %v5755_v61 = vpop.permute.xlu1 %5754  ;;  %v569_v62 = vsel %vm7655_vm1, %v6507_v39, 0.0  ;;  %vm815_vm1 = vcmask 195584  }
 0x5ef   :  { %5944 = vpow2.f32 %v565_v58  ;;  %v5752_v50 = vunpack.i.h.bf16 %v5750_v16  ;;  %v5751_v2 = vunpack.i.l.bf16 %v5750_v16  ;;  %v5757_v4 = vunpack.i.h.bf16 %v5755_v61  ;;  %570 = vadd.xlane.f32.xlu0 %v569_v62 }
 0x5f0   :  { %5946 = vpow2.f32 %v567_v59  ;;  %v5756_v5 = vunpack.i.l.bf16 %v5755_v61 }
 0x5f1   :  { %v6513_v7 = vpop.eup %5936  ;;  %v5349_v8 = vpack.c.bf16 %v5752_v50, %v5751_v2 }
 0x5f2   :  { %v6515_v12 = vpop.eup %5938  ;;  %v575_v14 = vsel %vm7656_vm3, %v6513_v7, 0.0  ;;  %v5353_v19 = vpack.c.bf16 %v5757_v4, %v5756_v5  ;;  %vm7669_vm3 = vcmask 64512  }
 0x5f3   :  { %5350 = vmatprep.subr.bf16.mxu0 %v5349_v8  ;;  %576 = vadd.xlane.f32.xlu0 %v575_v14  ;;  %v578_v17 = vsel %vm7657_vm7, %v6515_v12, 0.0  ;;  %vm7670_vm7 = vmmov %vm7669_vm3 }
 0x5f4   :  { %579 = vadd.xlane.f32.xlu1 %v578_v17  ;;  %5352 = vmatpush3.bf16.msra.mxu0 %v5349_v8 }
 0x5f5   :  { %v6521_v20 = vpop.eup %5940  ;;  %5354 = vmatprep.subr.bf16.mxu0 %v5353_v19 }
 0x5f6   :  { %v6523_v21 = vpop.eup %5942  ;;  %v581_v22 = vsel %vm7658_vm15, %v6521_v20, 0.0  ;;  %vm7671_vm15 = vcmask 261120  }
 0x5f7   :  { %582 = vadd.xlane.f32.xlu0 %v581_v22  ;;  %v584_v23 = vsel %vm7659_vm2, %v6523_v21, 0.0  ;;  %vm7672_vm2 = vmmov %vm7671_vm15 }
 0x5f8   :  { %585 = vadd.xlane.f32.xlu1 %v584_v23  ;;  %5356 = vmatpush3.bf16.msra.mxu0 %v5353_v19 }
 0x5f9   :  { %v6529_v24 = vpop.eup %5944 }
 0x5fa   :  { %v6531_v25 = vpop.eup %5946  ;;  %v587_v28 = vsel %vm7660_vm4, %v6529_v24, 0.0  ;;  %vm7673_vm4 = vmmov %vm7672_vm2 }
 0x5fb   :  { %588 = vadd.xlane.f32.xlu0 %v587_v28  ;;  %v590_v29 = vsel %vm7661_vm5, %v6531_v25, 0.0  ;;  %vm7674_vm5 = vmmov %vm7672_vm2 }
 0x5fc   :  { %591 = vadd.xlane.f32.xlu1 %v590_v29 }
 0x60d   :  { %5759 = vrot.lane.b32.xlu1 %v6253_v6, %s6099_s14 }
 0x611   :  { %5764 = vrot.lane.b32.xlu0 %v6257_v9, %s6099_s14  ;;  %5769 = vrot.lane.b32.xlu1 %v5768_v30, %s6100_s15 }
 0x67b   :  { %v574_v33 = vpop.xlane.xlu1 %573 }
 0x67c   :  { %v571_v34 = vpop.xlane.xlu0 %570 }
 0x67d   :  { %5948 = vrcp.f32 %v571_v34 }
 0x67e   :  { %5950 = vrcp.f32 %v574_v33 }
 0x680   :  { %v577_v36 = vpop.xlane.xlu0 %576 }
 0x681   :  { %5952 = vrcp.f32 %v577_v36  ;;  %v580_v37 = vpop.xlane.xlu1 %579 }
 0x682   :  { %5954 = vrcp.f32 %v580_v37 }
 0x684   :  { %v583_v43 = vpop.xlane.xlu0 %582 }
 0x685   :  { %5956 = vrcp.f32 %v583_v43  ;;  %v586_v6 = vpop.xlane.xlu1 %585 }
 0x686   :  { %5958 = vrcp.f32 %v586_v6 }
 0x687   :  { %v5949_v46 = vpop.eup %5948 }
 0x688   :  { %v601_v9 = vmul.f32 %v5949_v46, %v571_v34  ;;  %v589_v47 = vpop.xlane.xlu0 %588  ;;  %v5951_v15 = vpop.eup %5950 }
 0x689   :  { %5960 = vrcp.f32 %v589_v47  ;;  %v592_v41 = vpop.xlane.xlu1 %591  ;;  %v602_v3 = vmul.f32 %v5951_v15, %v574_v33 }
 0x68a   :  { %v609_v42 = vsub.f32 2.0, %v601_v9  ;;  %5962 = vrcp.f32 %v592_v41 }
 0x68b   :  { %v5953_v49 = vpop.eup %5952  ;;  %v610_v61 = vsub.f32 2.0, %v602_v3 }
 0x68c   :  { %v617_v51 = vmul.f32 %v5949_v46, %v609_v42  ;;  %v5765_v0 = vpop.permute.xlu0 %5764  ;;  %v5955_v48 = vpop.eup %5954  ;;  %v603_v52 = vmul.f32 %v5953_v49, %v577_v36 }
 0x68d   :  { %v5767_v53 = vunpack.i.h.bf16 %v5765_v0  ;;  %v5760_v55 = vpop.permute.xlu1 %5759  ;;  %v5766_v57 = vunpack.i.l.bf16 %v5765_v0  ;;  %v604_v62 = vmul.f32 %v5955_v48, %v580_v37  ;;  %v618_v17 = vmul.f32 %v5951_v15, %v610_v61 }
 0x68e   :  { %v5762_v58 = vunpack.i.h.bf16 %v5760_v55  ;;  %v5761_v59 = vunpack.i.l.bf16 %v5760_v55  ;;  %v625_v60 = vmul.f32 %v6507_v39, %v617_v51  ;;  %v611_v4 = vsub.f32 2.0, %v603_v52 }
 0x68f   :  { %v5957_v16 = vpop.eup %5956  ;;  %v5361_v8 = vpack.c.bf16 %v5767_v53, %v5766_v57  ;;  %v612_v19 = vsub.f32 2.0, %v604_v62  ;;  %v626_v30 = vmul.f32 %v6505_v38, %v618_v17 }
 0x690   :  { %4838 = vmatprep.mubr.msk.f32.mxu0 %vm7662_vm10, %v625_v60  ;;  %v5357_v50 = vpack.c.bf16 %v5762_v58, %v5761_v59  ;;  %v5959_v2 = vpop.eup %5958  ;;  %v605_v5 = vmul.f32 %v5957_v16, %v583_v43  ;;  %v619_v28 = vmul.f32 %v5953_v49, %v611_v4  ;;  %vm7675_vm10 = vmmov %vm7672_vm2 }
 0x691   :  { %v606_v22 = vmul.f32 %v5959_v2, %v586_v6  ;;  %v620_v33 = vmul.f32 %v5955_v48, %v612_v19 }
 0x692   :  { %5358 = vmatprep.subr.bf16.mxu0 %v5357_v50  ;;  %v613_v39 = vsub.f32 2.0, %v605_v5  ;;  %v627_v46 = vmul.f32 %v6513_v7, %v619_v28 }
 0x693   :  { %v5961_v14 = vpop.eup %5960  ;;  %5360 = vmatpush3.bf16.msra.mxu0 %v5357_v50  ;;  %v614_v34 = vsub.f32 2.0, %v606_v22  ;;  %v628_v15 = vmul.f32 %v6515_v12, %v620_v33  ;;  %v5773_v12 = vpack.i.bf16 %v6230_v45, %v6225_v44 }
 0x694   :  { %5362 = vmatprep.subr.bf16.mxu0 %v5361_v8  ;;  %v5963_v23 = vpop.eup %5962  ;;  %v607_v29 = vmul.f32 %v5961_v14, %v589_v47  ;;  %v621_v37 = vmul.f32 %v5957_v16, %v613_v39 }
 0x695   :  { %v608_v36 = vmul.f32 %v5963_v23, %v592_v41  ;;  %v622_v6 = vmul.f32 %v5959_v2, %v614_v34  ;;  %5774 = vrot.lane.b32.xlu0 %v5773_v12, %s6100_s15 }
 0x696   :  { %v615_v43 = vsub.f32 2.0, %v607_v29  ;;  %v629_v47 = vmul.f32 %v6521_v20, %v621_v37  ;;  %v5770_v20 = vpop.permute.xlu1 %5769 }
 0x697   :  { %5364 = vmatpush3.bf16.msra.mxu0 %v5361_v8  ;;  %v616_v9 = vsub.f32 2.0, %v608_v36  ;;  %v630_v41 = vmul.f32 %v6523_v21, %v622_v6  ;;  %v5772_v3 = vunpack.i.h.bf16 %v5770_v20  ;;  %v5771_v51 = vunpack.i.l.bf16 %v5770_v20  ;;  %v974_v20 = vld [vmem:[%s7596_s2 + $0x4] sm:$0x11] }
 0x698   :  { %v623_v42 = vmul.f32 %v5961_v14, %v615_v43 }
 0x699   :  { %v624_v38 = vmul.f32 %v5963_v23, %v616_v9  ;;  %v5365_v0 = vpack.c.bf16 %v5772_v3, %v5771_v51  ;;  %v6619_v3 = vsub.s32 0, %v6291_v32  ;;  %v6622_v51 = vsub.s32 4, %v6291_v32  ;;  %v1088_v32 = vld [vmem:[%s7598_s4 + $0x18] sm:$0xff] }
 0x69a   :  { %4839 = vmatmul.mubr.msk.f32.vlgmr.msra.gmra.mrb[2].mxu0 %vm7663_vm9, %v626_v30  ;;  %v631_v7 = vmul.f32 %v6529_v24, %v623_v42  ;;  %vm7676_vm9 = vmmov %vm7672_vm2 }
 0x69b   :  { %4841 = vmatprep.mubr.msk.f32.mxu0 %vm7664_vm14, %v627_v46  ;;  %v632_v49 = vmul.f32 %v6531_v25, %v624_v38  ;;  %5366 = vmatprep.subr.bf16.mxu0 %v5365_v0  ;;  %v971_v38 = vld [vmem:[%s7597_s3 + $0x18] sm:$0xff]  ;;  %vm7677_vm14 = vmmov %vm7672_vm2 }
 0x69c   :  { %5368 = vmatpush3.bf16.msra.mxu0 %v5365_v0  ;;  %v1085_v0 = vld [vmem:[%s7598_s4] sm:$0xff] }
 0x69e   :  { %4842 = vmatmul.mubr.msk.f32.gmra.mrb[4].mxu0 %vm7665_vm11, %v628_v15  ;;  %vm7678_vm11 = vmmov %vm7672_vm2 }
 0x69f   :  { %4844 = vmatprep.mubr.msk.f32.mxu0 %vm7666_vm6, %v629_v47  ;;  %v970_v47 = vld [vmem:[%s7597_s3 + $0x8] sm:$0xff]  ;;  %vm7679_vm6 = vmmov %vm7653_vm0 }
 0x6a2   :  { %4845 = vmatmul.mubr.msk.f32.gmra.mrb[6].mxu0 %vm7667_vm8, %v630_v41  ;;  %v5373_v41 = vpack.c.bf16 %v971_v38, %v970_v47  ;;  %v1099_v47 = vld [vmem:[%s7598_s4 + $0x70] sm:$0xff]  ;;  %v1100_v38 = vld [vmem:[%s7598_s4 + $0x78] sm:$0xff]  ;;  %vm7680_vm8 = vmmov %vm7672_vm2 }
 0x6a3   :  { %4847 = vmatprep.mubr.msk.f32.mxu0 %vm7668_vm12, %v631_v7  ;;  %v972_v7 = vld [vmem:[%s7597_s3 + $0x28] sm:$0xff]  ;;  %vm7681_vm12 = vmmov %vm7672_vm2 }
 0x6a6   :  { %4848 = vmatmul.mubr.msk.f32.gmra.mrb[8].mxu0 %vm7653_vm0, %v632_v49  ;;  %v973_v49 = vld [vmem:[%s7597_s3 + $0x38] sm:$0xff]  ;;  %vm7682_vm0 = vmmov %vm7672_vm2 }
 0x6a7   :  { %v5377_v12 = vpack.c.bf16 %v973_v49, %v972_v7 }
 0x707   :  { %v5775_v21 = vpop.permute.xlu0 %5774 }
 0x708   :  { %v5777_v24 = vunpack.i.h.bf16 %v5775_v21  ;;  %v5776_v48 = vunpack.i.l.bf16 %v5775_v21  ;;  %v1086_v21 = vld [vmem:[%s7598_s4 + $0x8] sm:$0xff] }
 0x70a   :  { %v5369_v52 = vpack.c.bf16 %v5777_v24, %v5776_v48  ;;  %v1087_v24 = vld [vmem:[%s7598_s4 + $0x10] sm:$0xff]  ;;  %v983_v48 = vrot.slane %v974_v20, %v6622_v51 }
 0x70c   :  { %5370 = vmatprep.subr.bf16.mxu0 %v5369_v52 }
 0x70d   :  { %5372 = vmatpush3.bf16.msra.mxu0 %v5369_v52  ;;  %v979_v52 = vrot.slane %v974_v20, %v6619_v3 }
 0x70e   :  { %5374 = vmatprep.subr.bf16.mxu0 %v5373_v41 }
 0x76d   :  { %v4840_v25 = vpop.f32.mrb[2].mxu0 }
 0x76e   :  { %v747_v53 = vpop.f32.mrb[3].mxu0 }
 0x771   :  { %v4843_v55 = vpop.f32.mrb[4].mxu0 }
 0x772   :  { %790 = vrot.lane.b32.xlu0 %v4843_v55, %s6101_s16  ;;  %v757_v44 = vpop.f32.mrb[5].mxu0  ;;  %v1089_v55 = vld [vmem:[%s7598_s4 + $0x20] sm:$0xff] }
 0x773   :  { %788 = vrot.lane.b32.xlu1 %v757_v44, %s6101_s16  ;;  %v1090_v44 = vld [vmem:[%s7598_s4 + $0x28] sm:$0xff] }
 0x775   :  { %v4846_v45 = vpop.f32.mrb[6].mxu0 }
 0x776   :  { %798 = vrot.lane.b32.xlu0 %v4846_v45, %s6102_s17  ;;  %v767_v57 = vpop.f32.mrb[7].mxu0  ;;  %v993_v45 = vrot.slane %v983_v48, %v6619_v3 }
 0x777   :  { %796 = vrot.lane.b32.xlu1 %v767_v57, %s6102_s17  ;;  %v989_v57 = vrot.slane %v979_v52, %v6619_v3 }
 0x779   :  { %v4849_v58 = vpop.f32.mrb[8].mxu0 }
 0x77a   :  { %806 = vrot.lane.b32.xlu0 %v4849_v58, %s6103_s18  ;;  %v777_v59 = vpop.f32.mrb[9].mxu0  ;;  %v5389_v58 = vpack.c.bf16 %v1090_v44, %v1089_v55 }
 0x77b   :  { %804 = vrot.lane.b32.xlu1 %v777_v59, %s6103_s18  ;;  %v1091_v59 = vld [vmem:[%s7598_s4 + $0x30] sm:$0xff] }
 0x77f   :  { %927 = vrot.lane.b32.xlu1 %v6206_v40, %s6099_s14 }
 0x7e4   :  { %v791_v60 = vpop.permute.xlu0 %790 }
 0x7e5   :  { %v789_v16 = vpop.permute.xlu1 %788  ;;  %v811_v4 = vsel %vm7670_vm7, %v4840_v25, %v791_v60  ;;  %v5381_v25 = vpack.c.bf16 %v1086_v21, %v1085_v0  ;;  %v1092_v60 = vld [vmem:[%s7598_s4 + $0x38] sm:$0xff]  ;;  %vm7684_vm7 = vmmov %vm7682_vm0 }
 0x7e6   :  { %v810_v50 = vsel %vm7669_vm3, %v747_v53, %v789_v16  ;;  %v5385_v53 = vpack.c.bf16 %v1088_v32, %v1087_v24  ;;  %v4283_v16 = vld [vmem:[%s7596_s2 + $0x4] ss:$0 sm:$0xff]  ;;  %vm7683_vm3 = vmmov %vm7682_vm0 }
 0x7e7   :  { %5382 = vmatprep.subr.bf16.mxu1 %v5381_v25 }
 0x7e8   :  { %v799_v61 = vpop.permute.xlu0 %798  ;;  %5384 = vmatpush3.bf16.msra.mxu1 %v5381_v25 }
 0x7e9   :  { %v797_v62 = vpop.permute.xlu1 %796  ;;  %v814_v14 = vsel %vm812_vm13, %v811_v4, %v799_v61  ;;  %5386 = vmatprep.subr.bf16.mxu1 %v5385_v53  ;;  %v5393_v61 = vpack.c.bf16 %v1092_v60, %v1091_v59  ;;  %v1095_v4 = vld [vmem:[%s7598_s4 + $0x50] sm:$0xff] }
 0x7ea   :  { %v813_v5 = vsel %vm812_vm13, %v810_v50, %v797_v62  ;;  %v1093_v62 = vld [vmem:[%s7598_s4 + $0x40] sm:$0xff]  ;;  %v1094_v50 = vld [vmem:[%s7598_s4 + $0x48] sm:$0xff] }
 0x7ec   :  { %v807_v2 = vpop.permute.xlu0 %806  ;;  %5388 = vmatpush3.bf16.msra.mxu1 %v5385_v53 }
 0x7ed   :  { %v805_v8 = vpop.permute.xlu1 %804  ;;  %v817_v19 = vsel %vm815_vm1, %v814_v14, %v807_v2  ;;  %5390 = vmatprep.subr.bf16.mxu1 %v5389_v58  ;;  %v5397_v2 = vpack.c.bf16 %v1094_v50, %v1093_v62  ;;  %v1097_v14 = vld [vmem:[%s7598_s4 + $0x60] sm:$0xff] }
 0x7ee   :  { %v816_v17 = vsel %vm815_vm1, %v813_v5, %v805_v8  ;;  %v1096_v5 = vld [vmem:[%s7598_s4 + $0x58] sm:$0xff] }
 0x7ef   :  { %4858 = vmatprep.mubr.msk.f32.mxu0 %vm7671_vm15, %v816_v17  ;;  %v5401_v8 = vpack.c.bf16 %v1096_v5, %v1095_v4  ;;  %v1098_v17 = vld [vmem:[%s7598_s4 + $0x68] sm:$0xff]  ;;  %v6711_v5 = vld [vmem:[%s7597_s3 + $0x40] sm:$0xff]  ;;  %vm7685_vm15 = vmmov %vm7682_vm0 }
 0x7f0   :  { %4859 = vmatmul.mubr.msk.f32.vlgmr.msra.gmra.mrb[10].mxu0 %vm7672_vm2, %v817_v19  ;;  %5392 = vmatpush3.bf16.msra.mxu1 %v5389_v58  ;;  %v5405_v19 = vpack.c.bf16 %v1098_v17, %v1097_v14  ;;  %v6700_v58 = vld [vmem:[%s7596_s2 + $0x1] ss:$0 sm:$0xff]  ;;  %vm7686_vm2 = vcmask 64512  }
 0x7f1   :  { %v928_v23 = vpop.permute.xlu1 %927  ;;  %5376 = vmatpush3.bf16.msra.mxu0 %v5373_v41  ;;  %5394 = vmatprep.subr.bf16.mxu1 %v5393_v61  ;;  %v6723_v17 = vld [vmem:[%s7597_s3 + $0x60] sm:$0xff] }
 0x7f2   :  { %5378 = vmatprep.subr.bf16.mxu0 %v5377_v12 }
 0x7f4   :  { %5396 = vmatpush3.bf16.msra.mxu1 %v5393_v61 }
 0x7f5   :  { %5380 = vmatpush3.bf16.msra.mxu0 %v5377_v12  ;;  %5398 = vmatprep.subr.bf16.mxu1 %v5397_v2 }
 0x7f8   :  { %5400 = vmatpush3.bf16.msra.mxu1 %v5397_v2 }
 0x7f9   :  { %5402 = vmatprep.subr.bf16.mxu1 %v5401_v8 }
 0x7fc   :  { %5404 = vmatpush3.bf16.msra.mxu1 %v5401_v8  ;;  %v6716_v8 = vld [vmem:[%s7597_s3 + $0x50] sm:$0xff] }
 0x7fd   :  { %5406 = vmatprep.subr.bf16.mxu1 %v5405_v19  ;;  %v5413_v14 = vpack.c.bf16 %v6716_v8, %v6711_v5 }
 0x7ff   :  { %5414 = vmatprep.subr.bf16.mxu0 %v5413_v14 }
 0x800   :  { %5408 = vmatpush3.bf16.msra.mxu1 %v5405_v19  ;;  %v6728_v19 = vld [vmem:[%s7597_s3 + $0x70] sm:$0xff] }
 0x8c3   :  { %v4860_v22 = vpop.f32.mrb[10].mxu0 }
 0x8c4   :  { %v920_v28 = vadd.f32 %v4860_v22, %v6193_v27  ;;  %v910_v39 = vpop.f32.mrb[11].mxu0 }
 0x8c5   :  { %v919_v29 = vadd.f32 %v910_v39, %v6191_v26 }
 0x8c6   :  { %v6581_v30 = vadd.f32 %v928_v23, %v920_v28 }
 0x8c7   :  { %v6583_v33 = vadd.f32 %v928_v23, %v919_v29 }
 0x8c8   :  { %v936_v34 = vsel %vm7673_vm4, %v6581_v30, 0.0  ;;  %vm7687_vm4 = vnez %v7608_v13 }
 0x8c9   :  { %937 = vadd.xlane.f32.xlu1 %v936_v34  ;;  %v933_v36 = vsel %vm7674_vm5, %v6583_v33, 0.0  ;;  %vm7688_vm5 = vmmov %vm7686_vm2 }
 0x8ca   :  { %934 = vadd.xlane.f32.xlu0 %v933_v36 }
 0x8da   :  { %959 = vrot.lane.b32.xlu1 %v6206_v40, %s6100_s15 }
 0x8de   :  { %998 = vrot.lane.b32.xlu1 %v993_v45, %s6099_s14 }
 0x8e2   :  { %1179 = vrot.lane.b32.xlu1 %v4283_v16, %s6094_s25 }
 0x956   :  { %v938_v37 = vpop.xlane.xlu1 %937 }
 0x957   :  { %v940_v27 = vmul.f32 0.03125, %v938_v37  ;;  %v935_v43 = vpop.xlane.xlu0 %934 }
 0x958   :  { %v939_v46 = vmul.f32 0.03125, %v935_v43 }
 0x959   :  { %v6592_v26 = vsub.f32 %v6581_v30, %v940_v27 }
 0x95a   :  { %v6595_v6 = vsub.f32 %v6583_v33, %v939_v46  ;;  %v960_v37 = vpop.permute.xlu1 %959 }
 0x95b   :  { %v944_v42 = vmul.f32 %v6592_v26, %v6592_v26 }
 0x95c   :  { %v943_v9 = vmul.f32 %v6595_v6, %v6595_v6 }
 0x95d   :  { %v948_v40 = vsel %vm7676_vm9, %v944_v42, 0.0  ;;  %vm7690_vm9 = vmmov %vm7686_vm2 }
 0x95e   :  { %v945_v15 = vsel %vm7675_vm10, %v943_v9, 0.0  ;;  %v999_v41 = vpop.permute.xlu1 %998  ;;  %vm7689_vm10 = vmmov %vm7686_vm2 }
 0x95f   :  { %946 = vadd.xlane.f32.xlu0 %v945_v15 }
 0x962   :  { %v1180_v52 = vpop.permute.xlu1 %1179 }
 0x963   :  { %949 = vadd.xlane.f32.xlu0 %v948_v40 }
 0x979   :  { %996 = vrot.lane.b32.xlu0 %v989_v57, %s6099_s14 }
 0x9ec   :  { %v947_v22 = vpop.xlane.xlu0 %946 }
 0x9ed   :  { %v951_v23 = vmul.f32 0.03125, %v947_v22  ;;  %v5417_v22 = vpack.c.bf16 %v6728_v19, %v6723_v17 }
 0x9ef   :  { %v953_v28 = vadd.f32 1e-05, %v951_v23 }
 0x9f0   :  { %v950_v39 = vpop.xlane.xlu0 %949 }
 0x9f1   :  { %5964 = vrsqrt.f32 %v953_v28  ;;  %v952_v29 = vmul.f32 0.03125, %v950_v39 }
 0x9f3   :  { %v954_v34 = vadd.f32 1e-05, %v952_v29 }
 0x9f5   :  { %5966 = vrsqrt.f32 %v954_v34 }
 0x9fb   :  { %v5965_v36 = vpop.eup %5964 }
 0x9fc   :  { %v957_v27 = vmul.f32 %v5965_v36, %v6595_v6  ;;  %v5409_v6 = vpack.c.bf16 %v1100_v38, %v1099_v47 }
 0x9fe   :  { %v962_v43 = vmul.f32 %v960_v37, %v957_v27  ;;  %5410 = vmatprep.subr.bf16.mxu1 %v5409_v6 }
 0x9ff   :  { %v5967_v46 = vpop.eup %5966  ;;  %5412 = vmatpush3.bf16.msra.mxu1 %v5409_v6 }
 0xa00   :  { %v958_v9 = vmul.f32 %v5967_v46, %v6592_v26  ;;  %v968_v15 = vadd.f32 %v4283_v16, %v962_v43  ;;  %v997_v26 = vpop.permute.xlu0 %996 }
 0xa01   :  { %v1000_v7 = vsel %vm7679_vm6, %v997_v26, %v999_v41  ;;  %vm7693_vm6 = vmmov %vm7686_vm2 }
 0xa02   :  { %v963_v42 = vmul.f32 %v960_v37, %v958_v9  ;;  %4869 = vmatprep.mubr.msk.f32.mxu0 %vm7677_vm14, %v968_v15  ;;  %vm7691_vm14 = vmmov %vm7686_vm2 }
 0xa04   :  { %v969_v40 = vadd.f32 %v4283_v16, %v963_v42 }
 0xa06   :  { %4870 = vmatmul.mubr.msk.f32.vlgmr.msra.gmra.mrb[12].mxu0 %vm7678_vm11, %v969_v40  ;;  %vm7692_vm11 = vmmov %vm7686_vm2 }
 0xa07   :  { %5416 = vmatpush3.bf16.msra.mxu0 %v5413_v14 }
 0xa08   :  { %5418 = vmatprep.subr.bf16.mxu0 %v5417_v22 }
 0xa0b   :  { %5420 = vmatpush3.bf16.msra.mxu0 %v5417_v22 }
 0xad9   :  { %v4871_v49 = vpop.f32.mrb[12].mxu0 }
 0xada   :  { %v1080_v12 = vadd.f32 %v4871_v49, %v1000_v7  ;;  %v1074_v20 = vpop.f32.mrb[13].mxu0 }
 0xadb   :  { %v1075_v0 = vadd.f32 %v1074_v20, %v1000_v7 }
 0xadc   :  { %v1084_v24 = vmax.f32 %v1080_v12, 0.0 }
 0xadd   :  { %v1083_v21 = vmax.f32 %v1075_v0, 0.0 }
 0xadf   :  { %4904 = vmatprep.mubr.f32.mxu1 %v1083_v21 }
 0xae0   :  { %4905 = vmatmul.mubr.f32.vlgmr.msra.gmra.mrb[10].mxu1 %v1084_v24 }
 0xbb3   :  { %v4906_v48 = vpop.f32.mrb[10].mxu1 }
 0xbb4   :  { %v1177_v25 = vadd.f32 %v4906_v48, %v6581_v30  ;;  %v1167_v32 = vpop.f32.mrb[11].mxu1 }
 0xbb5   :  { %v1176_v53 = vadd.f32 %v1167_v32, %v6583_v33 }
 0xbb6   :  { %v6689_v55 = vadd.f32 %v1180_v52, %v1177_v25 }
 0xbb7   :  { %v6691_v44 = vadd.f32 %v1180_v52, %v1176_v53 }
 0xbb8   :  { %v1188_v45 = vsel %vm7680_vm8, %v6689_v55, 0.0  ;;  %vm7694_vm8 = vmmov %vm7686_vm2 }
 0xbb9   :  { %1189 = vadd.xlane.f32.xlu1 %v1188_v45  ;;  %v1185_v57 = vsel %vm7681_vm12, %v6691_v44, 0.0  ;;  %vm7695_vm12 = vcmask 523264  }
 0xbba   :  { %1186 = vadd.xlane.f32.xlu0 %v1185_v57 }
 0xbca   :  { %1218 = vrot.lane.b32.xlu1 %v6700_v58, %s6094_s25 }
 0xc46   :  { %v1190_v30 = vpop.xlane.xlu1 %1189 }
 0xc47   :  { %v1192_v33 = vmul.f32 0.03125, %v1190_v30  ;;  %v1187_v59 = vpop.xlane.xlu0 %1186 }
 0xc48   :  { %v1191_v60 = vmul.f32 0.03125, %v1187_v59 }
 0xc49   :  { %v1194_v16 = vsub.f32 %v6689_v55, %v1192_v33 }
 0xc4a   :  { %v1193_v61 = vsub.f32 %v6691_v44, %v1191_v60  ;;  %v1219_v43 = vpop.permute.xlu1 %1218 }
 0xc4b   :  { %v1196_v2 = vmul.f32 %v1194_v16, %v1194_v16 }
 0xc4c   :  { %v1195_v62 = vmul.f32 %v1193_v61, %v1193_v61 }
 0xc4d   :  { %v1200_v4 = vsel %vm7683_vm3, %v1196_v2, 0.0 }
 0xc4e   :  { %v1197_v50 = vsel %vm7682_vm0, %v1195_v62, 0.0  ;;  %vm7696_vm0 = vmmov %vm7695_vm12 }
 0xc4f   :  { %1198 = vadd.xlane.f32.xlu0 %v1197_v50  ;;  %vm7697_vm3 = vmmov %vm7696_vm0 }
 0xc53   :  { %1201 = vadd.xlane.f32.xlu0 %v1200_v4 }
 0xcdc   :  { %v1199_v23 = vpop.xlane.xlu0 %1198 }
 0xcdd   :  { %v1203_v28 = vmul.f32 0.03125, %v1199_v23 }
 0xcdf   :  { %v1205_v39 = vadd.f32 1e-05, %v1203_v28 }
 0xce0   :  { %v1202_v29 = vpop.xlane.xlu0 %1201 }
 0xce1   :  { %5968 = vrsqrt.f32 %v1205_v39  ;;  %v1204_v34 = vmul.f32 0.03125, %v1202_v29 }
 0xce3   :  { %v1206_v36 = vadd.f32 1e-05, %v1204_v34 }
 0xce5   :  { %5970 = vrsqrt.f32 %v1206_v36 }
 0xceb   :  { %v5969_v37 = vpop.eup %5968 }
 0xcec   :  { %v1209_v27 = vmul.f32 %v5969_v37, %v1193_v61 }
 0xcee   :  { %v1215_v46 = vmul.f32 %v6700_v58, %v1209_v27 }
 0xcef   :  { %v5971_v9 = vpop.eup %5970 }
 0xcf0   :  { %v1210_v15 = vmul.f32 %v5971_v9, %v1194_v16  ;;  %v1221_v42 = vadd.f32 %v1219_v43, %v1215_v46 }
 0xcf2   :  { %v1216_v40 = vmul.f32 %v6700_v58, %v1210_v15  ;;  %4915 = vmatprep.mubr.msk.f32.mxu0 %vm7684_vm7, %v1221_v42  ;;  %vm7698_vm7 = vmmov %vm7696_vm0 }
 0xcf4   :  { %v1222_v47 = vadd.f32 %v1219_v43, %v1216_v40 }
 0xcf6   :  { %4916 = vmatmul.mubr.msk.f32.vlgmr.msra.gmra.mrb[14].mxu0 %vm7685_vm15, %v1222_v47  ;;  %vm7699_vm15 = vmmov %vm7696_vm0 }
 0xdc9   :  { %v4917_v38 = vpop.f32.mrb[14].mxu0 }
 0xdca   :  { %1313 = vrot.lane.b32.xlu1 %v4917_v38, %s6096_s12  ;;  %v1300_v6 = vpop.f32.mrb[15].mxu0 }
 0xdcb   :  { %1311 = vrot.lane.b32.xlu0 %v1300_v6, %s6096_s12  ;;  %4934 = vmatprep.mubr.msk.f32.mxu0 %vm7686_vm2, %v1300_v6  ;;  %v6739_v41 = vpack.i.bf16 %v4917_v38, %v1300_v6  ;;  %vm7700_vm2 = vmmov %vm7696_vm0 }
 0xdce   :  { %1315 = vrot.lane.b32.xlu1 %v1300_v6, %s6095_s11 }
 0xdcf   :  { %1317 = vrot.lane.b32.xlu0 %v4917_v38, %s6095_s11 }
 0xdd2   :  { %1319 = vrot.lane.b32.xlu1 %v1300_v6, %s6097_s13 }
 0xdd3   :  { %1321 = vrot.lane.b32.xlu0 %v4917_v38, %s6097_s13 }
 0xdd6   :  { %5779 = vrot.lane.b32.xlu1 %v6739_v41, %s6094_s25 }
 0xe3c   :  { %v1314_v26 = vpop.permute.xlu1 %1313 }
 0xe3d   :  { %v1312_v7 = vpop.permute.xlu0 %1311 }
 0xe3e   :  { %v6747_v49 = vpack.i.bf16 %v1314_v26, %v1312_v7 }
 0xe40   :  { %v1316_v12 = vpop.permute.xlu1 %1315  ;;  %5784 = vrot.lane.b32.xlu0 %v6747_v49, %s6094_s25 }
 0xe41   :  { %v1318_v20 = vpop.permute.xlu0 %1317 }
 0xe42   :  { %v6751_v0 = vpack.i.bf16 %v1318_v20, %v1316_v12 }
 0xe44   :  { %v1320_v21 = vpop.permute.xlu1 %1319  ;;  %5789 = vrot.lane.b32.xlu1 %v6751_v0, %s6094_s25 }
 0xe45   :  { %v1322_v24 = vpop.permute.xlu0 %1321 }
 0xe46   :  { %v6755_v48 = vpack.i.bf16 %v1322_v24, %v1320_v21 }
 0xe48   :  { %v5780_v52 = vpop.permute.xlu1 %5779  ;;  %5794 = vrot.lane.b32.xlu0 %v6755_v48, %s6094_s25 }
 0xe49   :  { %v5782_v25 = vunpack.i.h.bf16 %v5780_v52  ;;  %v5781_v32 = vunpack.i.l.bf16 %v5780_v52 }
 0xe4b   :  { %v5421_v53 = vpack.c.bf16 %v5782_v25, %v5781_v32 }
 0xe4d   :  { %5423 = vmatprep.subr.msk.bf16.mxu0 %vm7687_vm4, %v5421_v53 }
 0xe4e   :  { %5426 = vmatpush3.bf16.xpose.msk.msra.mxu0 %vm7687_vm4, %v5421_v53 }
 0xeb2   :  { %v5785_v45 = vpop.permute.xlu0 %5784 }
 0xeb3   :  { %v5787_v57 = vunpack.i.h.bf16 %v5785_v45  ;;  %v5786_v30 = vunpack.i.l.bf16 %v5785_v45 }
 0xeb5   :  { %v5427_v33 = vpack.c.bf16 %v5787_v57, %v5786_v30 }
 0xeb6   :  { %v5790_v59 = vpop.permute.xlu1 %5789 }
 0xeb7   :  { %v5792_v60 = vunpack.i.h.bf16 %v5790_v59  ;;  %v5791_v16 = vunpack.i.l.bf16 %v5790_v59  ;;  %5429 = vmatprep.subr.msk.bf16.mxu0 %vm7687_vm4, %v5427_v33 }
 0xeb8   :  { %5432 = vmatpush3.bf16.xpose.msk.msra.mxu0 %vm7687_vm4, %v5427_v33 }
 0xeb9   :  { %v5433_v61 = vpack.c.bf16 %v5792_v60, %v5791_v16 }
 0xeba   :  { %v5795_v62 = vpop.permute.xlu0 %5794 }
 0xebb   :  { %v5797_v50 = vunpack.i.h.bf16 %v5795_v62  ;;  %v5796_v2 = vunpack.i.l.bf16 %v5795_v62  ;;  %5435 = vmatprep.subr.msk.bf16.mxu0 %vm7687_vm4, %v5433_v61 }
 0xebd   :  { %v5439_v4 = vpack.c.bf16 %v5797_v50, %v5796_v2 }
 0xec0   :  { %5438 = vmatpush3.bf16.xpose.msk.msra.mxu0 %vm7687_vm4, %v5433_v61 }
 0xec1   :  { %5441 = vmatprep.subr.msk.bf16.mxu0 %vm7687_vm4, %v5439_v4 }
 0xec8   :  { %5444 = vmatpush3.bf16.xpose.msk.msra.mxu0 %vm7687_vm4, %v5439_v4 }
 0xecf   :  { %4935 = vmatmul.mubr.msk.f32.vlgmr.msra.gmra.mrb[16].mxu0 %vm7688_vm5, %v4917_v38  ;;  %vm7701_vm5 = vmmov %vm7696_vm0 }
 0xed0   :  { %4937 = vmatprep.mubr.msk.f32.mxu0 %vm7689_vm10, %v1312_v7  ;;  %vm7702_vm10 = vmmov %vm7696_vm0 }
 0xed3   :  { %4938 = vmatmul.mubr.msk.f32.gmra.mrb[18].mxu0 %vm7690_vm9, %v1314_v26  ;;  %vm7703_vm9 = vmmov %vm7696_vm0 }
 0xed4   :  { %4940 = vmatprep.mubr.msk.f32.mxu0 %vm7691_vm14, %v1316_v12  ;;  %vm7704_vm14 = vmmov %vm7696_vm0 }
 0xed7   :  { %4941 = vmatmul.mubr.msk.f32.gmra.mrb[20].mxu0 %vm7692_vm11, %v1318_v20  ;;  %vm7705_vm11 = vmmov %vm7696_vm0 }
 0xed8   :  { %4943 = vmatprep.mubr.msk.f32.mxu0 %vm7693_vm6, %v1320_v21  ;;  %vm7706_vm6 = vmmov %vm7696_vm0 }
 0xedb   :  { %4944 = vmatmul.mubr.msk.f32.gmra.mrb[22].mxu0 %vm7694_vm8, %v1322_v24  ;;  %vm7707_vm8 = vmmov %vm7696_vm0 }
 0xfa2   :  { %v4936_v14 = vpop.f32.mrb[16].mxu0 }
 0xfa3   :  { %v1443_v22 = vadd.f32 %v4936_v14, %v6384_v31  ;;  %v1437_v23 = vpop.f32.mrb[17].mxu0 }
 0xfa4   :  { %v1438_v28 = vadd.f32 %v1437_v23, %v6391_v35 }
 0xfa5   :  { %v1479_v39 = vsel %vm7695_vm12, %v1443_v22, -inf  ;;  %vm7708_vm12 = vmmov %vm7696_vm0 }
 0xfa6   :  { %1480 = vmax.xlane.f32.xlu0 %v1479_v39  ;;  %v4939_v29 = vpop.f32.mrb[18].mxu0  ;;  %v1476_v34 = vsel %vm7696_vm0, %v1438_v28, -inf }
 0xfa7   :  { %v1453_v36 = vadd.f32 %v4939_v29, %v6427_v54  ;;  %v1447_v37 = vpop.f32.mrb[19].mxu0  ;;  %1477 = vmax.xlane.f32.xlu1 %v1476_v34 }
 0xfa8   :  { %v1448_v27 = vadd.f32 %v1447_v37, %v6441_v56 }
 0xfa9   :  { %v1485_v43 = vsel %vm7697_vm3, %v1453_v36, -inf  ;;  %vm7709_vm3 = vmmov %vm7696_vm0 }
 0xfaa   :  { %v4942_v46 = vpop.f32.mrb[20].mxu0  ;;  %v1482_v9 = vsel %vm7698_vm7, %v1448_v27, -inf  ;;  %vm7710_vm7 = vmmov %vm7696_vm0 }
 0xfab   :  { %v1463_v15 = vadd.f32 %v4942_v46, %v6475_v63  ;;  %v1457_v42 = vpop.f32.mrb[21].mxu0  ;;  %1483 = vmax.xlane.f32.xlu0 %v1482_v9  ;;  %1486 = vmax.xlane.f32.xlu1 %v1485_v43 }
 0xfac   :  { %v1458_v40 = vadd.f32 %v1457_v42, %v6477_v1 }
 0xfad   :  { %v1491_v47 = vsel %vm7699_vm15, %v1463_v15, -inf  ;;  %vm7711_vm15 = vmmov %vm7696_vm0 }
 0xfae   :  { %v4945_v38 = vpop.f32.mrb[22].mxu0  ;;  %v1488_v6 = vsel %vm7700_vm2, %v1458_v40, -inf  ;;  %vm7712_vm2 = vmmov %vm7696_vm0 }
 0xfaf   :  { %v1473_v26 = vadd.f32 %v4945_v38, %v6491_v10  ;;  %v1467_v7 = vpop.f32.mrb[23].mxu0  ;;  %1489 = vmax.xlane.f32.xlu0 %v1488_v6  ;;  %1492 = vmax.xlane.f32.xlu1 %v1491_v47 }
 0xfb0   :  { %v1468_v12 = vadd.f32 %v1467_v7, %v6493_v11 }
 0xfb1   :  { %v1497_v20 = vsel %vm7701_vm5, %v1473_v26, -inf  ;;  %vm7713_vm5 = vmmov %vm7696_vm0 }
 0xfb2   :  { %v1494_v21 = vsel %vm7702_vm10, %v1468_v12, -inf  ;;  %vm7714_vm10 = vmmov %vm7696_vm0 }
 0xfb3   :  { %1495 = vmax.xlane.f32.xlu0 %v1494_v21  ;;  %1498 = vmax.xlane.f32.xlu1 %v1497_v20 }
 0xfc4   :  { %5804 = vrot.lane.b32.xlu1 %v6747_v49, %s6099_s14 }
 0xfc9   :  { %5799 = vrot.lane.b32.xlu0 %v6739_v41, %s6099_s14 }
0x1033   :  { %v1481_v24 = vpop.xlane.xlu0 %1480 }
0x1034   :  { %v1501_v52 = vsub.f32 %v1443_v22, %v1481_v24  ;;  %v1478_v25 = vpop.xlane.xlu1 %1477 }
0x1035   :  { %v1500_v32 = vsub.f32 %v1438_v28, %v1478_v25 }
0x1036   :  { %v1510_v53 = vmul.f32 1.442695, %v1501_v52 }
0x1037   :  { %v1508_v45 = vmul.f32 1.442695, %v1500_v32 }
0x1038   :  { %5972 = vpow2.f32 %v1510_v53  ;;  %v1484_v57 = vpop.xlane.xlu0 %1483  ;;  %v1487_v30 = vpop.xlane.xlu1 %1486 }
0x1039   :  { %5974 = vpow2.f32 %v1508_v45  ;;  %v1502_v33 = vsub.f32 %v1448_v27, %v1484_v57  ;;  %v1503_v59 = vsub.f32 %v1453_v36, %v1487_v30  ;;  %v5818_v45 = vpack.i.bf16 %v6716_v8, %v6711_v5 }
0x103b   :  { %v1512_v60 = vmul.f32 1.442695, %v1502_v33  ;;  %v1514_v16 = vmul.f32 1.442695, %v1503_v59 }
0x103c   :  { %v1490_v61 = vpop.xlane.xlu0 %1489  ;;  %v1493_v62 = vpop.xlane.xlu1 %1492 }
0x103d   :  { %5976 = vpow2.f32 %v1512_v60  ;;  %v1504_v49 = vsub.f32 %v1458_v40, %v1490_v61  ;;  %v1505_v50 = vsub.f32 %v1463_v15, %v1493_v62 }
0x103e   :  { %5978 = vpow2.f32 %v1514_v16 }
0x103f   :  { %v1516_v41 = vmul.f32 1.442695, %v1504_v49  ;;  %v1518_v2 = vmul.f32 1.442695, %v1505_v50 }
0x1040   :  { %v1496_v4 = vpop.xlane.xlu0 %1495  ;;  %v1499_v14 = vpop.xlane.xlu1 %1498 }
0x1041   :  { %5980 = vpow2.f32 %v1516_v41  ;;  %v1506_v22 = vsub.f32 %v1468_v12, %v1496_v4  ;;  %v1507_v23 = vsub.f32 %v1473_v26, %v1499_v14 }
0x1042   :  { %v6802_v28 = vpop.eup %5972  ;;  %5982 = vpow2.f32 %v1518_v2 }
0x1043   :  { %v6804_v39 = vpop.eup %5974  ;;  %v1520_v29 = vmul.f32 1.442695, %v1506_v22  ;;  %v1522_v34 = vmul.f32 1.442695, %v1507_v23  ;;  %v1527_v36 = vsel %vm7703_vm9, %v6802_v28, 0.0  ;;  %vm7715_vm9 = vmmov %vm7696_vm0 }
0x1044   :  { %v5800_v37 = vpop.permute.xlu0 %5799  ;;  %1528 = vadd.xlane.f32.xlu1 %v1527_v36  ;;  %v5805_v27 = vpop.permute.xlu1 %5804  ;;  %v1524_v43 = vsel %vm7704_vm14, %v6804_v39, 0.0  ;;  %vm7716_vm14 = vmmov %vm7696_vm0 }
0x1045   :  { %5984 = vpow2.f32 %v1520_v29  ;;  %v5802_v46 = vunpack.i.h.bf16 %v5800_v37  ;;  %v5801_v9 = vunpack.i.l.bf16 %v5800_v37  ;;  %v5807_v15 = vunpack.i.h.bf16 %v5805_v27  ;;  %1525 = vadd.xlane.f32.xlu0 %v1524_v43 }
0x1046   :  { %5986 = vpow2.f32 %v1522_v34  ;;  %v5806_v42 = vunpack.i.l.bf16 %v5805_v27 }
0x1047   :  { %v6810_v40 = vpop.eup %5976  ;;  %v5445_v47 = vpack.c.bf16 %v5802_v46, %v5801_v9 }
0x1048   :  { %v6812_v38 = vpop.eup %5978  ;;  %v1530_v6 = vsel %vm7705_vm11, %v6810_v40, 0.0  ;;  %v5449_v7 = vpack.c.bf16 %v5807_v15, %v5806_v42  ;;  %vm7717_vm11 = vmmov %vm7696_vm0 }
0x1049   :  { %5446 = vmatprep.subr.bf16.mxu1 %v5445_v47  ;;  %1531 = vadd.xlane.f32.xlu0 %v1530_v6  ;;  %v1533_v26 = vsel %vm7706_vm6, %v6812_v38, 0.0  ;;  %vm7718_vm6 = vcmask 64512  }
0x104a   :  { %1534 = vadd.xlane.f32.xlu1 %v1533_v26  ;;  %5448 = vmatpush3.bf16.msra.mxu1 %v5445_v47 }
0x104b   :  { %v6818_v12 = vpop.eup %5980  ;;  %5450 = vmatprep.subr.bf16.mxu1 %v5449_v7 }
0x104c   :  { %v6820_v20 = vpop.eup %5982  ;;  %v1536_v21 = vsel %vm7707_vm8, %v6818_v12, 0.0  ;;  %vm7719_vm8 = vmmov %vm7718_vm6 }
0x104d   :  { %1537 = vadd.xlane.f32.xlu0 %v1536_v21  ;;  %v1539_v24 = vsel %vm7708_vm12, %v6820_v20, 0.0  ;;  %vm7720_vm12 = vcmask 261120  }
0x104e   :  { %1540 = vadd.xlane.f32.xlu1 %v1539_v24  ;;  %5452 = vmatpush3.bf16.msra.mxu1 %v5449_v7 }
0x104f   :  { %v6826_v52 = vpop.eup %5984 }
0x1050   :  { %v6828_v25 = vpop.eup %5986  ;;  %v1542_v32 = vsel %vm7696_vm0, %v6826_v52, 0.0  ;;  %vm7721_vm0 = vmmov %vm7720_vm12 }
0x1051   :  { %1543 = vadd.xlane.f32.xlu0 %v1542_v32  ;;  %v1545_v53 = vsel %vm7709_vm3, %v6828_v25, 0.0  ;;  %vm7722_vm3 = vmmov %vm7721_vm0 }
0x1052   :  { %1546 = vadd.xlane.f32.xlu1 %v1545_v53 }
0x1063   :  { %5809 = vrot.lane.b32.xlu1 %v6751_v0, %s6099_s14 }
0x1067   :  { %5814 = vrot.lane.b32.xlu0 %v6755_v48, %s6099_s14  ;;  %5819 = vrot.lane.b32.xlu1 %v5818_v45, %s6100_s15 }
0x10d1   :  { %v1529_v57 = vpop.xlane.xlu1 %1528 }
0x10d2   :  { %v1526_v30 = vpop.xlane.xlu0 %1525 }
0x10d3   :  { %5988 = vrcp.f32 %v1526_v30 }
0x10d4   :  { %5990 = vrcp.f32 %v1529_v57 }
0x10d6   :  { %v1532_v33 = vpop.xlane.xlu0 %1531 }
0x10d7   :  { %5992 = vrcp.f32 %v1532_v33  ;;  %v1535_v59 = vpop.xlane.xlu1 %1534 }
0x10d8   :  { %5994 = vrcp.f32 %v1535_v59 }
0x10da   :  { %v1538_v60 = vpop.xlane.xlu0 %1537 }
0x10db   :  { %5996 = vrcp.f32 %v1538_v60  ;;  %v1541_v16 = vpop.xlane.xlu1 %1540 }
0x10dc   :  { %5998 = vrcp.f32 %v1541_v16 }
0x10dd   :  { %v5989_v0 = vpop.eup %5988 }
0x10de   :  { %v1556_v61 = vmul.f32 %v5989_v0, %v1526_v30  ;;  %v1544_v48 = vpop.xlane.xlu0 %1543  ;;  %v5991_v62 = vpop.eup %5990 }
0x10df   :  { %6000 = vrcp.f32 %v1544_v48  ;;  %v1547_v5 = vpop.xlane.xlu1 %1546  ;;  %v1557_v50 = vmul.f32 %v5991_v62, %v1529_v57 }
0x10e0   :  { %v1564_v8 = vsub.f32 2.0, %v1556_v61  ;;  %6002 = vrcp.f32 %v1547_v5 }
0x10e1   :  { %v5993_v49 = vpop.eup %5992  ;;  %v1565_v43 = vsub.f32 2.0, %v1557_v50 }
0x10e2   :  { %v1572_v41 = vmul.f32 %v5989_v0, %v1564_v8  ;;  %v5815_v2 = vpop.permute.xlu0 %5814  ;;  %v5995_v4 = vpop.eup %5994  ;;  %v1558_v14 = vmul.f32 %v5993_v49, %v1532_v33 }
0x10e3   :  { %v5817_v22 = vunpack.i.h.bf16 %v5815_v2  ;;  %v5810_v23 = vpop.permute.xlu1 %5809  ;;  %v5816_v29 = vunpack.i.l.bf16 %v5815_v2  ;;  %v1559_v46 = vmul.f32 %v5995_v4, %v1535_v59  ;;  %v1573_v7 = vmul.f32 %v5991_v62, %v1565_v43 }
0x10e4   :  { %v5812_v34 = vunpack.i.h.bf16 %v5810_v23  ;;  %v5811_v36 = vunpack.i.l.bf16 %v5810_v23  ;;  %v1580_v37 = vmul.f32 %v6804_v39, %v1572_v41  ;;  %v1566_v42 = vsub.f32 2.0, %v1558_v14 }
0x10e5   :  { %v5997_v27 = vpop.eup %5996  ;;  %v5457_v6 = vpack.c.bf16 %v5817_v22, %v5816_v29  ;;  %v1567_v21 = vsub.f32 2.0, %v1559_v46  ;;  %v1581_v57 = vmul.f32 %v6802_v28, %v1573_v7 }
0x10e6   :  { %4962 = vmatprep.mubr.msk.f32.mxu1 %vm7710_vm7, %v1580_v37  ;;  %v5453_v9 = vpack.c.bf16 %v5812_v34, %v5811_v36  ;;  %v5999_v15 = vpop.eup %5998  ;;  %v1560_v47 = vmul.f32 %v5997_v27, %v1538_v60  ;;  %v1574_v53 = vmul.f32 %v5993_v49, %v1566_v42  ;;  %vm7723_vm7 = vmmov %vm7721_vm0 }
0x10e7   :  { %v1561_v24 = vmul.f32 %v5999_v15, %v1541_v16  ;;  %v1575_v30 = vmul.f32 %v5995_v4, %v1567_v21 }
0x10e8   :  { %5454 = vmatprep.subr.bf16.mxu1 %v5453_v9  ;;  %v1568_v39 = vsub.f32 2.0, %v1560_v47  ;;  %v1582_v61 = vmul.f32 %v6810_v40, %v1574_v53 }
0x10e9   :  { %v6001_v26 = vpop.eup %6000  ;;  %5456 = vmatpush3.bf16.msra.mxu1 %v5453_v9  ;;  %v1569_v33 = vsub.f32 2.0, %v1561_v24  ;;  %v1583_v8 = vmul.f32 %v6812_v38, %v1575_v30  ;;  %v5823_v38 = vpack.i.bf16 %v6728_v19, %v6723_v17 }
0x10ea   :  { %5458 = vmatprep.subr.bf16.mxu1 %v5457_v6  ;;  %v6003_v32 = vpop.eup %6002  ;;  %v1562_v45 = vmul.f32 %v6001_v26, %v1544_v48  ;;  %v1576_v0 = vmul.f32 %v5997_v27, %v1568_v39 }
0x10eb   :  { %v1563_v59 = vmul.f32 %v6003_v32, %v1547_v5  ;;  %v1577_v16 = vmul.f32 %v5999_v15, %v1569_v33  ;;  %5824 = vrot.lane.b32.xlu0 %v5823_v38, %s6100_s15  ;;  %v4328_v38 = vld [vmem:[%s7597_s3 + $0x78] sm:$0xff] }
0x10ec   :  { %v1570_v60 = vsub.f32 2.0, %v1562_v45  ;;  %v1584_v48 = vmul.f32 %v6818_v12, %v1576_v0  ;;  %v5820_v12 = vpop.permute.xlu1 %5819 }
0x10ed   :  { %5460 = vmatpush3.bf16.msra.mxu1 %v5457_v6  ;;  %v1571_v62 = vsub.f32 2.0, %v1563_v59  ;;  %v1585_v5 = vmul.f32 %v6820_v20, %v1577_v16  ;;  %v5822_v41 = vunpack.i.h.bf16 %v5820_v12  ;;  %v5821_v2 = vunpack.i.l.bf16 %v5820_v12 }
0x10ee   :  { %v1578_v49 = vmul.f32 %v6001_v26, %v1570_v60 }
0x10ef   :  { %v1579_v28 = vmul.f32 %v6003_v32, %v1571_v62  ;;  %v5461_v4 = vpack.c.bf16 %v5822_v41, %v5821_v2  ;;  %v1927_v41 = vld [vmem:[%s7596_s2 + $0x5] sm:$0x11] }
0x10f0   :  { %4963 = vmatmul.mubr.msk.f32.vlgmr.msra.gmra.mrb[12].mxu1 %vm7711_vm15, %v1581_v57  ;;  %v1586_v40 = vmul.f32 %v6826_v52, %v1578_v49  ;;  %vm7724_vm15 = vmmov %vm7721_vm0  ;;  %v4331_v2 = vld [vmem:[%s7598_s4 + $0x80] sm:$0xff] }
0x10f1   :  { %4965 = vmatprep.mubr.msk.f32.mxu1 %vm7712_vm2, %v1582_v61  ;;  %v1587_v50 = vmul.f32 %v6828_v25, %v1579_v28  ;;  %5462 = vmatprep.subr.bf16.mxu1 %v5461_v4  ;;  %vm7725_vm2 = vmmov %vm7721_vm0  ;;  %v4325_v28 = vld [vmem:[%s7597_s3 + $0x48] sm:$0xff] }
0x10f2   :  { %5464 = vmatpush3.bf16.msra.mxu1 %v5461_v4  ;;  %v4332_v4 = vld [vmem:[%s7598_s4 + $0x88] sm:$0xff] }
0x10f4   :  { %4966 = vmatmul.mubr.msk.f32.gmra.mrb[14].mxu1 %vm7713_vm5, %v1583_v8  ;;  %vm7726_vm5 = vmmov %vm7721_vm0 }
0x10f5   :  { %4968 = vmatprep.mubr.msk.f32.mxu1 %vm7714_vm10, %v1584_v48  ;;  %vm7727_vm10 = vmmov %vm7721_vm0 }
0x10f8   :  { %4969 = vmatmul.mubr.msk.f32.gmra.mrb[16].mxu1 %vm7715_vm9, %v1585_v5  ;;  %v4326_v5 = vld [vmem:[%s7597_s3 + $0x58] sm:$0xff] }
0x10f9   :  { %4971 = vmatprep.mubr.msk.f32.mxu1 %vm7716_vm14, %v1586_v40  ;;  %v4327_v40 = vld [vmem:[%s7597_s3 + $0x68] sm:$0xff]  ;;  %vm7728_vm14 = vmmov %vm7721_vm0 }
0x10fa   :  { %v5473_v12 = vpack.c.bf16 %v4328_v38, %v4327_v40 }
0x10fc   :  { %4972 = vmatmul.mubr.msk.f32.gmra.mrb[18].mxu1 %vm7717_vm11, %v1587_v50  ;;  %v5469_v50 = vpack.c.bf16 %v4326_v5, %v4325_v28  ;;  %v4345_v28 = vld [vmem:[%s7598_s4 + $0xf0] sm:$0xff]  ;;  %v4346_v5 = vld [vmem:[%s7598_s4 + $0xf8] sm:$0xff]  ;;  %vm7729_vm11 = vmmov %vm7721_vm0 }
0x10fe   :  { %5470 = vmatprep.subr.bf16.mxu0 %v5469_v50 }
0x10ff   :  { %5472 = vmatpush3.bf16.msra.mxu0 %v5469_v50 }
0x1100   :  { %5474 = vmatprep.subr.bf16.mxu0 %v5473_v12 }
0x1103   :  { %5476 = vmatpush3.bf16.msra.mxu0 %v5473_v12 }
0x115d   :  { %v5825_v20 = vpop.permute.xlu0 %5824 }
0x115e   :  { %v5827_v52 = vunpack.i.h.bf16 %v5825_v20  ;;  %v5826_v14 = vunpack.i.l.bf16 %v5825_v20  ;;  %v1936_v20 = vrot.slane %v1927_v41, %v6622_v51 }
0x1160   :  { %v5465_v22 = vpack.c.bf16 %v5827_v52, %v5826_v14  ;;  %v1932_v52 = vrot.slane %v1927_v41, %v6619_v3  ;;  %v5477_v14 = vpack.c.bf16 %v4332_v4, %v4331_v2 }
0x1162   :  { %5466 = vmatprep.subr.bf16.mxu1 %v5465_v22 }
0x1163   :  { %5468 = vmatpush3.bf16.msra.mxu1 %v5465_v22  ;;  %v4333_v22 = vld [vmem:[%s7598_s4 + $0x90] sm:$0xff] }
0x1164   :  { %5478 = vmatprep.subr.bf16.mxu1 %v5477_v14 }
0x11c3   :  { %v4964_v25 = vpop.f32.mrb[12].mxu1 }
0x11c4   :  { %v1702_v23 = vpop.f32.mrb[13].mxu1 }
0x11c7   :  { %v4967_v29 = vpop.f32.mrb[14].mxu1 }
0x11c8   :  { %1745 = vrot.lane.b32.xlu0 %v4967_v29, %s6101_s16  ;;  %v1712_v17 = vpop.f32.mrb[15].mxu1  ;;  %v4335_v29 = vld [vmem:[%s7598_s4 + $0xa0] sm:$0xff] }
0x11c9   :  { %1743 = vrot.lane.b32.xlu1 %v1712_v17, %s6101_s16  ;;  %v4336_v17 = vld [vmem:[%s7598_s4 + $0xa8] sm:$0xff] }
0x11cb   :  { %v4970_v19 = vpop.f32.mrb[16].mxu1 }
0x11cc   :  { %1753 = vrot.lane.b32.xlu0 %v4970_v19, %s6102_s17  ;;  %v1722_v34 = vpop.f32.mrb[17].mxu1  ;;  %v1946_v19 = vrot.slane %v1936_v20, %v6619_v3 }
0x11cd   :  { %1751 = vrot.lane.b32.xlu1 %v1722_v34, %s6102_s17  ;;  %v1942_v34 = vrot.slane %v1932_v52, %v6619_v3 }
0x11cf   :  { %v4973_v36 = vpop.f32.mrb[18].mxu1 }
0x11d0   :  { %1761 = vrot.lane.b32.xlu0 %v4973_v36, %s6103_s18  ;;  %v1732_v37 = vpop.f32.mrb[19].mxu1  ;;  %v5485_v36 = vpack.c.bf16 %v4336_v17, %v4335_v29 }
0x11d1   :  { %1759 = vrot.lane.b32.xlu1 %v1732_v37, %s6103_s18  ;;  %v4337_v37 = vld [vmem:[%s7598_s4 + $0xb0] sm:$0xff] }
0x11d5   :  { %1880 = vrot.lane.b32.xlu1 %v6700_v58, %s6099_s14 }
0x123a   :  { %v1746_v27 = vpop.permute.xlu0 %1745 }
0x123b   :  { %v1744_v43 = vpop.permute.xlu1 %1743  ;;  %v1766_v47 = vsel %vm7719_vm8, %v4964_v25, %v1746_v27  ;;  %v4334_v25 = vld [vmem:[%s7598_s4 + $0x98] sm:$0xff]  ;;  %vm7731_vm8 = vmmov %vm7721_vm0 }
0x123c   :  { %v1765_v15 = vsel %vm7718_vm6, %v1702_v23, %v1744_v43  ;;  %v5481_v23 = vpack.c.bf16 %v4334_v25, %v4333_v22  ;;  %v4338_v27 = vld [vmem:[%s7598_s4 + $0xb8] sm:$0xff]  ;;  %v4324_v43 = vld [vmem:[%s7596_s2 + $0x5] ss:$0 sm:$0xff]  ;;  %vm7730_vm6 = vmmov %vm7721_vm0 }
0x123e   :  { %v1754_v46 = vpop.permute.xlu0 %1753 }
0x123f   :  { %v1752_v9 = vpop.permute.xlu1 %1751  ;;  %v1768_v7 = vsel %vm812_vm13, %v1766_v47, %v1754_v46  ;;  %v5489_v46 = vpack.c.bf16 %v4338_v27, %v4337_v37  ;;  %v4341_v47 = vld [vmem:[%s7598_s4 + $0xd0] sm:$0xff] }
0x1240   :  { %v1767_v6 = vsel %vm812_vm13, %v1765_v15, %v1752_v9  ;;  %v4339_v9 = vld [vmem:[%s7598_s4 + $0xc0] sm:$0xff]  ;;  %v4340_v15 = vld [vmem:[%s7598_s4 + $0xc8] sm:$0xff] }
0x1242   :  { %v1762_v42 = vpop.permute.xlu0 %1761 }
0x1243   :  { %v1760_v26 = vpop.permute.xlu1 %1759  ;;  %v1770_v24 = vsel %vm815_vm1, %v1768_v7, %v1762_v42  ;;  %v5493_v42 = vpack.c.bf16 %v4340_v15, %v4339_v9  ;;  %v4343_v7 = vld [vmem:[%s7598_s4 + $0xe0] sm:$0xff] }
0x1244   :  { %v1769_v21 = vsel %vm815_vm1, %v1767_v6, %v1760_v26  ;;  %v4342_v6 = vld [vmem:[%s7598_s4 + $0xd8] sm:$0xff] }
0x1245   :  { %4982 = vmatprep.mubr.msk.f32.mxu1 %vm7720_vm12, %v1769_v21  ;;  %v5497_v26 = vpack.c.bf16 %v4342_v6, %v4341_v47  ;;  %v4344_v21 = vld [vmem:[%s7598_s4 + $0xe8] sm:$0xff]  ;;  %v7002_v6 = vld [vmem:[%s7597_s3 + $0x80] sm:$0xff]  ;;  %vm7732_vm12 = vmmov %vm7721_vm0 }
0x1246   :  { %4983 = vmatmul.mubr.msk.f32.vlgmr.msra.gmra.mrb[20].mxu1 %vm7721_vm0, %v1770_v24  ;;  %v5501_v24 = vpack.c.bf16 %v4344_v21, %v4343_v7  ;;  %v7014_v21 = vld [vmem:[%s7597_s3 + $0xa0] sm:$0xff] }
0x1247   :  { %v1881_v53 = vpop.permute.xlu1 %1880  ;;  %5480 = vmatpush3.bf16.msra.mxu1 %v5477_v14 }
0x1248   :  { %5482 = vmatprep.subr.bf16.mxu1 %v5481_v23 }
0x124b   :  { %5484 = vmatpush3.bf16.msra.mxu1 %v5481_v23 }
0x124c   :  { %5486 = vmatprep.subr.bf16.mxu1 %v5485_v36 }
0x124f   :  { %5488 = vmatpush3.bf16.msra.mxu1 %v5485_v36  ;;  %v6991_v36 = vld [vmem:[%s7596_s2 + $0x2] ss:$0 sm:$0xff] }
0x1250   :  { %5490 = vmatprep.subr.bf16.mxu1 %v5489_v46 }
0x1253   :  { %5492 = vmatpush3.bf16.msra.mxu1 %v5489_v46 }
0x1254   :  { %5494 = vmatprep.subr.bf16.mxu1 %v5493_v42 }
0x1257   :  { %5496 = vmatpush3.bf16.msra.mxu1 %v5493_v42 }
0x1258   :  { %5498 = vmatprep.subr.bf16.mxu1 %v5497_v26 }
0x125b   :  { %5500 = vmatpush3.bf16.msra.mxu1 %v5497_v26  ;;  %v7007_v26 = vld [vmem:[%s7597_s3 + $0x90] sm:$0xff] }
0x125c   :  { %5502 = vmatprep.subr.bf16.mxu1 %v5501_v24  ;;  %v5509_v7 = vpack.c.bf16 %v7007_v26, %v7002_v6 }
0x125e   :  { %5510 = vmatprep.subr.bf16.mxu0 %v5509_v7 }
0x125f   :  { %5504 = vmatpush3.bf16.msra.mxu1 %v5501_v24  ;;  %v7019_v24 = vld [vmem:[%s7597_s3 + $0xb0] sm:$0xff] }
0x1319   :  { %v4984_v32 = vpop.f32.mrb[20].mxu1 }
0x131a   :  { %v1873_v39 = vadd.f32 %v4984_v32, %v6689_v55  ;;  %v1863_v45 = vpop.f32.mrb[21].mxu1 }
0x131b   :  { %v1872_v57 = vadd.f32 %v1863_v45, %v6691_v44 }
0x131c   :  { %v6878_v30 = vadd.f32 %v1881_v53, %v1873_v39 }
0x131d   :  { %v6880_v33 = vadd.f32 %v1881_v53, %v1872_v57 }
0x131e   :  { %v1889_v59 = vsel %vm7722_vm3, %v6878_v30, 0.0  ;;  %vm7733_vm3 = vcmask 64512  }
0x131f   :  { %1890 = vadd.xlane.f32.xlu1 %v1889_v59  ;;  %v1886_v0 = vsel %vm7723_vm7, %v6880_v33, 0.0  ;;  %vm7734_vm7 = vmmov %vm7733_vm3 }
0x1320   :  { %1887 = vadd.xlane.f32.xlu0 %v1886_v0 }
0x1330   :  { %1912 = vrot.lane.b32.xlu1 %v6700_v58, %s6100_s15 }
0x1334   :  { %1951 = vrot.lane.b32.xlu1 %v1946_v19, %s6099_s14 }
0x1338   :  { %2133 = vrot.lane.b32.xlu1 %v4324_v43, %s6094_s25 }
0x13ac   :  { %v1891_v60 = vpop.xlane.xlu1 %1890 }
0x13ad   :  { %v1893_v55 = vmul.f32 0.03125, %v1891_v60  ;;  %v1888_v61 = vpop.xlane.xlu0 %1887 }
0x13ae   :  { %v1892_v16 = vmul.f32 0.03125, %v1888_v61 }
0x13af   :  { %v6889_v44 = vsub.f32 %v6878_v30, %v1893_v55 }
0x13b0   :  { %v6892_v62 = vsub.f32 %v6880_v33, %v1892_v16  ;;  %v1913_v60 = vpop.permute.xlu1 %1912 }
0x13b1   :  { %v1897_v48 = vmul.f32 %v6889_v44, %v6889_v44 }
0x13b2   :  { %v1896_v8 = vmul.f32 %v6892_v62, %v6892_v62 }
0x13b3   :  { %v1901_v58 = vsel %vm7725_vm2, %v1897_v48, 0.0  ;;  %vm7736_vm2 = vmmov %vm7733_vm3 }
0x13b4   :  { %v1898_v49 = vsel %vm7724_vm15, %v1896_v8, 0.0  ;;  %v1952_v40 = vpop.permute.xlu1 %1951  ;;  %vm7735_vm15 = vmmov %vm7733_vm3 }
0x13b5   :  { %1899 = vadd.xlane.f32.xlu0 %v1898_v49 }
0x13b8   :  { %v2134_v14 = vpop.permute.xlu1 %2133 }
0x13b9   :  { %1902 = vadd.xlane.f32.xlu0 %v1901_v58 }
0x13cf   :  { %1949 = vrot.lane.b32.xlu0 %v1942_v34, %s6099_s14 }
0x1442   :  { %v1900_v32 = vpop.xlane.xlu0 %1899 }
0x1443   :  { %v1904_v53 = vmul.f32 0.03125, %v1900_v32  ;;  %v5513_v32 = vpack.c.bf16 %v7019_v24, %v7014_v21 }
0x1445   :  { %v1906_v39 = vadd.f32 1e-05, %v1904_v53 }
0x1446   :  { %v1903_v45 = vpop.xlane.xlu0 %1902 }
0x1447   :  { %6004 = vrsqrt.f32 %v1906_v39  ;;  %v1905_v57 = vmul.f32 0.03125, %v1903_v45 }
0x1449   :  { %v1907_v59 = vadd.f32 1e-05, %v1905_v57 }
0x144b   :  { %6006 = vrsqrt.f32 %v1907_v59 }
0x1451   :  { %v6005_v0 = vpop.eup %6004 }
0x1452   :  { %v1910_v55 = vmul.f32 %v6005_v0, %v6892_v62  ;;  %v5505_v62 = vpack.c.bf16 %v4346_v5, %v4345_v28 }
0x1454   :  { %v1915_v61 = vmul.f32 %v1913_v60, %v1910_v55  ;;  %5506 = vmatprep.subr.bf16.mxu1 %v5505_v62 }
0x1455   :  { %v6007_v16 = vpop.eup %6006  ;;  %5508 = vmatpush3.bf16.msra.mxu1 %v5505_v62 }
0x1456   :  { %v1911_v8 = vmul.f32 %v6007_v16, %v6889_v44  ;;  %v1921_v49 = vadd.f32 %v4324_v43, %v1915_v61  ;;  %v1950_v44 = vpop.permute.xlu0 %1949 }
0x1457   :  { %v1953_v50 = vsel %vm7715_vm9, %v1950_v44, %v1952_v40  ;;  %vm7739_vm9 = vmmov %vm7736_vm2 }
0x1458   :  { %v1916_v48 = vmul.f32 %v1913_v60, %v1911_v8  ;;  %4993 = vmatprep.mubr.msk.f32.mxu0 %vm7726_vm5, %v1921_v49  ;;  %vm7737_vm5 = vmmov %vm7736_vm2 }
0x145a   :  { %v1922_v58 = vadd.f32 %v4324_v43, %v1916_v48 }
0x145c   :  { %4994 = vmatmul.mubr.msk.f32.vlgmr.msra.gmra.mrb[24].mxu0 %vm7727_vm10, %v1922_v58  ;;  %vm7738_vm10 = vmmov %vm7736_vm2 }
0x145d   :  { %5512 = vmatpush3.bf16.msra.mxu0 %v5509_v7 }
0x145e   :  { %5514 = vmatprep.subr.bf16.mxu0 %v5513_v32 }
0x1461   :  { %5516 = vmatpush3.bf16.msra.mxu0 %v5513_v32 }
0x152f   :  { %v4995_v38 = vpop.f32.mrb[24].mxu0 }
0x1530   :  { %v2033_v12 = vadd.f32 %v4995_v38, %v1953_v50  ;;  %v2027_v41 = vpop.f32.mrb[25].mxu0 }
0x1531   :  { %v2028_v2 = vadd.f32 %v2027_v41, %v1953_v50 }
0x1532   :  { %v2037_v20 = vmax.f32 %v2033_v12, 0.0 }
0x1533   :  { %v2036_v4 = vmax.f32 %v2028_v2, 0.0 }
0x1535   :  { %5028 = vmatprep.mubr.f32.mxu1 %v2036_v4 }
0x1536   :  { %5029 = vmatmul.mubr.f32.vlgmr.msra.gmra.mrb[22].mxu1 %v2037_v20 }
0x1609   :  { %v5030_v52 = vpop.f32.mrb[22].mxu1 }
0x160a   :  { %v2131_v22 = vadd.f32 %v5030_v52, %v6878_v30  ;;  %v2121_v25 = vpop.f32.mrb[23].mxu1 }
0x160b   :  { %v2130_v23 = vadd.f32 %v2121_v25, %v6880_v33 }
0x160c   :  { %v6980_v29 = vadd.f32 %v2134_v14, %v2131_v22 }
0x160d   :  { %v6982_v17 = vadd.f32 %v2134_v14, %v2130_v23 }
0x160e   :  { %v2142_v19 = vsel %vm7728_vm14, %v6980_v29, 0.0  ;;  %vm7740_vm14 = vmmov %vm7736_vm2 }
0x160f   :  { %2143 = vadd.xlane.f32.xlu1 %v2142_v19  ;;  %v2139_v34 = vsel %vm7729_vm11, %v6982_v17, 0.0  ;;  %vm7741_vm11 = vcmask 523264  }
0x1610   :  { %2140 = vadd.xlane.f32.xlu0 %v2139_v34 }
0x1620   :  { %2172 = vrot.lane.b32.xlu1 %v6991_v36, %s6094_s25 }
0x169c   :  { %v2144_v30 = vpop.xlane.xlu1 %2143 }
0x169d   :  { %v2146_v33 = vmul.f32 0.03125, %v2144_v30  ;;  %v2141_v37 = vpop.xlane.xlu0 %2140 }
0x169e   :  { %v2145_v27 = vmul.f32 0.03125, %v2141_v37 }
0x169f   :  { %v2148_v43 = vsub.f32 %v6980_v29, %v2146_v33 }
0x16a0   :  { %v2147_v46 = vsub.f32 %v6982_v17, %v2145_v27  ;;  %v2173_v61 = vpop.permute.xlu1 %2172 }
0x16a1   :  { %v2150_v42 = vmul.f32 %v2148_v43, %v2148_v43 }
0x16a2   :  { %v2149_v9 = vmul.f32 %v2147_v46, %v2147_v46 }
0x16a3   :  { %v2154_v47 = vsel %vm7731_vm8, %v2150_v42, 0.0 }
0x16a4   :  { %v2151_v15 = vsel %vm7730_vm6, %v2149_v9, 0.0  ;;  %vm7742_vm6 = vmmov %vm7741_vm11 }
0x16a5   :  { %2152 = vadd.xlane.f32.xlu0 %v2151_v15  ;;  %vm7743_vm8 = vmmov %vm7742_vm6 }
0x16a9   :  { %2155 = vadd.xlane.f32.xlu0 %v2154_v47 }
0x1732   :  { %v2153_v53 = vpop.xlane.xlu0 %2152 }
0x1733   :  { %v2157_v39 = vmul.f32 0.03125, %v2153_v53 }
0x1735   :  { %v2159_v45 = vadd.f32 1e-05, %v2157_v39 }
0x1736   :  { %v2156_v57 = vpop.xlane.xlu0 %2155 }
0x1737   :  { %6008 = vrsqrt.f32 %v2159_v45  ;;  %v2158_v59 = vmul.f32 0.03125, %v2156_v57 }
0x1739   :  { %v2160_v0 = vadd.f32 1e-05, %v2158_v59 }
0x173b   :  { %6010 = vrsqrt.f32 %v2160_v0 }
0x1741   :  { %v6009_v60 = vpop.eup %6008 }
0x1742   :  { %v2163_v55 = vmul.f32 %v6009_v60, %v2147_v46 }
0x1744   :  { %v2169_v16 = vmul.f32 %v6991_v36, %v2163_v55 }
0x1745   :  { %v6011_v8 = vpop.eup %6010 }
0x1746   :  { %v2164_v49 = vmul.f32 %v6011_v8, %v2148_v43  ;;  %v2175_v48 = vadd.f32 %v2173_v61, %v2169_v16 }
0x1748   :  { %v2170_v58 = vmul.f32 %v6991_v36, %v2164_v49  ;;  %5039 = vmatprep.mubr.msk.f32.mxu0 %vm7732_vm12, %v2175_v48  ;;  %vm7744_vm12 = vmmov %vm7742_vm6 }
0x174a   :  { %v2176_v28 = vadd.f32 %v2173_v61, %v2170_v58 }
0x174c   :  { %5040 = vmatmul.mubr.msk.f32.vlgmr.msra.gmra.mrb[26].mxu0 %vm7721_vm0, %v2176_v28  ;;  %vm7745_vm0 = vmmov %vm7742_vm6 }
0x181f   :  { %v5041_v5 = vpop.f32.mrb[26].mxu0 }
0x1820   :  { %2267 = vrot.lane.b32.xlu1 %v5041_v5, %s6096_s12  ;;  %v2254_v62 = vpop.f32.mrb[27].mxu0 }
0x1821   :  { %2265 = vrot.lane.b32.xlu0 %v2254_v62, %s6096_s12  ;;  %5058 = vmatprep.mubr.msk.f32.mxu0 %vm7733_vm3, %v2254_v62  ;;  %v7030_v40 = vpack.i.bf16 %v5041_v5, %v2254_v62  ;;  %vm7746_vm3 = vmmov %vm7745_vm0 }
0x1824   :  { %2269 = vrot.lane.b32.xlu1 %v2254_v62, %s6095_s11 }
0x1825   :  { %2271 = vrot.lane.b32.xlu0 %v5041_v5, %s6095_s11 }
0x1828   :  { %2273 = vrot.lane.b32.xlu1 %v2254_v62, %s6097_s13 }
0x1829   :  { %2275 = vrot.lane.b32.xlu0 %v5041_v5, %s6097_s13 }
0x182c   :  { %5829 = vrot.lane.b32.xlu1 %v7030_v40, %s6094_s25 }
0x1892   :  { %v2268_v44 = vpop.permute.xlu1 %2267 }
0x1893   :  { %v2266_v50 = vpop.permute.xlu0 %2265 }
0x1894   :  { %v7038_v38 = vpack.i.bf16 %v2268_v44, %v2266_v50 }
0x1896   :  { %v2270_v12 = vpop.permute.xlu1 %2269  ;;  %5834 = vrot.lane.b32.xlu0 %v7038_v38, %s6094_s25 }
0x1897   :  { %v2272_v41 = vpop.permute.xlu0 %2271 }
0x1898   :  { %v7042_v2 = vpack.i.bf16 %v2272_v41, %v2270_v12 }
0x189a   :  { %v2274_v4 = vpop.permute.xlu1 %2273  ;;  %5839 = vrot.lane.b32.xlu1 %v7042_v2, %s6094_s25 }
0x189b   :  { %v2276_v20 = vpop.permute.xlu0 %2275 }
0x189c   :  { %v7046_v52 = vpack.i.bf16 %v2276_v20, %v2274_v4 }
0x189e   :  { %v5830_v14 = vpop.permute.xlu1 %5829  ;;  %5844 = vrot.lane.b32.xlu0 %v7046_v52, %s6094_s25 }
0x189f   :  { %v5832_v22 = vunpack.i.h.bf16 %v5830_v14  ;;  %v5831_v25 = vunpack.i.l.bf16 %v5830_v14 }
0x18a1   :  { %v5517_v23 = vpack.c.bf16 %v5832_v22, %v5831_v25 }
0x18a3   :  { %5519 = vmatprep.subr.msk.bf16.mxu0 %vm7687_vm4, %v5517_v23 }
0x18a4   :  { %5522 = vmatpush3.bf16.xpose.msk.msra.mxu0 %vm7687_vm4, %v5517_v23 }
0x1908   :  { %v5835_v19 = vpop.permute.xlu0 %5834 }
0x1909   :  { %v5837_v34 = vunpack.i.h.bf16 %v5835_v19  ;;  %v5836_v30 = vunpack.i.l.bf16 %v5835_v19 }
0x190b   :  { %v5523_v33 = vpack.c.bf16 %v5837_v34, %v5836_v30 }
0x190c   :  { %v5840_v37 = vpop.permute.xlu1 %5839 }
0x190d   :  { %v5842_v27 = vunpack.i.h.bf16 %v5840_v37  ;;  %v5841_v43 = vunpack.i.l.bf16 %v5840_v37  ;;  %5525 = vmatprep.subr.msk.bf16.mxu0 %vm7687_vm4, %v5523_v33 }
0x190e   :  { %5528 = vmatpush3.bf16.xpose.msk.msra.mxu0 %vm7687_vm4, %v5523_v33 }
0x190f   :  { %v5529_v46 = vpack.c.bf16 %v5842_v27, %v5841_v43 }
0x1910   :  { %v5845_v9 = vpop.permute.xlu0 %5844 }
0x1911   :  { %v5847_v15 = vunpack.i.h.bf16 %v5845_v9  ;;  %v5846_v42 = vunpack.i.l.bf16 %v5845_v9  ;;  %5531 = vmatprep.subr.msk.bf16.mxu0 %vm7687_vm4, %v5529_v46 }
0x1913   :  { %v5535_v47 = vpack.c.bf16 %v5847_v15, %v5846_v42 }
0x1916   :  { %5534 = vmatpush3.bf16.xpose.msk.msra.mxu0 %vm7687_vm4, %v5529_v46 }
0x1917   :  { %5537 = vmatprep.subr.msk.bf16.mxu0 %vm7687_vm4, %v5535_v47 }
0x191e   :  { %5540 = vmatpush3.bf16.xpose.msk.msra.mxu0 %vm7687_vm4, %v5535_v47 }
0x1925   :  { %5059 = vmatmul.mubr.msk.f32.vlgmr.msra.gmra.mrb[28].mxu0 %vm7734_vm7, %v5041_v5  ;;  %vm7747_vm7 = vmmov %vm7745_vm0 }
0x1926   :  { %5061 = vmatprep.mubr.msk.f32.mxu0 %vm7735_vm15, %v2266_v50  ;;  %vm7748_vm15 = vmmov %vm7745_vm0 }
0x1929   :  { %5062 = vmatmul.mubr.msk.f32.gmra.mrb[30].mxu0 %vm7736_vm2, %v2268_v44  ;;  %vm7749_vm2 = vmmov %vm7745_vm0 }
0x192a   :  { %5064 = vmatprep.mubr.msk.f32.mxu0 %vm7737_vm5, %v2270_v12  ;;  %vm7750_vm5 = vmmov %vm7745_vm0 }
0x192d   :  { %5065 = vmatmul.mubr.msk.f32.gmra.mrb[32].mxu0 %vm7738_vm10, %v2272_v41  ;;  %vm7751_vm10 = vmmov %vm7745_vm0 }
0x192e   :  { %5067 = vmatprep.mubr.msk.f32.mxu0 %vm7739_vm9, %v2274_v4  ;;  %vm7752_vm9 = vmmov %vm7745_vm0 }
0x1931   :  { %5068 = vmatmul.mubr.msk.f32.gmra.mrb[34].mxu0 %vm7740_vm14, %v2276_v20  ;;  %vm7753_vm14 = vmmov %vm7745_vm0 }
0x19f8   :  { %v5060_v7 = vpop.f32.mrb[28].mxu0 }
0x19f9   :  { %v2397_v32 = vadd.f32 %v5060_v7, %v6384_v31  ;;  %v2391_v53 = vpop.f32.mrb[29].mxu0 }
0x19fa   :  { %v2392_v39 = vadd.f32 %v2391_v53, %v6391_v35 }
0x19fb   :  { %v2433_v45 = vsel %vm7741_vm11, %v2397_v32, -inf  ;;  %vm7754_vm11 = vmmov %vm7745_vm0 }
0x19fc   :  { %2434 = vmax.xlane.f32.xlu0 %v2433_v45  ;;  %v5063_v57 = vpop.f32.mrb[30].mxu0  ;;  %v2430_v59 = vsel %vm7742_vm6, %v2392_v39, -inf  ;;  %vm7755_vm6 = vmmov %vm7745_vm0 }
0x19fd   :  { %v2407_v0 = vadd.f32 %v5063_v57, %v6427_v54  ;;  %v2401_v60 = vpop.f32.mrb[31].mxu0  ;;  %2431 = vmax.xlane.f32.xlu1 %v2430_v59 }
0x19fe   :  { %v2402_v55 = vadd.f32 %v2401_v60, %v6441_v56 }
0x19ff   :  { %v2439_v61 = vsel %vm7743_vm8, %v2407_v0, -inf  ;;  %vm7756_vm8 = vmmov %vm7745_vm0 }
0x1a00   :  { %v5066_v16 = vpop.f32.mrb[32].mxu0  ;;  %v2436_v8 = vsel %vm7744_vm12, %v2402_v55, -inf  ;;  %vm7757_vm12 = vmmov %vm7745_vm0 }
0x1a01   :  { %v2417_v49 = vadd.f32 %v5066_v16, %v6475_v63  ;;  %v2411_v48 = vpop.f32.mrb[33].mxu0  ;;  %2437 = vmax.xlane.f32.xlu0 %v2436_v8  ;;  %2440 = vmax.xlane.f32.xlu1 %v2439_v61 }
0x1a02   :  { %v2412_v58 = vadd.f32 %v2411_v48, %v6477_v1 }
0x1a03   :  { %v2445_v28 = vsel %vm7745_vm0, %v2417_v49, -inf }
0x1a04   :  { %v5069_v5 = vpop.f32.mrb[34].mxu0  ;;  %v2442_v62 = vsel %vm7746_vm3, %v2412_v58, -inf  ;;  %vm7758_vm3 = vmmov %vm7745_vm0 }
0x1a05   :  { %v2427_v44 = vadd.f32 %v5069_v5, %v6491_v10  ;;  %v2421_v50 = vpop.f32.mrb[35].mxu0  ;;  %2443 = vmax.xlane.f32.xlu0 %v2442_v62  ;;  %2446 = vmax.xlane.f32.xlu1 %v2445_v28 }
0x1a06   :  { %v2422_v12 = vadd.f32 %v2421_v50, %v6493_v11 }
0x1a07   :  { %v2451_v41 = vsel %vm7747_vm7, %v2427_v44, -inf  ;;  %vm7759_vm7 = vmmov %vm7745_vm0 }
0x1a08   :  { %v2448_v4 = vsel %vm7748_vm15, %v2422_v12, -inf  ;;  %vm7760_vm15 = vmmov %vm7745_vm0 }
0x1a09   :  { %2449 = vmax.xlane.f32.xlu0 %v2448_v4  ;;  %2452 = vmax.xlane.f32.xlu1 %v2451_v41 }
0x1a1a   :  { %5854 = vrot.lane.b32.xlu1 %v7038_v38, %s6099_s14 }
0x1a1f   :  { %5849 = vrot.lane.b32.xlu0 %v7030_v40, %s6099_s14 }
0x1a89   :  { %v2435_v20 = vpop.xlane.xlu0 %2434 }
0x1a8a   :  { %v2455_v14 = vsub.f32 %v2397_v32, %v2435_v20  ;;  %v2432_v22 = vpop.xlane.xlu1 %2431 }
0x1a8b   :  { %v2454_v25 = vsub.f32 %v2392_v39, %v2432_v22 }
0x1a8c   :  { %v2464_v23 = vmul.f32 1.442695, %v2455_v14 }
0x1a8d   :  { %v2462_v19 = vmul.f32 1.442695, %v2454_v25 }
0x1a8e   :  { %6012 = vpow2.f32 %v2464_v23  ;;  %v2438_v34 = vpop.xlane.xlu0 %2437  ;;  %v2441_v30 = vpop.xlane.xlu1 %2440 }
0x1a8f   :  { %6014 = vpow2.f32 %v2462_v19  ;;  %v2456_v33 = vsub.f32 %v2402_v55, %v2438_v34  ;;  %v2457_v37 = vsub.f32 %v2407_v0, %v2441_v30  ;;  %v5868_v19 = vpack.i.bf16 %v7007_v26, %v7002_v6 }
0x1a91   :  { %v2466_v27 = vmul.f32 1.442695, %v2456_v33  ;;  %v2468_v43 = vmul.f32 1.442695, %v2457_v37 }
0x1a92   :  { %v2444_v46 = vpop.xlane.xlu0 %2443  ;;  %v2447_v9 = vpop.xlane.xlu1 %2446 }
0x1a93   :  { %6016 = vpow2.f32 %v2466_v27  ;;  %v2458_v38 = vsub.f32 %v2412_v58, %v2444_v46  ;;  %v2459_v15 = vsub.f32 %v2417_v49, %v2447_v9 }
0x1a94   :  { %6018 = vpow2.f32 %v2468_v43 }
0x1a95   :  { %v2470_v40 = vmul.f32 1.442695, %v2458_v38  ;;  %v2472_v42 = vmul.f32 1.442695, %v2459_v15 }
0x1a96   :  { %v2450_v47 = vpop.xlane.xlu0 %2449  ;;  %v2453_v7 = vpop.xlane.xlu1 %2452 }
0x1a97   :  { %6020 = vpow2.f32 %v2470_v40  ;;  %v2460_v32 = vsub.f32 %v2422_v12, %v2450_v47  ;;  %v2461_v53 = vsub.f32 %v2427_v44, %v2453_v7 }
0x1a98   :  { %v7093_v39 = vpop.eup %6012  ;;  %6022 = vpow2.f32 %v2472_v42 }
0x1a99   :  { %v7095_v45 = vpop.eup %6014  ;;  %v2474_v57 = vmul.f32 1.442695, %v2460_v32  ;;  %v2476_v59 = vmul.f32 1.442695, %v2461_v53  ;;  %v2481_v0 = vsel %vm7749_vm2, %v7093_v39, 0.0  ;;  %vm7761_vm2 = vmmov %vm7745_vm0 }
0x1a9a   :  { %v5850_v60 = vpop.permute.xlu0 %5849  ;;  %2482 = vadd.xlane.f32.xlu1 %v2481_v0  ;;  %v5855_v55 = vpop.permute.xlu1 %5854  ;;  %v2478_v61 = vsel %vm7750_vm5, %v7095_v45, 0.0  ;;  %vm7762_vm5 = vmmov %vm7745_vm0 }
0x1a9b   :  { %6024 = vpow2.f32 %v2474_v57  ;;  %v5852_v16 = vunpack.i.h.bf16 %v5850_v60  ;;  %v5851_v8 = vunpack.i.l.bf16 %v5850_v60  ;;  %v5857_v49 = vunpack.i.h.bf16 %v5855_v55  ;;  %2479 = vadd.xlane.f32.xlu0 %v2478_v61 }
0x1a9c   :  { %6026 = vpow2.f32 %v2476_v59  ;;  %v5856_v48 = vunpack.i.l.bf16 %v5855_v55 }
0x1a9d   :  { %v7101_v58 = vpop.eup %6016  ;;  %v5541_v28 = vpack.c.bf16 %v5852_v16, %v5851_v8 }
0x1a9e   :  { %v7103_v5 = vpop.eup %6018  ;;  %v2484_v62 = vsel %vm7751_vm10, %v7101_v58, 0.0  ;;  %v5545_v44 = vpack.c.bf16 %v5857_v49, %v5856_v48  ;;  %vm7763_vm10 = vmmov %vm7745_vm0 }
0x1a9f   :  { %5542 = vmatprep.subr.bf16.mxu1 %v5541_v28  ;;  %2485 = vadd.xlane.f32.xlu0 %v2484_v62  ;;  %v2487_v50 = vsel %vm7752_vm9, %v7103_v5, 0.0  ;;  %vm7764_vm9 = vcmask 64512  }
0x1aa0   :  { %2488 = vadd.xlane.f32.xlu1 %v2487_v50  ;;  %5544 = vmatpush3.bf16.msra.mxu1 %v5541_v28 }
0x1aa1   :  { %v7109_v12 = vpop.eup %6020  ;;  %5546 = vmatprep.subr.bf16.mxu1 %v5545_v44 }
0x1aa2   :  { %v7111_v41 = vpop.eup %6022  ;;  %v2490_v4 = vsel %vm7753_vm14, %v7109_v12, 0.0  ;;  %vm7765_vm14 = vmmov %vm7764_vm9 }
0x1aa3   :  { %2491 = vadd.xlane.f32.xlu0 %v2490_v4  ;;  %v2493_v20 = vsel %vm7754_vm11, %v7111_v41, 0.0  ;;  %vm7766_vm11 = vcmask 261120  }
0x1aa4   :  { %2494 = vadd.xlane.f32.xlu1 %v2493_v20  ;;  %5548 = vmatpush3.bf16.msra.mxu1 %v5545_v44 }
0x1aa5   :  { %v7117_v14 = vpop.eup %6024 }
0x1aa6   :  { %v7119_v22 = vpop.eup %6026  ;;  %v2496_v25 = vsel %vm7755_vm6, %v7117_v14, 0.0  ;;  %vm7767_vm6 = vmmov %vm7766_vm11 }
0x1aa7   :  { %2497 = vadd.xlane.f32.xlu0 %v2496_v25  ;;  %v2499_v23 = vsel %vm7756_vm8, %v7119_v22, 0.0  ;;  %vm7768_vm8 = vmmov %vm7767_vm6 }
0x1aa8   :  { %2500 = vadd.xlane.f32.xlu1 %v2499_v23 }
0x1ab9   :  { %5859 = vrot.lane.b32.xlu1 %v7042_v2, %s6099_s14 }
0x1abd   :  { %5864 = vrot.lane.b32.xlu0 %v7046_v52, %s6099_s14  ;;  %5869 = vrot.lane.b32.xlu1 %v5868_v19, %s6100_s15 }
0x1b27   :  { %v2483_v34 = vpop.xlane.xlu1 %2482 }
0x1b28   :  { %v2480_v30 = vpop.xlane.xlu0 %2479 }
0x1b29   :  { %6028 = vrcp.f32 %v2480_v30 }
0x1b2a   :  { %6030 = vrcp.f32 %v2483_v34 }
0x1b2c   :  { %v2486_v33 = vpop.xlane.xlu0 %2485 }
0x1b2d   :  { %6032 = vrcp.f32 %v2486_v33  ;;  %v2489_v37 = vpop.xlane.xlu1 %2488 }
0x1b2e   :  { %6034 = vrcp.f32 %v2489_v37 }
0x1b30   :  { %v2492_v27 = vpop.xlane.xlu0 %2491 }
0x1b31   :  { %6036 = vrcp.f32 %v2492_v27  ;;  %v2495_v43 = vpop.xlane.xlu1 %2494 }
0x1b32   :  { %6038 = vrcp.f32 %v2495_v43 }
0x1b33   :  { %v6029_v2 = vpop.eup %6028 }
0x1b34   :  { %v2510_v46 = vmul.f32 %v6029_v2, %v2480_v30  ;;  %v2498_v52 = vpop.xlane.xlu0 %2497  ;;  %v6031_v9 = vpop.eup %6030 }
0x1b35   :  { %6040 = vrcp.f32 %v2498_v52  ;;  %v2501_v6 = vpop.xlane.xlu1 %2500  ;;  %v2511_v15 = vmul.f32 %v6031_v9, %v2483_v34 }
0x1b36   :  { %v2518_v26 = vsub.f32 2.0, %v2510_v46  ;;  %6042 = vrcp.f32 %v2501_v6 }
0x1b37   :  { %v6033_v38 = vpop.eup %6032  ;;  %v2519_v61 = vsub.f32 2.0, %v2511_v15 }
0x1b38   :  { %v2526_v40 = vmul.f32 %v6029_v2, %v2518_v26  ;;  %v5865_v42 = vpop.permute.xlu0 %5864  ;;  %v6035_v47 = vpop.eup %6034  ;;  %v2512_v7 = vmul.f32 %v6033_v38, %v2486_v33 }
0x1b39   :  { %v5867_v32 = vunpack.i.h.bf16 %v5865_v42  ;;  %v5860_v53 = vpop.permute.xlu1 %5859  ;;  %v5866_v59 = vunpack.i.l.bf16 %v5865_v42  ;;  %v2513_v16 = vmul.f32 %v6035_v47, %v2489_v37  ;;  %v2527_v50 = vmul.f32 %v6031_v9, %v2519_v61 }
0x1b3a   :  { %v2534_v57 = vmul.f32 %v7095_v45, %v2526_v40  ;;  %v5862_v0 = vunpack.i.h.bf16 %v5860_v53  ;;  %v5861_v60 = vunpack.i.l.bf16 %v5860_v53  ;;  %v2520_v48 = vsub.f32 2.0, %v2512_v7 }
0x1b3b   :  { %v6037_v55 = vpop.eup %6036  ;;  %v5553_v62 = vpack.c.bf16 %v5867_v32, %v5866_v59  ;;  %v2521_v4 = vsub.f32 2.0, %v2513_v16  ;;  %v2535_v34 = vmul.f32 %v7093_v39, %v2527_v50 }
0x1b3c   :  { %v5549_v8 = vpack.c.bf16 %v5862_v0, %v5861_v60  ;;  %5086 = vmatprep.mubr.msk.f32.mxu1 %vm7757_vm12, %v2534_v57  ;;  %v6039_v49 = vpop.eup %6038  ;;  %v2514_v28 = vmul.f32 %v6037_v55, %v2492_v27  ;;  %v2528_v25 = vmul.f32 %v6033_v38, %v2520_v48  ;;  %vm7769_vm12 = vmmov %vm7767_vm6 }
0x1b3d   :  { %v2515_v20 = vmul.f32 %v6039_v49, %v2495_v43  ;;  %v2529_v30 = vmul.f32 %v6035_v47, %v2521_v4  ;;  %v5870_v15 = vpop.permute.xlu1 %5869 }
0x1b3e   :  { %5550 = vmatprep.subr.bf16.mxu1 %v5549_v8  ;;  %v2522_v23 = vsub.f32 2.0, %v2514_v28  ;;  %v2536_v27 = vmul.f32 %v7101_v58, %v2528_v25  ;;  %v5872_v40 = vunpack.i.h.bf16 %v5870_v15  ;;  %v5871_v42 = vunpack.i.l.bf16 %v5870_v15 }
0x1b3f   :  { %v6041_v44 = vpop.eup %6040  ;;  %5552 = vmatpush3.bf16.msra.mxu1 %v5549_v8  ;;  %v2523_v33 = vsub.f32 2.0, %v2515_v20  ;;  %v2537_v43 = vmul.f32 %v7103_v5, %v2529_v30 }
0x1b40   :  { %5554 = vmatprep.subr.bf16.mxu1 %v5553_v62  ;;  %v6043_v45 = vpop.eup %6042  ;;  %v2516_v19 = vmul.f32 %v6041_v44, %v2498_v52  ;;  %v2530_v2 = vmul.f32 %v6037_v55, %v2522_v23 }
0x1b41   :  { %v2517_v37 = vmul.f32 %v6043_v45, %v2501_v6  ;;  %v2531_v9 = vmul.f32 %v6039_v49, %v2523_v33 }
0x1b42   :  { %v2524_v46 = vsub.f32 2.0, %v2516_v19  ;;  %v2538_v52 = vmul.f32 %v7109_v12, %v2530_v2  ;;  %v5873_v12 = vpack.i.bf16 %v7019_v24, %v7014_v21 }
0x1b43   :  { %5556 = vmatpush3.bf16.msra.mxu1 %v5553_v62  ;;  %v2525_v26 = vsub.f32 2.0, %v2517_v37  ;;  %v2539_v39 = vmul.f32 %v7111_v41, %v2531_v9  ;;  %v5557_v41 = vpack.c.bf16 %v5872_v40, %v5871_v42  ;;  %v2881_v40 = vld [vmem:[%s7596_s2 + $0x6] sm:$0x11] }
0x1b44   :  { %v2532_v38 = vmul.f32 %v6041_v44, %v2524_v46  ;;  %5874 = vrot.lane.b32.xlu0 %v5873_v12, %s6100_s15  ;;  %v4389_v12 = vld [vmem:[%s7597_s3 + $0xb8] sm:$0xff]  ;;  %v4392_v42 = vld [vmem:[%s7598_s4 + $0x100] sm:$0xff] }
0x1b45   :  { %v2533_v58 = vmul.f32 %v6043_v45, %v2525_v26  ;;  %5558 = vmatprep.subr.bf16.mxu0 %v5557_v41 }
0x1b46   :  { %5087 = vmatmul.mubr.msk.f32.vlgmr.msra.gmra.mrb[24].mxu1 %vm7745_vm0, %v2535_v34  ;;  %v2540_v6 = vmul.f32 %v7117_v14, %v2532_v38  ;;  %5560 = vmatpush3.bf16.msra.mxu0 %v5557_v41  ;;  %vm7770_vm0 = vmmov %vm7767_vm6  ;;  %v4393_v41 = vld [vmem:[%s7598_s4 + $0x108] sm:$0xff] }
0x1b47   :  { %5089 = vmatprep.mubr.msk.f32.mxu1 %vm7758_vm3, %v2536_v27  ;;  %v2541_v5 = vmul.f32 %v7119_v22, %v2533_v58  ;;  %vm7771_vm3 = vmmov %vm7770_vm0  ;;  %v4387_v58 = vld [vmem:[%s7597_s3 + $0x98] sm:$0xff] }
0x1b4a   :  { %5090 = vmatmul.mubr.msk.f32.gmra.mrb[26].mxu1 %vm7759_vm7, %v2537_v43  ;;  %vm7772_vm7 = vmmov %vm7770_vm0 }
0x1b4b   :  { %5092 = vmatprep.mubr.msk.f32.mxu1 %vm7760_vm15, %v2538_v52  ;;  %vm7773_vm15 = vmmov %vm7770_vm0 }
0x1b4e   :  { %5093 = vmatmul.mubr.msk.f32.gmra.mrb[28].mxu1 %vm7761_vm2, %v2539_v39  ;;  %v4386_v39 = vld [vmem:[%s7597_s3 + $0x88] sm:$0xff] }
0x1b4f   :  { %5095 = vmatprep.mubr.msk.f32.mxu1 %vm7762_vm5, %v2540_v6  ;;  %v4388_v6 = vld [vmem:[%s7597_s3 + $0xa8] sm:$0xff]  ;;  %vm7774_vm5 = vmmov %vm7770_vm0 }
0x1b50   :  { %v5569_v15 = vpack.c.bf16 %v4389_v12, %v4388_v6 }
0x1b52   :  { %5096 = vmatmul.mubr.msk.f32.gmra.mrb[30].mxu1 %vm7763_vm10, %v2541_v5  ;;  %v5565_v5 = vpack.c.bf16 %v4387_v58, %v4386_v39  ;;  %v4406_v39 = vld [vmem:[%s7598_s4 + $0x170] sm:$0xff]  ;;  %v4407_v58 = vld [vmem:[%s7598_s4 + $0x178] sm:$0xff]  ;;  %vm7775_vm10 = vmmov %vm7770_vm0 }
0x1b54   :  { %5566 = vmatprep.subr.bf16.mxu1 %v5565_v5 }
0x1b55   :  { %5568 = vmatpush3.bf16.msra.mxu1 %v5565_v5 }
0x1b56   :  { %5570 = vmatprep.subr.bf16.mxu1 %v5569_v15 }
0x1b59   :  { %5572 = vmatpush3.bf16.msra.mxu1 %v5569_v15 }
0x1bb6   :  { %v5875_v14 = vpop.permute.xlu0 %5874 }
0x1bb7   :  { %v5877_v47 = vunpack.i.h.bf16 %v5875_v14  ;;  %v5876_v7 = vunpack.i.l.bf16 %v5875_v14  ;;  %v2890_v14 = vrot.slane %v2881_v40, %v6622_v51 }
0x1bb9   :  { %v5561_v32 = vpack.c.bf16 %v5877_v47, %v5876_v7  ;;  %v2886_v47 = vrot.slane %v2881_v40, %v6619_v3  ;;  %v5573_v7 = vpack.c.bf16 %v4393_v41, %v4392_v42 }
0x1bbb   :  { %5562 = vmatprep.subr.bf16.mxu0 %v5561_v32 }
0x1bbc   :  { %5564 = vmatpush3.bf16.msra.mxu0 %v5561_v32  ;;  %v4394_v32 = vld [vmem:[%s7598_s4 + $0x110] sm:$0xff] }
0x1bbd   :  { %5574 = vmatprep.subr.bf16.mxu0 %v5573_v7 }
0x1c19   :  { %v5088_v22 = vpop.f32.mrb[24].mxu1 }
0x1c1a   :  { %v2656_v53 = vpop.f32.mrb[25].mxu1 }
0x1c1d   :  { %v5091_v57 = vpop.f32.mrb[26].mxu1 }
0x1c1e   :  { %2699 = vrot.lane.b32.xlu0 %v5091_v57, %s6101_s16  ;;  %v2666_v21 = vpop.f32.mrb[27].mxu1  ;;  %v4396_v57 = vld [vmem:[%s7598_s4 + $0x120] sm:$0xff] }
0x1c1f   :  { %2697 = vrot.lane.b32.xlu1 %v2666_v21, %s6101_s16  ;;  %v4397_v21 = vld [vmem:[%s7598_s4 + $0x128] sm:$0xff] }
0x1c21   :  { %v5094_v24 = vpop.f32.mrb[28].mxu1 }
0x1c22   :  { %2707 = vrot.lane.b32.xlu0 %v5094_v24, %s6102_s17  ;;  %v2676_v59 = vpop.f32.mrb[29].mxu1  ;;  %v2900_v24 = vrot.slane %v2890_v14, %v6619_v3 }
0x1c23   :  { %2705 = vrot.lane.b32.xlu1 %v2676_v59, %s6102_s17  ;;  %v2896_v59 = vrot.slane %v2886_v47, %v6619_v3 }
0x1c25   :  { %v5097_v0 = vpop.f32.mrb[30].mxu1 }
0x1c26   :  { %2715 = vrot.lane.b32.xlu0 %v5097_v0, %s6103_s18  ;;  %v2686_v60 = vpop.f32.mrb[31].mxu1  ;;  %v5581_v0 = vpack.c.bf16 %v4397_v21, %v4396_v57 }
0x1c27   :  { %2713 = vrot.lane.b32.xlu1 %v2686_v60, %s6103_s18  ;;  %v4398_v60 = vld [vmem:[%s7598_s4 + $0x130] sm:$0xff] }
0x1c2b   :  { %2834 = vrot.lane.b32.xlu1 %v6991_v36, %s6099_s14 }
0x1c90   :  { %v2700_v55 = vpop.permute.xlu0 %2699 }
0x1c91   :  { %v2698_v61 = vpop.permute.xlu1 %2697  ;;  %v2720_v28 = vsel %vm7765_vm14, %v5088_v22, %v2700_v55  ;;  %v4395_v22 = vld [vmem:[%s7598_s4 + $0x118] sm:$0xff]  ;;  %vm7777_vm14 = vmmov %vm7770_vm0 }
0x1c92   :  { %v2719_v49 = vsel %vm7764_vm9, %v2656_v53, %v2698_v61  ;;  %v5577_v53 = vpack.c.bf16 %v4395_v22, %v4394_v32  ;;  %v4399_v55 = vld [vmem:[%s7598_s4 + $0x138] sm:$0xff]  ;;  %v4385_v61 = vld [vmem:[%s7596_s2 + $0x6] ss:$0 sm:$0xff]  ;;  %vm7776_vm9 = vmmov %vm7770_vm0 }
0x1c94   :  { %v2708_v16 = vpop.permute.xlu0 %2707 }
0x1c95   :  { %v2706_v8 = vpop.permute.xlu1 %2705  ;;  %v2722_v50 = vsel %vm812_vm13, %v2720_v28, %v2708_v16  ;;  %v5585_v16 = vpack.c.bf16 %v4399_v55, %v4398_v60  ;;  %v4402_v28 = vld [vmem:[%s7598_s4 + $0x150] sm:$0xff] }
0x1c96   :  { %v2721_v62 = vsel %vm812_vm13, %v2719_v49, %v2706_v8  ;;  %v4400_v8 = vld [vmem:[%s7598_s4 + $0x140] sm:$0xff]  ;;  %v4401_v49 = vld [vmem:[%s7598_s4 + $0x148] sm:$0xff] }
0x1c98   :  { %v2716_v48 = vpop.permute.xlu0 %2715 }
0x1c99   :  { %v2714_v44 = vpop.permute.xlu1 %2713  ;;  %v2724_v20 = vsel %vm815_vm1, %v2722_v50, %v2716_v48  ;;  %v5589_v48 = vpack.c.bf16 %v4401_v49, %v4400_v8  ;;  %v4404_v50 = vld [vmem:[%s7598_s4 + $0x160] sm:$0xff] }
0x1c9a   :  { %v2723_v4 = vsel %vm815_vm1, %v2721_v62, %v2714_v44  ;;  %v4403_v62 = vld [vmem:[%s7598_s4 + $0x158] sm:$0xff] }
0x1c9b   :  { %5106 = vmatprep.mubr.msk.f32.mxu0 %vm7766_vm11, %v2723_v4  ;;  %v5593_v44 = vpack.c.bf16 %v4403_v62, %v4402_v28  ;;  %v4405_v4 = vld [vmem:[%s7598_s4 + $0x168] sm:$0xff]  ;;  %v7293_v62 = vld [vmem:[%s7597_s3 + $0xc0] sm:$0xff]  ;;  %vm7778_vm11 = vmmov %vm7770_vm0 }
0x1c9c   :  { %5107 = vmatmul.mubr.msk.f32.vlgmr.msra.gmra.mrb[36].mxu0 %vm7767_vm6, %v2724_v20  ;;  %v5597_v20 = vpack.c.bf16 %v4405_v4, %v4404_v50  ;;  %v7305_v4 = vld [vmem:[%s7597_s3 + $0xe0] sm:$0xff]  ;;  %vm7779_vm6 = vmmov %vm7770_vm0 }
0x1c9d   :  { %v2835_v25 = vpop.permute.xlu1 %2834  ;;  %5576 = vmatpush3.bf16.msra.mxu0 %v5573_v7 }
0x1c9e   :  { %5578 = vmatprep.subr.bf16.mxu0 %v5577_v53 }
0x1ca1   :  { %5580 = vmatpush3.bf16.msra.mxu0 %v5577_v53 }
0x1ca2   :  { %5582 = vmatprep.subr.bf16.mxu0 %v5581_v0 }
0x1ca5   :  { %5584 = vmatpush3.bf16.msra.mxu0 %v5581_v0  ;;  %v7282_v0 = vld [vmem:[%s7596_s2 + $0x3] ss:$0 sm:$0xff] }
0x1ca6   :  { %5586 = vmatprep.subr.bf16.mxu0 %v5585_v16 }
0x1ca9   :  { %5588 = vmatpush3.bf16.msra.mxu0 %v5585_v16 }
0x1caa   :  { %5590 = vmatprep.subr.bf16.mxu0 %v5589_v48 }
0x1cad   :  { %5592 = vmatpush3.bf16.msra.mxu0 %v5589_v48 }
0x1cae   :  { %5594 = vmatprep.subr.bf16.mxu0 %v5593_v44 }
0x1cb1   :  { %5596 = vmatpush3.bf16.msra.mxu0 %v5593_v44  ;;  %v7298_v44 = vld [vmem:[%s7597_s3 + $0xd0] sm:$0xff] }
0x1cb2   :  { %5598 = vmatprep.subr.bf16.mxu0 %v5597_v20  ;;  %v5605_v50 = vpack.c.bf16 %v7298_v44, %v7293_v62 }
0x1cb4   :  { %5606 = vmatprep.subr.bf16.mxu1 %v5605_v50 }
0x1cb5   :  { %5600 = vmatpush3.bf16.msra.mxu0 %v5597_v20  ;;  %v7310_v20 = vld [vmem:[%s7597_s3 + $0xf0] sm:$0xff] }
0x1d6f   :  { %v5108_v45 = vpop.f32.mrb[36].mxu0 }
0x1d70   :  { %v2827_v23 = vadd.f32 %v5108_v45, %v6980_v29  ;;  %v2817_v19 = vpop.f32.mrb[37].mxu0 }
0x1d71   :  { %v2826_v34 = vadd.f32 %v2817_v19, %v6982_v17 }
0x1d72   :  { %v7169_v30 = vadd.f32 %v2835_v25, %v2827_v23 }
0x1d73   :  { %v7171_v33 = vadd.f32 %v2835_v25, %v2826_v34 }
0x1d74   :  { %v2843_v37 = vsel %vm7768_vm8, %v7169_v30, 0.0  ;;  %vm7780_vm8 = vcmask 64512  }
0x1d75   :  { %2844 = vadd.xlane.f32.xlu1 %v2843_v37  ;;  %v2840_v27 = vsel %vm7769_vm12, %v7171_v33, 0.0  ;;  %vm7781_vm12 = vmmov %vm7780_vm8 }
0x1d76   :  { %2841 = vadd.xlane.f32.xlu0 %v2840_v27 }
0x1d86   :  { %2866 = vrot.lane.b32.xlu1 %v6991_v36, %s6100_s15 }
0x1d8a   :  { %2905 = vrot.lane.b32.xlu1 %v2900_v24, %s6099_s14 }
0x1d8e   :  { %3087 = vrot.lane.b32.xlu1 %v4385_v61, %s6094_s25 }
0x1e02   :  { %v2845_v2 = vpop.xlane.xlu1 %2844 }
0x1e03   :  { %v2847_v29 = vmul.f32 0.03125, %v2845_v2  ;;  %v2842_v46 = vpop.xlane.xlu0 %2841 }
0x1e04   :  { %v2846_v43 = vmul.f32 0.03125, %v2842_v46 }
0x1e05   :  { %v7180_v17 = vsub.f32 %v7169_v30, %v2847_v29 }
0x1e06   :  { %v7183_v9 = vsub.f32 %v7171_v33, %v2846_v43  ;;  %v2867_v2 = vpop.permute.xlu1 %2866 }
0x1e07   :  { %v2851_v38 = vmul.f32 %v7180_v17, %v7180_v17 }
0x1e08   :  { %v2850_v26 = vmul.f32 %v7183_v9, %v7183_v9 }
0x1e09   :  { %v2855_v36 = vsel %vm7771_vm3, %v2851_v38, 0.0 }
0x1e0a   :  { %v2852_v52 = vsel %vm7770_vm0, %v2850_v26, 0.0  ;;  %v2906_v6 = vpop.permute.xlu1 %2905  ;;  %vm7782_vm0 = vmmov %vm7780_vm8 }
0x1e0b   :  { %2853 = vadd.xlane.f32.xlu0 %v2852_v52  ;;  %vm7783_vm3 = vmmov %vm7782_vm0 }
0x1e0e   :  { %v3088_v7 = vpop.permute.xlu1 %3087 }
0x1e0f   :  { %2856 = vadd.xlane.f32.xlu0 %v2855_v36 }
0x1e25   :  { %2903 = vrot.lane.b32.xlu0 %v2896_v59, %s6099_s14 }
0x1e98   :  { %v2854_v45 = vpop.xlane.xlu0 %2853 }
0x1e99   :  { %v2858_v25 = vmul.f32 0.03125, %v2854_v45  ;;  %v5609_v45 = vpack.c.bf16 %v7310_v20, %v7305_v4 }
0x1e9b   :  { %v2860_v23 = vadd.f32 1e-05, %v2858_v25 }
0x1e9c   :  { %v2857_v19 = vpop.xlane.xlu0 %2856 }
0x1e9d   :  { %6044 = vrsqrt.f32 %v2860_v23  ;;  %v2859_v34 = vmul.f32 0.03125, %v2857_v19 }
0x1e9f   :  { %v2861_v37 = vadd.f32 1e-05, %v2859_v34 }
0x1ea1   :  { %6046 = vrsqrt.f32 %v2861_v37 }
0x1ea7   :  { %v6045_v27 = vpop.eup %6044 }
0x1ea8   :  { %v2864_v29 = vmul.f32 %v6045_v27, %v7183_v9  ;;  %v5601_v9 = vpack.c.bf16 %v4407_v58, %v4406_v39 }
0x1eaa   :  { %v2869_v46 = vmul.f32 %v2867_v2, %v2864_v29  ;;  %5602 = vmatprep.subr.bf16.mxu0 %v5601_v9 }
0x1eab   :  { %v6047_v43 = vpop.eup %6046  ;;  %5604 = vmatpush3.bf16.msra.mxu0 %v5601_v9 }
0x1eac   :  { %v2865_v26 = vmul.f32 %v6047_v43, %v7180_v17  ;;  %v2875_v52 = vadd.f32 %v4385_v61, %v2869_v46  ;;  %v2904_v17 = vpop.permute.xlu0 %2903 }
0x1ead   :  { %v2907_v5 = vsel %vm7761_vm2, %v2904_v17, %v2906_v6  ;;  %vm7786_vm2 = vmmov %vm7782_vm0 }
0x1eae   :  { %v2870_v38 = vmul.f32 %v2867_v2, %v2865_v26  ;;  %5117 = vmatprep.mubr.msk.f32.mxu1 %vm7772_vm7, %v2875_v52  ;;  %vm7784_vm7 = vmmov %vm7782_vm0 }
0x1eb0   :  { %v2876_v36 = vadd.f32 %v4385_v61, %v2870_v38 }
0x1eb2   :  { %5118 = vmatmul.mubr.msk.f32.vlgmr.msra.gmra.mrb[32].mxu1 %vm7773_vm15, %v2876_v36  ;;  %vm7785_vm15 = vmmov %vm7782_vm0 }
0x1eb3   :  { %5608 = vmatpush3.bf16.msra.mxu1 %v5605_v50 }
0x1eb4   :  { %5610 = vmatprep.subr.bf16.mxu1 %v5609_v45 }
0x1eb7   :  { %5612 = vmatpush3.bf16.msra.mxu1 %v5609_v45 }
0x1f85   :  { %v5119_v12 = vpop.f32.mrb[32].mxu1 }
0x1f86   :  { %v2987_v15 = vadd.f32 %v5119_v12, %v2907_v5  ;;  %v2981_v40 = vpop.f32.mrb[33].mxu1 }
0x1f87   :  { %v2982_v42 = vadd.f32 %v2981_v40, %v2907_v5 }
0x1f88   :  { %v2991_v14 = vmax.f32 %v2987_v15, 0.0 }
0x1f89   :  { %v2990_v41 = vmax.f32 %v2982_v42, 0.0 }
0x1f8b   :  { %5152 = vmatprep.mubr.f32.mxu0 %v2990_v41 }
0x1f8c   :  { %5153 = vmatmul.mubr.f32.vlgmr.msra.gmra.mrb[38].mxu0 %v2991_v14 }
0x205f   :  { %v5154_v47 = vpop.f32.mrb[38].mxu0 }
0x2060   :  { %v3085_v32 = vadd.f32 %v5154_v47, %v7169_v30  ;;  %v3075_v22 = vpop.f32.mrb[39].mxu0 }
0x2061   :  { %v3084_v53 = vadd.f32 %v3075_v22, %v7171_v33 }
0x2062   :  { %v7271_v57 = vadd.f32 %v3088_v7, %v3085_v32 }
0x2063   :  { %v7273_v21 = vadd.f32 %v3088_v7, %v3084_v53 }
0x2064   :  { %v3096_v24 = vsel %vm7774_vm5, %v7271_v57, 0.0  ;;  %vm7787_vm5 = vmmov %vm7782_vm0 }
0x2065   :  { %3097 = vadd.xlane.f32.xlu1 %v3096_v24  ;;  %v3093_v59 = vsel %vm7775_vm10, %v7273_v21, 0.0 }
0x2066   :  { %3094 = vadd.xlane.f32.xlu0 %v3093_v59 }
0x2076   :  { %3126 = vrot.lane.b32.xlu1 %v7282_v0, %s6094_s25 }
0x20f2   :  { %v3098_v30 = vpop.xlane.xlu1 %3097 }
0x20f3   :  { %v3100_v33 = vmul.f32 0.03125, %v3098_v30  ;;  %v3095_v60 = vpop.xlane.xlu0 %3094 }
0x20f4   :  { %v3099_v55 = vmul.f32 0.03125, %v3095_v60 }
0x20f5   :  { %v3102_v61 = vsub.f32 %v7271_v57, %v3100_v33 }
0x20f6   :  { %v3101_v16 = vsub.f32 %v7273_v21, %v3099_v55  ;;  %v3127_v46 = vpop.permute.xlu1 %3126 }
0x20f7   :  { %v3104_v48 = vmul.f32 %v3102_v61, %v3102_v61 }
0x20f8   :  { %v3103_v8 = vmul.f32 %v3101_v16, %v3101_v16 }
0x20f9   :  { %v3108_v28 = vsel %vm7777_vm14, %v3104_v48, 0.0 }
0x20fa   :  { %v3105_v49 = vsel %vm7776_vm9, %v3103_v8, 0.0 }
0x20fb   :  { %3106 = vadd.xlane.f32.xlu0 %v3105_v49 }
0x20ff   :  { %3109 = vadd.xlane.f32.xlu0 %v3108_v28 }
0x2188   :  { %v3107_v25 = vpop.xlane.xlu0 %3106 }
0x2189   :  { %v3111_v23 = vmul.f32 0.03125, %v3107_v25 }
0x218b   :  { %v3113_v19 = vadd.f32 1e-05, %v3111_v23 }
0x218c   :  { %v3110_v34 = vpop.xlane.xlu0 %3109 }
0x218d   :  { %6048 = vrsqrt.f32 %v3113_v19  ;;  %v3112_v37 = vmul.f32 0.03125, %v3110_v34 }
0x218f   :  { %v3114_v27 = vadd.f32 1e-05, %v3112_v37 }
0x2191   :  { %6050 = vrsqrt.f32 %v3114_v27 }
0x2197   :  { %v6049_v2 = vpop.eup %6048 }
0x2198   :  { %v3117_v29 = vmul.f32 %v6049_v2, %v3101_v16 }
0x219a   :  { %v3123_v43 = vmul.f32 %v7282_v0, %v3117_v29 }
0x219b   :  { %v6051_v26 = vpop.eup %6050 }
0x219c   :  { %v3118_v52 = vmul.f32 %v6051_v26, %v3102_v61  ;;  %v3129_v38 = vadd.f32 %v3127_v46, %v3123_v43 }
0x219e   :  { %v3124_v36 = vmul.f32 %v7282_v0, %v3118_v52  ;;  %5163 = vmatprep.mubr.msk.f32.mxu1 %vm7778_vm11, %v3129_v38 }
0x21a0   :  { %v3130_v39 = vadd.f32 %v3127_v46, %v3124_v36 }
0x21a2   :  { %5164 = vmatmul.mubr.msk.f32.vlgmr.msra.gmra.mrb[34].mxu1 %vm7779_vm6, %v3130_v39 }
0x2275   :  { %v5165_v58 = vpop.f32.mrb[34].mxu1 }
0x2276   :  { %3221 = vrot.lane.b32.xlu1 %v5165_v58, %s6096_s12  ;;  %v3208_v9 = vpop.f32.mrb[35].mxu1 }
0x2277   :  { %3219 = vrot.lane.b32.xlu0 %v3208_v9, %s6096_s12  ;;  %5182 = vmatprep.mubr.msk.f32.mxu1 %vm7780_vm8, %v3208_v9  ;;  %v7321_v6 = vpack.i.bf16 %v5165_v58, %v3208_v9 }
0x227a   :  { %3223 = vrot.lane.b32.xlu1 %v3208_v9, %s6095_s11 }
0x227b   :  { %3225 = vrot.lane.b32.xlu0 %v5165_v58, %s6095_s11 }
0x227e   :  { %3227 = vrot.lane.b32.xlu1 %v3208_v9, %s6097_s13 }
0x227f   :  { %3229 = vrot.lane.b32.xlu0 %v5165_v58, %s6097_s13 }
0x2282   :  { %5879 = vrot.lane.b32.xlu1 %v7321_v6, %s6094_s25 }
0x22e8   :  { %v3222_v17 = vpop.permute.xlu1 %3221 }
0x22e9   :  { %v3220_v5 = vpop.permute.xlu0 %3219 }
0x22ea   :  { %v7329_v12 = vpack.i.bf16 %v3222_v17, %v3220_v5 }
0x22ec   :  { %v3224_v15 = vpop.permute.xlu1 %3223  ;;  %5884 = vrot.lane.b32.xlu0 %v7329_v12, %s6094_s25 }
0x22ed   :  { %v3226_v40 = vpop.permute.xlu0 %3225 }
0x22ee   :  { %v7333_v42 = vpack.i.bf16 %v3226_v40, %v3224_v15 }
0x22f0   :  { %v3228_v41 = vpop.permute.xlu1 %3227  ;;  %5889 = vrot.lane.b32.xlu1 %v7333_v42, %s6094_s25 }
0x22f1   :  { %v3230_v14 = vpop.permute.xlu0 %3229 }
0x22f2   :  { %v7337_v47 = vpack.i.bf16 %v3230_v14, %v3228_v41 }
0x22f4   :  { %v5880_v7 = vpop.permute.xlu1 %5879  ;;  %5894 = vrot.lane.b32.xlu0 %v7337_v47, %s6094_s25 }
0x22f5   :  { %v5882_v32 = vunpack.i.h.bf16 %v5880_v7  ;;  %v5881_v22 = vunpack.i.l.bf16 %v5880_v7 }
0x22f7   :  { %v5613_v53 = vpack.c.bf16 %v5882_v32, %v5881_v22 }
0x22f9   :  { %5615 = vmatprep.subr.msk.bf16.mxu1 %vm7687_vm4, %v5613_v53 }
0x22fa   :  { %5618 = vmatpush3.bf16.xpose.msk.msra.mxu1 %vm7687_vm4, %v5613_v53 }
0x235e   :  { %v5885_v24 = vpop.permute.xlu0 %5884 }
0x235f   :  { %v5887_v59 = vunpack.i.h.bf16 %v5885_v24  ;;  %v5886_v30 = vunpack.i.l.bf16 %v5885_v24 }
0x2361   :  { %v5619_v33 = vpack.c.bf16 %v5887_v59, %v5886_v30 }
0x2362   :  { %v5890_v60 = vpop.permute.xlu1 %5889 }
0x2363   :  { %v5892_v55 = vunpack.i.h.bf16 %v5890_v60  ;;  %v5891_v61 = vunpack.i.l.bf16 %v5890_v60  ;;  %5621 = vmatprep.subr.msk.bf16.mxu1 %vm7687_vm4, %v5619_v33 }
0x2364   :  { %5624 = vmatpush3.bf16.xpose.msk.msra.mxu1 %vm7687_vm4, %v5619_v33 }
0x2365   :  { %v5625_v16 = vpack.c.bf16 %v5892_v55, %v5891_v61 }
0x2366   :  { %v5895_v8 = vpop.permute.xlu0 %5894 }
0x2367   :  { %v5897_v49 = vunpack.i.h.bf16 %v5895_v8  ;;  %v5896_v48 = vunpack.i.l.bf16 %v5895_v8  ;;  %5627 = vmatprep.subr.msk.bf16.mxu1 %vm7687_vm4, %v5625_v16 }
0x2369   :  { %v5631_v28 = vpack.c.bf16 %v5897_v49, %v5896_v48 }
0x236c   :  { %5630 = vmatpush3.bf16.xpose.msk.msra.mxu1 %vm7687_vm4, %v5625_v16 }
0x236d   :  { %5633 = vmatprep.subr.msk.bf16.mxu1 %vm7687_vm4, %v5631_v28 }
0x2374   :  { %5636 = vmatpush3.bf16.xpose.msk.msra.mxu1 %vm7687_vm4, %v5631_v28  ;;  %vm7788_vm4 = vcmask 523264  }
0x2375   :  { %vm7789_vm10 = vmmov %vm7788_vm4 }
0x2376   :  { %vm7790_vm9 = vmmov %vm7788_vm4 }
0x2377   :  { %vm7791_vm14 = vmmov %vm7788_vm4 }
0x2378   :  { %vm7792_vm11 = vmmov %vm7788_vm4 }
0x2379   :  { %vm7793_vm6 = vmmov %vm7788_vm4 }
0x237a   :  { %vm7794_vm8 = vmmov %vm7788_vm4 }
0x237b   :  { %5183 = vmatmul.mubr.msk.f32.vlgmr.msra.gmra.mrb[36].mxu1 %vm7781_vm12, %v5165_v58  ;;  %vm7795_vm12 = vmmov %vm7788_vm4 }
0x237c   :  { %5185 = vmatprep.mubr.msk.f32.mxu1 %vm7782_vm0, %v3220_v5  ;;  %vm7796_vm0 = vmmov %vm7788_vm4 }
0x237f   :  { %5186 = vmatmul.mubr.msk.f32.gmra.mrb[38].mxu1 %vm7783_vm3, %v3222_v17  ;;  %vm7797_vm3 = vmmov %vm7796_vm0 }
0x2380   :  { %5188 = vmatprep.mubr.msk.f32.mxu1 %vm7784_vm7, %v3224_v15  ;;  %vm7798_vm7 = vmmov %vm7796_vm0 }
0x2383   :  { %5189 = vmatmul.mubr.msk.f32.gmra.mrb[40].mxu1 %vm7785_vm15, %v3226_v40  ;;  %vm7799_vm15 = vmmov %vm7796_vm0 }
0x2384   :  { %5191 = vmatprep.mubr.msk.f32.mxu1 %vm7786_vm2, %v3228_v41  ;;  %vm7800_vm2 = vmmov %vm7796_vm0 }
0x2387   :  { %5192 = vmatmul.mubr.msk.f32.gmra.mrb[42].mxu1 %vm7787_vm5, %v3230_v14  ;;  %vm7801_vm5 = vmmov %vm7796_vm0 }
0x244e   :  { %v5184_v50 = vpop.f32.mrb[36].mxu1 }
0x244f   :  { %v3351_v45 = vadd.f32 %v5184_v50, %v6384_v31  ;;  %v3345_v25 = vpop.f32.mrb[37].mxu1 }
0x2450   :  { %v3346_v13 = vadd.f32 %v3345_v25, %v6391_v35 }
0x2451   :  { %v3387_v23 = vsel %vm7788_vm4, %v3351_v45, -inf  ;;  %vm7802_vm4 = vmmov %vm7796_vm0 }
0x2452   :  { %3388 = vmax.xlane.f32.xlu0 %v3387_v23  ;;  %v5187_v19 = vpop.f32.mrb[38].mxu1  ;;  %v3384_v34 = vsel %vm7789_vm10, %v3346_v13, -inf  ;;  %vm7803_vm10 = vmmov %vm7796_vm0 }
0x2453   :  { %v3361_v37 = vadd.f32 %v5187_v19, %v6427_v54  ;;  %v3355_v27 = vpop.f32.mrb[39].mxu1  ;;  %3385 = vmax.xlane.f32.xlu1 %v3384_v34 }
0x2454   :  { %v3356_v2 = vadd.f32 %v3355_v27, %v6441_v56 }
0x2455   :  { %v3393_v29 = vsel %vm7790_vm9, %v3361_v37, -inf  ;;  %vm7804_vm9 = vmmov %vm7796_vm0 }
0x2456   :  { %v5190_v46 = vpop.f32.mrb[40].mxu1  ;;  %v3390_v31 = vsel %vm7791_vm14, %v3356_v2, -inf  ;;  %vm7805_vm14 = vmmov %vm7796_vm0 }
0x2457   :  { %v3371_v43 = vadd.f32 %v5190_v46, %v6475_v63  ;;  %v3365_v35 = vpop.f32.mrb[41].mxu1  ;;  %3391 = vmax.xlane.f32.xlu0 %v3390_v31  ;;  %3394 = vmax.xlane.f32.xlu1 %v3393_v29 }
0x2458   :  { %v3366_v26 = vadd.f32 %v3365_v35, %v6477_v1 }
0x2459   :  { %v3399_v52 = vsel %vm7792_vm11, %v3371_v43, -inf  ;;  %vm7806_vm11 = vmmov %vm7796_vm0 }
0x245a   :  { %v5193_v38 = vpop.f32.mrb[42].mxu1  ;;  %v3396_v54 = vsel %vm7793_vm6, %v3366_v26, -inf  ;;  %vm7807_vm6 = vmmov %vm7796_vm0 }
0x245b   :  { %v3381_v36 = vadd.f32 %v5193_v38, %v6491_v10  ;;  %v3375_v56 = vpop.f32.mrb[43].mxu1  ;;  %3397 = vmax.xlane.f32.xlu0 %v3396_v54  ;;  %3400 = vmax.xlane.f32.xlu1 %v3399_v52 }
0x245c   :  { %v3376_v39 = vadd.f32 %v3375_v56, %v6493_v11  ;;  %v5918_v56 = vpack.i.bf16 %v7298_v44, %v7293_v62 }
0x245d   :  { %v3405_v58 = vsel %vm7794_vm8, %v3381_v36, -inf  ;;  %vm7808_vm8 = vmmov %vm7796_vm0 }
0x245e   :  { %v3402_v63 = vsel %vm7795_vm12, %v3376_v39, -inf  ;;  %vm7809_vm12 = vmmov %vm7796_vm0 }
0x245f   :  { %3403 = vmax.xlane.f32.xlu0 %v3402_v63  ;;  %3406 = vmax.xlane.f32.xlu1 %v3405_v58 }
0x2470   :  { %5904 = vrot.lane.b32.xlu1 %v7329_v12, %s6099_s14 }
0x2475   :  { %5899 = vrot.lane.b32.xlu0 %v7321_v6, %s6099_s14 }
0x24df   :  { %v3389_v1 = vpop.xlane.xlu0 %3388 }
0x24e0   :  { %v3409_v9 = vsub.f32 %v3351_v45, %v3389_v1  ;;  %v3386_v10 = vpop.xlane.xlu1 %3385 }
0x24e1   :  { %v3408_v17 = vsub.f32 %v3346_v13, %v3386_v10 }
0x24e2   :  { %v3418_v5 = vmul.f32 1.442695, %v3409_v9 }
0x24e3   :  { %v3416_v15 = vmul.f32 1.442695, %v3408_v17 }
0x24e4   :  { %6052 = vpow2.f32 %v3418_v5  ;;  %v3392_v11 = vpop.xlane.xlu0 %3391  ;;  %v3395_v40 = vpop.xlane.xlu1 %3394 }
0x24e5   :  { %6054 = vpow2.f32 %v3416_v15  ;;  %v3410_v41 = vsub.f32 %v3356_v2, %v3392_v11  ;;  %v3411_v14 = vsub.f32 %v3361_v37, %v3395_v40 }
0x24e7   :  { %v3420_v7 = vmul.f32 1.442695, %v3410_v41  ;;  %v3422_v32 = vmul.f32 1.442695, %v3411_v14 }
0x24e8   :  { %v3398_v22 = vpop.xlane.xlu0 %3397  ;;  %v3401_v53 = vpop.xlane.xlu1 %3400 }
0x24e9   :  { %6056 = vpow2.f32 %v3420_v7  ;;  %v3412_v12 = vsub.f32 %v3366_v26, %v3398_v22  ;;  %v3413_v24 = vsub.f32 %v3371_v43, %v3401_v53 }
0x24ea   :  { %6058 = vpow2.f32 %v3422_v32 }
0x24eb   :  { %v3424_v6 = vmul.f32 1.442695, %v3412_v12  ;;  %v3426_v59 = vmul.f32 1.442695, %v3413_v24 }
0x24ec   :  { %v3404_v30 = vpop.xlane.xlu0 %3403  ;;  %v3407_v33 = vpop.xlane.xlu1 %3406 }
0x24ed   :  { %6060 = vpow2.f32 %v3424_v6  ;;  %v3414_v60 = vsub.f32 %v3376_v39, %v3404_v30  ;;  %v3415_v55 = vsub.f32 %v3381_v36, %v3407_v33 }
0x24ee   :  { %v7384_v61 = vpop.eup %6052  ;;  %6062 = vpow2.f32 %v3426_v59 }
0x24ef   :  { %v7386_v16 = vpop.eup %6054  ;;  %v3428_v8 = vmul.f32 1.442695, %v3414_v60  ;;  %v3430_v49 = vmul.f32 1.442695, %v3415_v55  ;;  %v3435_v48 = vsel %vm7796_vm0, %v7384_v61, 0.0 }
0x24f0   :  { %v5900_v28 = vpop.permute.xlu0 %5899  ;;  %3436 = vadd.xlane.f32.xlu1 %v3435_v48  ;;  %v5905_v50 = vpop.permute.xlu1 %5904  ;;  %v3432_v45 = vsel %vm7797_vm3, %v7386_v16, 0.0  ;;  %vm7810_vm3 = vmmov %vm7796_vm0 }
0x24f1   :  { %6064 = vpow2.f32 %v3428_v8  ;;  %v5902_v25 = vunpack.i.h.bf16 %v5900_v28  ;;  %v5901_v13 = vunpack.i.l.bf16 %v5900_v28  ;;  %v5907_v23 = vunpack.i.h.bf16 %v5905_v50  ;;  %3433 = vadd.xlane.f32.xlu0 %v3432_v45 }
0x24f2   :  { %6066 = vpow2.f32 %v3430_v49  ;;  %v5906_v19 = vunpack.i.l.bf16 %v5905_v50 }
0x24f3   :  { %v7392_v34 = vpop.eup %6056  ;;  %v5637_v37 = vpack.c.bf16 %v5902_v25, %v5901_v13 }
0x24f4   :  { %v7394_v27 = vpop.eup %6058  ;;  %v3438_v2 = vsel %vm7798_vm7, %v7392_v34, 0.0  ;;  %v5641_v29 = vpack.c.bf16 %v5907_v23, %v5906_v19  ;;  %vm7811_vm7 = vcmask 64512  }
0x24f5   :  { %5638 = vmatprep.subr.bf16.mxu0 %v5637_v37  ;;  %3439 = vadd.xlane.f32.xlu0 %v3438_v2  ;;  %v3441_v46 = vsel %vm7799_vm15, %v7394_v27, 0.0  ;;  %vm7812_vm15 = vmmov %vm7811_vm7 }
0x24f6   :  { %3442 = vadd.xlane.f32.xlu1 %v3441_v46  ;;  %5640 = vmatpush3.bf16.msra.mxu0 %v5637_v37 }
0x24f7   :  { %v7400_v31 = vpop.eup %6060  ;;  %5642 = vmatprep.subr.bf16.mxu0 %v5641_v29 }
0x24f8   :  { %v7402_v43 = vpop.eup %6062  ;;  %v3444_v35 = vsel %vm7800_vm2, %v7400_v31, 0.0  ;;  %vm7813_vm2 = vcmask 261120  }
0x24f9   :  { %3445 = vadd.xlane.f32.xlu0 %v3444_v35  ;;  %v3447_v26 = vsel %vm7801_vm5, %v7402_v43, 0.0  ;;  %vm7814_vm5 = vmmov %vm7813_vm2 }
0x24fa   :  { %3448 = vadd.xlane.f32.xlu1 %v3447_v26  ;;  %5644 = vmatpush3.bf16.msra.mxu0 %v5641_v29 }
0x24fb   :  { %v7408_v52 = vpop.eup %6064 }
0x24fc   :  { %v7410_v38 = vpop.eup %6066  ;;  %v3450_v54 = vsel %vm7802_vm4, %v7408_v52, 0.0 }
0x24fd   :  { %3451 = vadd.xlane.f32.xlu0 %v3450_v54  ;;  %v3453_v36 = vsel %vm7803_vm10, %v7410_v38, 0.0 }
0x24fe   :  { %3454 = vadd.xlane.f32.xlu1 %v3453_v36 }
0x250f   :  { %5909 = vrot.lane.b32.xlu1 %v7333_v42, %s6099_s14 }
0x2513   :  { %5914 = vrot.lane.b32.xlu0 %v7337_v47, %s6099_s14  ;;  %5919 = vrot.lane.b32.xlu1 %v5918_v56, %s6100_s15 }
0x257d   :  { %v3437_v39 = vpop.xlane.xlu1 %3436 }
0x257e   :  { %v3434_v58 = vpop.xlane.xlu0 %3433 }
0x257f   :  { %6068 = vrcp.f32 %v3434_v58 }
0x2580   :  { %6070 = vrcp.f32 %v3437_v39 }
0x2582   :  { %v3440_v63 = vpop.xlane.xlu0 %3439 }
0x2583   :  { %6072 = vrcp.f32 %v3440_v63  ;;  %v3443_v1 = vpop.xlane.xlu1 %3442 }
0x2584   :  { %6074 = vrcp.f32 %v3443_v1 }
0x2586   :  { %v3446_v9 = vpop.xlane.xlu0 %3445 }
0x2587   :  { %6076 = vrcp.f32 %v3446_v9  ;;  %v3449_v10 = vpop.xlane.xlu1 %3448 }
0x2588   :  { %6078 = vrcp.f32 %v3449_v10 }
0x2589   :  { %v6069_v42 = vpop.eup %6068 }
0x258a   :  { %v3464_v17 = vmul.f32 %v6069_v42, %v3434_v58  ;;  %v3452_v47 = vpop.xlane.xlu0 %3451  ;;  %v6071_v5 = vpop.eup %6070 }
0x258b   :  { %6080 = vrcp.f32 %v3452_v47  ;;  %v3455_v62 = vpop.xlane.xlu1 %3454  ;;  %v3465_v11 = vmul.f32 %v6071_v5, %v3437_v39 }
0x258c   :  { %v3472_v44 = vsub.f32 2.0, %v3464_v17  ;;  %6082 = vrcp.f32 %v3455_v62 }
0x258d   :  { %v6073_v15 = vpop.eup %6072  ;;  %v3473_v30 = vsub.f32 2.0, %v3465_v11 }
0x258e   :  { %v3480_v40 = vmul.f32 %v6069_v42, %v3472_v44  ;;  %v5915_v41 = vpop.permute.xlu0 %5914  ;;  %v6075_v14 = vpop.eup %6074  ;;  %v3466_v7 = vmul.f32 %v6073_v15, %v3440_v63 }
0x258f   :  { %v5917_v32 = vunpack.i.h.bf16 %v5915_v41  ;;  %v5910_v22 = vpop.permute.xlu1 %5909  ;;  %v5916_v12 = vunpack.i.l.bf16 %v5915_v41  ;;  %v3467_v33 = vmul.f32 %v6075_v14, %v3443_v1  ;;  %v3481_v50 = vmul.f32 %v6071_v5, %v3473_v30 }
0x2590   :  { %v3488_v53 = vmul.f32 %v7386_v16, %v3480_v40  ;;  %v5912_v24 = vunpack.i.h.bf16 %v5910_v22  ;;  %v5911_v6 = vunpack.i.l.bf16 %v5910_v22  ;;  %v3474_v8 = vsub.f32 2.0, %v3466_v7 }
0x2591   :  { %v6077_v59 = vpop.eup %6076  ;;  %v5649_v48 = vpack.c.bf16 %v5917_v32, %v5916_v12  ;;  %v3475_v45 = vsub.f32 2.0, %v3467_v33  ;;  %v3489_v37 = vmul.f32 %v7384_v61, %v3481_v50 }
0x2592   :  { %v5645_v60 = vpack.c.bf16 %v5912_v24, %v5911_v6  ;;  %5210 = vmatprep.mubr.msk.f32.mxu0 %vm7804_vm9, %v3488_v53  ;;  %v6079_v55 = vpop.eup %6078  ;;  %v3468_v49 = vmul.f32 %v6077_v59, %v3446_v9  ;;  %v3482_v13 = vmul.f32 %v6073_v15, %v3474_v8 }
0x2593   :  { %v3469_v25 = vmul.f32 %v6079_v55, %v3449_v10  ;;  %v3483_v2 = vmul.f32 %v6075_v14, %v3475_v45  ;;  %v5920_v9 = vpop.permute.xlu1 %5919 }
0x2594   :  { %5646 = vmatprep.subr.bf16.mxu0 %v5645_v60  ;;  %v3476_v23 = vsub.f32 2.0, %v3468_v49  ;;  %v3490_v35 = vmul.f32 %v7392_v34, %v3482_v13  ;;  %v5922_v10 = vunpack.i.h.bf16 %v5920_v9  ;;  %v5921_v42 = vunpack.i.l.bf16 %v5920_v9 }
0x2595   :  { %v6081_v28 = vpop.eup %6080  ;;  %5648 = vmatpush3.bf16.msra.mxu0 %v5645_v60  ;;  %v3477_v29 = vsub.f32 2.0, %v3469_v25  ;;  %v3491_v36 = vmul.f32 %v7394_v27, %v3483_v2 }
0x2596   :  { %5650 = vmatprep.subr.bf16.mxu0 %v5649_v48  ;;  %v6083_v16 = vpop.eup %6082  ;;  %v3470_v19 = vmul.f32 %v6081_v28, %v3452_v47  ;;  %v3484_v26 = vmul.f32 %v6077_v59, %v3476_v23 }
0x2597   :  { %v3471_v46 = vmul.f32 %v6083_v16, %v3455_v62  ;;  %v3485_v56 = vmul.f32 %v6079_v55, %v3477_v29 }
0x2598   :  { %v3478_v54 = vsub.f32 2.0, %v3470_v19  ;;  %v3492_v58 = vmul.f32 %v7400_v31, %v3484_v26  ;;  %v5923_v31 = vpack.i.bf16 %v7310_v20, %v7305_v4  ;;  %v4449_v26 = vld [vmem:[%s7597_s3 + $0xe8] sm:$0xff] }
0x2599   :  { %5652 = vmatpush3.bf16.msra.mxu0 %v5649_v48  ;;  %v3479_v39 = vsub.f32 2.0, %v3471_v46  ;;  %v3493_v61 = vmul.f32 %v7402_v43, %v3485_v56  ;;  %v5653_v43 = vpack.c.bf16 %v5922_v10, %v5921_v42  ;;  %v4447_v46 = vld [vmem:[%s7597_s3 + $0xc8] sm:$0xff]  ;;  %v4457_v10 = vld [vmem:[%s7598_s4 + $0x1a0] sm:$0xff] }
0x259a   :  { %v3486_v63 = vmul.f32 %v6081_v28, %v3478_v54  ;;  %5924 = vrot.lane.b32.xlu0 %v5923_v31, %s6100_s15  ;;  %v4456_v31 = vld [vmem:[%s7598_s4 + $0x198] sm:$0xff] }
0x259b   :  { %v3487_v34 = vmul.f32 %v6083_v16, %v3479_v39  ;;  %5654 = vmatprep.subr.bf16.mxu1 %v5653_v43  ;;  %v3835_v39 = vld [vmem:[%s7596_s2 + $0x7] sm:$0x11] }
0x259c   :  { %5211 = vmatmul.mubr.msk.f32.vlgmr.msra.gmra.mrb[40].mxu0 %vm7805_vm14, %v3489_v37  ;;  %v3494_v1 = vmul.f32 %v7408_v52, %v3486_v63  ;;  %5656 = vmatpush3.bf16.msra.mxu1 %v5653_v43  ;;  %v4454_v63 = vld [vmem:[%s7598_s4 + $0x188] sm:$0xff] }
0x259d   :  { %5213 = vmatprep.mubr.msk.f32.mxu0 %vm7806_vm11, %v3490_v35  ;;  %v3495_v27 = vmul.f32 %v7410_v38, %v3487_v34  ;;  %v4448_v35 = vld [vmem:[%s7597_s3 + $0xd8] sm:$0xff]  ;;  %v3840_v34 = vrot.slane %v3835_v39, %v6619_v3  ;;  %vm7821_vm11 = vmmov %vm7796_vm0 }
0x259e   :  { %v5661_v54 = vpack.c.bf16 %v4448_v35, %v4447_v46 }
0x259f   :  { %v3850_v43 = vrot.slane %v3840_v34, %v6619_v3 }
0x25a0   :  { %5214 = vmatmul.mubr.msk.f32.gmra.mrb[42].mxu0 %vm7807_vm6, %v3491_v36  ;;  %v4450_v36 = vld [vmem:[%s7597_s3 + $0xf8] sm:$0xff]  ;;  %5662 = vmatprep.subr.bf16.mxu0 %v5661_v54 }
0x25a1   :  { %5216 = vmatprep.mubr.msk.f32.mxu0 %vm7808_vm8, %v3492_v58  ;;  %v5665_v56 = vpack.c.bf16 %v4450_v36, %v4449_v26  ;;  %5664 = vmatpush3.bf16.msra.mxu0 %v5661_v54  ;;  %v4453_v58 = vld [vmem:[%s7598_s4 + $0x180] sm:$0xff] }
0x25a3   :  { %5666 = vmatprep.subr.bf16.mxu0 %v5665_v56 }
0x25a4   :  { %5217 = vmatmul.mubr.msk.f32.gmra.mrb[44].mxu0 %vm7809_vm12, %v3493_v61  ;;  %v3844_v61 = vrot.slane %v3835_v39, %v6622_v51  ;;  %v4458_v51 = vld [vmem:[%s7598_s4 + $0x1a8] sm:$0xff] }
0x25a5   :  { %5219 = vmatprep.mubr.msk.f32.mxu0 %vm7796_vm0, %v3494_v1  ;;  %5668 = vmatpush3.bf16.msra.mxu0 %v5665_v56  ;;  %v5669_v1 = vpack.c.bf16 %v4454_v63, %v4453_v58  ;;  %v4469_v63 = vld [vmem:[%s7599_s5] ss:$0 sm:$0xff] }
0x25a6   :  { %v3854_v42 = vrot.slane %v3844_v61, %v6619_v3  ;;  %v4446_v3 = vld [vmem:[%s7596_s2 + $0x7] ss:$0 sm:$0xff] }
0x25a8   :  { %5220 = vmatmul.mubr.msk.f32.gmra.mrb[46].mxu0 %vm7810_vm3, %v3495_v27  ;;  %v4455_v27 = vld [vmem:[%s7598_s4 + $0x190] sm:$0xff]  ;;  %vm6105_vm3 = vmmov 0  }
0x25a9   :  { %v5673_v9 = vpack.c.bf16 %v4456_v31, %v4455_v27 }
0x260c   :  { %v5925_v52 = vpop.permute.xlu0 %5924 }
0x260d   :  { %v5927_v17 = vunpack.i.h.bf16 %v5925_v52  ;;  %v5926_v47 = vunpack.i.l.bf16 %v5925_v52  ;;  %v5677_v52 = vpack.c.bf16 %v4458_v51, %v4457_v10 }
0x260f   :  { %v5657_v5 = vpack.c.bf16 %v5927_v17, %v5926_v47  ;;  %v4459_v17 = vld [vmem:[%s7598_s4 + $0x1b0] sm:$0xff]  ;;  %v4460_v47 = vld [vmem:[%s7598_s4 + $0x1b8] sm:$0xff] }
0x2611   :  { %5658 = vmatprep.subr.bf16.mxu1 %v5657_v5 }
0x2612   :  { %5660 = vmatpush3.bf16.msra.mxu1 %v5657_v5  ;;  %v5681_v5 = vpack.c.bf16 %v4460_v47, %v4459_v17  ;;  %v4088_v17 = vld [vmem:[%s7600_s6 + $0x10] sm:$0xff] }
0x2613   :  { %5670 = vmatprep.subr.bf16.mxu1 %v5669_v1 }
0x266f   :  { %v5212_v38 = vpop.f32.mrb[40].mxu0 }
0x2670   :  { %v3610_v62 = vpop.f32.mrb[41].mxu0 }
0x2673   :  { %v5215_v44 = vpop.f32.mrb[42].mxu0 }
0x2674   :  { %3653 = vrot.lane.b32.xlu0 %v5215_v44, %s6101_s16  ;;  %v3620_v4 = vpop.f32.mrb[43].mxu0 }
0x2675   :  { %3651 = vrot.lane.b32.xlu1 %v3620_v4, %s6101_s16  ;;  %v4463_v4 = vld [vmem:[%s7598_s4 + $0x1d0] sm:$0xff] }
0x2677   :  { %v5218_v20 = vpop.f32.mrb[44].mxu0 }
0x2678   :  { %3661 = vrot.lane.b32.xlu0 %v5218_v20, %s6102_s17  ;;  %v3630_v15 = vpop.f32.mrb[45].mxu0  ;;  %v4464_v20 = vld [vmem:[%s7598_s4 + $0x1d8] sm:$0xff] }
0x2679   :  { %3659 = vrot.lane.b32.xlu1 %v3630_v15, %s6102_s17  ;;  %v5689_v15 = vpack.c.bf16 %v4464_v20, %v4463_v4 }
0x267b   :  { %v5221_v11 = vpop.f32.mrb[46].mxu0 }
0x267c   :  { %3669 = vrot.lane.b32.xlu0 %v5221_v11, %s6103_s18  ;;  %v3640_v40 = vpop.f32.mrb[47].mxu0  ;;  %v4465_v11 = vld [vmem:[%s7598_s4 + $0x1e0] sm:$0xff] }
0x267d   :  { %3667 = vrot.lane.b32.xlu1 %v3640_v40, %s6103_s18  ;;  %v4466_v40 = vld [vmem:[%s7598_s4 + $0x1e8] sm:$0xff] }
0x2681   :  { %3788 = vrot.lane.b32.xlu1 %v7282_v0, %s6099_s14 }
0x26e6   :  { %v3654_v41 = vpop.permute.xlu0 %3653 }
0x26e7   :  { %v3652_v14 = vpop.permute.xlu1 %3651  ;;  %v3674_v12 = vsel %vm7812_vm15, %v5212_v38, %v3654_v41  ;;  %v4461_v38 = vld [vmem:[%s7598_s4 + $0x1c0] sm:$0xff]  ;;  %v5693_v41 = vpack.c.bf16 %v4466_v40, %v4465_v11 }
0x26e8   :  { %v3673_v22 = vsel %vm7811_vm7, %v3610_v62, %v3652_v14  ;;  %v4462_v62 = vld [vmem:[%s7598_s4 + $0x1c8] sm:$0xff] }
0x26e9   :  { %v5685_v44 = vpack.c.bf16 %v4462_v62, %v4461_v38 }
0x26ea   :  { %v3662_v7 = vpop.permute.xlu0 %3661 }
0x26eb   :  { %v3660_v32 = vpop.permute.xlu1 %3659  ;;  %v3676_v59 = vsel %vm812_vm13, %v3674_v12, %v3662_v7 }
0x26ec   :  { %v3675_v24 = vsel %vm812_vm13, %v3673_v22, %v3660_v32  ;;  %vm7815_vm13 = vmmov %vm7813_vm2 }
0x26ee   :  { %v3670_v53 = vpop.permute.xlu0 %3669 }
0x26ef   :  { %v3668_v6 = vpop.permute.xlu1 %3667  ;;  %v3678_v33 = vsel %vm815_vm1, %v3676_v59, %v3670_v53 }
0x26f0   :  { %v3677_v30 = vsel %vm815_vm1, %v3675_v24, %v3668_v6  ;;  %vm7816_vm1 = vmmov %vm7813_vm2 }
0x26f1   :  { %5230 = vmatprep.mubr.msk.f32.mxu1 %vm7813_vm2, %v3677_v30  ;;  %vm7817_vm4 = vmmov %vm7816_vm1 }
0x26f2   :  { %5231 = vmatmul.mubr.msk.f32.vlgmr.msra.gmra.mrb[44].mxu1 %vm7814_vm5, %v3678_v33  ;;  %vm7818_vm10 = vmmov %vm7816_vm1 }
0x26f3   :  { %v3789_v55 = vpop.permute.xlu1 %3788  ;;  %5672 = vmatpush3.bf16.msra.mxu1 %v5669_v1  ;;  %vm7819_vm9 = vmmov %vm7816_vm1 }
0x26f4   :  { %5674 = vmatprep.subr.bf16.mxu1 %v5673_v9  ;;  %vm7820_vm14 = vmmov %vm7816_vm1 }
0x26f5   :  { %vm7822_vm6 = vmmov %vm7816_vm1 }
0x26f6   :  { %vm7823_vm8 = vmmov %vm7816_vm1 }
0x26f7   :  { %5676 = vmatpush3.bf16.msra.mxu1 %v5673_v9  ;;  %vm7824_vm12 = vmmov %vm7816_vm1 }
0x26f8   :  { %5678 = vmatprep.subr.bf16.mxu1 %v5677_v52  ;;  %vm7825_vm0 = vmmov %vm7816_vm1 }
0x26f9   :  { %vm7826_vm7 = vmmov %vm7825_vm0 }
0x26fa   :  { %vm7827_vm15 = vmmov %vm7825_vm0 }
0x26fb   :  { %5680 = vmatpush3.bf16.msra.mxu1 %v5677_v52  ;;  %v4087_v52 = vld [vmem:[%s7600_s6 + $0x8] sm:$0xff]  ;;  %vm7828_vm2 = vmmov %vm7821_vm11 }
0x26fc   :  { %5682 = vmatprep.subr.bf16.mxu1 %v5681_v5 }
0x26ff   :  { %5684 = vmatpush3.bf16.msra.mxu1 %v5681_v5 }
0x2700   :  { %5686 = vmatprep.subr.bf16.mxu1 %v5685_v44 }
0x2703   :  { %5688 = vmatpush3.bf16.msra.mxu1 %v5685_v44 }
0x2704   :  { %5690 = vmatprep.subr.bf16.mxu1 %v5689_v15 }
0x2707   :  { %5692 = vmatpush3.bf16.msra.mxu1 %v5689_v15 }
0x2708   :  { %5694 = vmatprep.subr.bf16.mxu1 %v5693_v41 }
0x270b   :  { %5696 = vmatpush3.bf16.msra.mxu1 %v5693_v41 }
0x27c5   :  { %v5232_v60 = vpop.f32.mrb[44].mxu1 }
0x27c6   :  { %v3781_v8 = vadd.f32 %v5232_v60, %v7271_v57  ;;  %v3771_v49 = vpop.f32.mrb[45].mxu1 }
0x27c7   :  { %v3780_v48 = vadd.f32 %v3771_v49, %v7273_v21 }
0x27c8   :  { %v7460_v28 = vadd.f32 %v3789_v55, %v3781_v8 }
0x27c9   :  { %v7462_v50 = vadd.f32 %v3789_v55, %v3780_v48  ;;  %v4467_v48 = vld [vmem:[%s7598_s4 + $0x1f0] sm:$0xff] }
0x27ca   :  { %v3797_v45 = vsel %vm7815_vm13, %v7460_v28, 0.0 }
0x27cb   :  { %3798 = vadd.xlane.f32.xlu1 %v3797_v45  ;;  %v3794_v25 = vsel %vm7816_vm1, %v7462_v50, 0.0  ;;  %v4468_v45 = vld [vmem:[%s7598_s4 + $0x1f8] sm:$0xff] }
0x27cc   :  { %3795 = vadd.xlane.f32.xlu0 %v3794_v25  ;;  %v5697_v25 = vpack.c.bf16 %v4468_v45, %v4467_v48 }
0x27ce   :  { %5698 = vmatprep.subr.bf16.mxu1 %v5697_v25 }
0x27cf   :  { %5700 = vmatpush3.bf16.msra.mxu1 %v5697_v25 }
0x27dc   :  { %3820 = vrot.lane.b32.xlu1 %v7282_v0, %s6100_s15 }
0x27e0   :  { %3859 = vrot.lane.b32.xlu1 %v3854_v42, %s6099_s14  ;;  %v6104_v42 = vmov 0.0|0.0  }
0x27e1   :  { %5701 = vmatprep.subr.bf16.mxu0 %v6104_v42 }
0x27e4   :  { %4041 = vrot.lane.b32.xlu1 %v4446_v3, %s6094_s25 }
0x2858   :  { %v3799_v16 = vpop.xlane.xlu1 %3798 }
0x2859   :  { %v3801_v57 = vmul.f32 0.03125, %v3799_v16  ;;  %v3796_v13 = vpop.xlane.xlu0 %3795 }
0x285a   :  { %v3800_v23 = vmul.f32 0.03125, %v3796_v13 }
0x285b   :  { %v7471_v21 = vsub.f32 %v7460_v28, %v3801_v57 }
0x285c   :  { %v7474_v19 = vsub.f32 %v7462_v50, %v3800_v23  ;;  %v3821_v6 = vpop.permute.xlu1 %3820 }
0x285d   :  { %v3805_v29 = vmul.f32 %v7471_v21, %v7471_v21 }
0x285e   :  { %v3804_v37 = vmul.f32 %v7474_v19, %v7474_v19 }
0x285f   :  { %v3809_v0 = vsel %vm7818_vm10, %v3805_v29, 0.0 }
0x2860   :  { %v3806_v2 = vsel %vm7817_vm4, %v3804_v37, 0.0  ;;  %v3860_v16 = vpop.permute.xlu1 %3859 }
0x2861   :  { %3807 = vadd.xlane.f32.xlu0 %v3806_v2 }
0x2864   :  { %v4042_v46 = vpop.permute.xlu1 %4041 }
0x2865   :  { %3810 = vadd.xlane.f32.xlu0 %v3809_v0 }
0x287b   :  { %3857 = vrot.lane.b32.xlu0 %v3850_v43, %s6099_s14  ;;  %v4086_v43 = vld [vmem:[%s7600_s6] sm:$0xff] }
0x287c   :  { %v5702_v47 = vpack.c.bf16 %v4087_v52, %v4086_v43 }
0x28ee   :  { %v3808_v14 = vpop.xlane.xlu0 %3807 }
0x28ef   :  { %v3812_v7 = vmul.f32 0.03125, %v3808_v14 }
0x28f1   :  { %v3814_v32 = vadd.f32 1e-05, %v3812_v7 }
0x28f2   :  { %v3811_v22 = vpop.xlane.xlu0 %3810 }
0x28f3   :  { %6084 = vrsqrt.f32 %v3814_v32  ;;  %v3813_v53 = vmul.f32 0.03125, %v3811_v22 }
0x28f5   :  { %v3815_v12 = vadd.f32 1e-05, %v3813_v53 }
0x28f6   :  { %v3858_v57 = vpop.permute.xlu0 %3857 }
0x28f7   :  { %6086 = vrsqrt.f32 %v3815_v12  ;;  %v3861_v13 = vsel %vm7821_vm11, %v3858_v57, %v3860_v16 }
0x28fd   :  { %v6085_v24 = vpop.eup %6084 }
0x28fe   :  { %v3818_v59 = vmul.f32 %v6085_v24, %v7474_v19 }
0x2900   :  { %v3823_v30 = vmul.f32 %v3821_v6, %v3818_v59 }
0x2901   :  { %v6087_v33 = vpop.eup %6086 }
0x2902   :  { %v3819_v60 = vmul.f32 %v6087_v33, %v7471_v21  ;;  %v3829_v55 = vadd.f32 %v4446_v3, %v3823_v30 }
0x2904   :  { %v3824_v8 = vmul.f32 %v3821_v6, %v3819_v60  ;;  %5241 = vmatprep.mubr.msk.f32.mxu0 %vm7819_vm9, %v3829_v55 }
0x2906   :  { %v3830_v49 = vadd.f32 %v4446_v3, %v3824_v8  ;;  %v4089_v3 = vld [vmem:[%s7600_s6 + $0x18] sm:$0xff] }
0x2907   :  { %v5705_v5 = vpack.c.bf16 %v4089_v3, %v4088_v17 }
0x2908   :  { %5242 = vmatmul.mubr.msk.f32.vlgmr.msra.gmra.mrb[48].mxu0 %vm7820_vm14, %v3830_v49 }
0x2909   :  { %5703 = vmatpush3.bf16.msra.mxu0 %v5702_v47  ;;  %5287 = vmatprep.mubr.msk.f32.mxu0 %vm6105_vm3, %v6093_v18 }
0x290a   :  { %5704 = vmatprep.subr.bf16.mxu0 %v6104_v42 }
0x290d   :  { %5706 = vmatpush3.bf16.msra.mxu0 %v5705_v5 }
0x290e   :  { %5707 = vmatprep.subr.bf16.mxu0 %v6104_v42 }
0x29db   :  { %v5243_v23 = vpop.f32.mrb[48].mxu0 }
0x29dc   :  { %v3941_v21 = vadd.f32 %v5243_v23, %v3861_v13  ;;  %v3935_v19 = vpop.f32.mrb[49].mxu0 }
0x29dd   :  { %v3936_v37 = vadd.f32 %v3935_v19, %v3861_v13 }
0x29de   :  { %v3945_v29 = vmax.f32 %v3941_v21, 0.0 }
0x29df   :  { %v3944_v2 = vmax.f32 %v3936_v37, 0.0 }
0x29e1   :  { %5276 = vmatprep.mubr.f32.mxu1 %v3944_v2 }
0x29e2   :  { %5277 = vmatmul.mubr.f32.vlgmr.msra.gmra.mrb[46].mxu1 %v3945_v29 }
0x2ab5   :  { %v5278_v0 = vpop.f32.mrb[46].mxu1 }
0x2ab6   :  { %v4039_v35 = vadd.f32 %v5278_v0, %v7460_v28  ;;  %v4029_v26 = vpop.f32.mrb[47].mxu1 }
0x2ab7   :  { %v4038_v54 = vadd.f32 %v4029_v26, %v7462_v50 }
0x2ab8   :  { %v4045_v36 = vadd.f32 %v4042_v46, %v4039_v35 }
0x2ab9   :  { %v4044_v56 = vadd.f32 %v4042_v46, %v4038_v54 }
0x2aba   :  { %v4050_v39 = vsel %vm7822_vm6, %v4045_v36, 0.0 }
0x2abb   :  { %4051 = vadd.xlane.f32.xlu1 %v4050_v39  ;;  %v4047_v58 = vsel %vm7823_vm8, %v4044_v56, 0.0 }
0x2abc   :  { %4048 = vadd.xlane.f32.xlu0 %v4047_v58 }
0x2acc   :  { %4081 = vrot.lane.b32.xlu1 %v4469_v63, %s6094_s25 }
0x2b48   :  { %v4052_v61 = vpop.xlane.xlu1 %4051 }
0x2b49   :  { %v4054_v34 = vmul.f32 0.03125, %v4052_v61  ;;  %v4049_v28 = vpop.xlane.xlu0 %4048 }
0x2b4a   :  { %v4053_v1 = vmul.f32 0.03125, %v4049_v28 }
0x2b4b   :  { %v4056_v27 = vsub.f32 %v4045_v36, %v4054_v34 }
0x2b4c   :  { %v4055_v50 = vsub.f32 %v4044_v56, %v4053_v1  ;;  %v4082_v41 = vpop.permute.xlu1 %4081 }
0x2b4d   :  { %v4058_v10 = vmul.f32 %v4056_v27, %v4056_v27 }
0x2b4e   :  { %v4057_v31 = vmul.f32 %v4055_v50, %v4055_v50 }
0x2b4f   :  { %v4062_v51 = vsel %vm7825_vm0, %v4058_v10, 0.0 }
0x2b50   :  { %v4059_v9 = vsel %vm7824_vm12, %v4057_v31, 0.0 }
0x2b51   :  { %4060 = vadd.xlane.f32.xlu0 %v4059_v9 }
0x2b55   :  { %4063 = vadd.xlane.f32.xlu0 %v4062_v51 }
0x2b6b   :  { %4090 = vrot.lane.b32.xlu0 %v4469_v63, %s6099_s14 }
0x2bde   :  { %v4061_v38 = vpop.xlane.xlu0 %4060 }
0x2bdf   :  { %v4065_v62 = vmul.f32 0.03125, %v4061_v38 }
0x2be1   :  { %v4067_v44 = vadd.f32 1e-05, %v4065_v62 }
0x2be2   :  { %v4064_v4 = vpop.xlane.xlu0 %4063 }
0x2be3   :  { %6088 = vrsqrt.f32 %v4067_v44  ;;  %v4066_v20 = vmul.f32 0.03125, %v4064_v4 }
0x2be5   :  { %v4068_v15 = vadd.f32 1e-05, %v4066_v20 }
0x2be6   :  { %v4091_v24 = vpop.permute.xlu0 %4090 }
0x2be7   :  { %6090 = vrsqrt.f32 %v4068_v15 }
0x2bed   :  { %v6089_v11 = vpop.eup %6088 }
0x2bee   :  { %v4071_v40 = vmul.f32 %v6089_v11, %v4055_v50 }
0x2bf0   :  { %v4079_v14 = vmul.f32 %v4469_v63, %v4071_v40 }
0x2bf1   :  { %v6091_v7 = vpop.eup %6090 }
0x2bf2   :  { %v4072_v32 = vmul.f32 %v6091_v7, %v4056_v27  ;;  %v4084_v22 = vadd.f32 %v4082_v41, %v4079_v14 }
0x2bf4   :  { %5288 = vmatmul.mubr.msk.f32.vlgmr.msra.gmra.mrb[50].mxu0 %vm7826_vm7, %v4084_v22  ;;  %v4080_v53 = vmul.f32 %v4469_v63, %v4072_v32 }
0x2bf5   :  { %5709 = vmatpush3.bf16.msra.mxu0 %v5702_v47  ;;  %5298 = vmatprep.mubr.msk.f32.mxu0 %vm6105_vm3, %v6093_v18 }
0x2bf6   :  { %5710 = vmatprep.subr.bf16.mxu0 %v6104_v42  ;;  %v4085_v12 = vadd.f32 %v4082_v41, %v4080_v53 }
0x2bf9   :  { %5712 = vmatpush3.bf16.msra.mxu0 %v5705_v5 }
0x2bfc   :  { %5299 = vmatmul.mubr.msk.f32.vlgmr.msra.gmra.mrb[52].mxu0 %vm7827_vm15, %v4085_v12 }
0x2cc7   :  { %v4162_v6 = vpop.f32.mrb[50].mxu0 }
0x2cc8   :  { %v4163_v59 = vadd.f32 %v4162_v6, %v4091_v24  ;;  %v5289_v30 = vpop.f32.mrb[51].mxu0 }
0x2ccf   :  { %v4235_v33 = vpop.f32.mrb[52].mxu0 }
0x2cd0   :  { %v4236_v60 = vadd.f32 %v4235_v33, %v4091_v24  ;;  %v5300_v55 = vpop.f32.mrb[53].mxu0 }
0x2cd2   :  { %4240 = vrot.lane.b32.xlu1 %v4236_v60, %s6099_s14 }
0x2d44   :  { %v4241_v8 = vpop.permute.xlu1 %4240 }
0x2d45   :  { %v4243_v49 = vsel %vm7828_vm2, %v4163_v59, %v4241_v8 }
0x2d46   :  { %4244 = vst [vmem:[%s7601_s7] sm:$0xff] %v4243_v49 }

</bundles_post_ra>
